<compile_context>
chip_gen: v5e
topology: v5e:2x2
jax: 0.10.0
libtpu: 0.0.40
codegen_flags: <defaults>
</compile_context>

<pallas_src>
import jax
import jax.numpy as jnp
from jax.experimental import pallas as pl
from jax.experimental.pallas import tpu as pltpu


KSIZE = 7
PAD = 3


def _make_kernel(C, H, W, c_chunk):
    HW = H * W
    Wp = W + 2 * PAD

    def kernel(x_ref, w_ref, b_ref, o_ref, pad_ref, attn_ref):
        # x_ref   : VMEM [Bblk, C, HW]        lane-dense block of batch elements
        # w_ref   : SMEM [2*7*7]              flattened OIHW conv1 weight (O=1 squeezed)
        # b_ref   : SMEM [1]                  conv1 bias
        # o_ref   : VMEM [Bblk, C, HW]
        # pad_ref : VMEM [Bblk, 2, H+6, W+6]  zero-bordered pooled maps (f32)
        # attn_ref: VMEM [Bblk, 1, HW]        flat attention map (f32)
        Bblk = x_ref.shape[0]

        # ---- channel mean / max, chunked over C (keepdims keeps Bblk leading) ----
        s = jnp.zeros((Bblk, 1, HW), jnp.float32)
        mx = jnp.full((Bblk, 1, HW), -jnp.inf, dtype=jnp.float32)
        for c0 in range(0, C, c_chunk):
            c1 = min(c0 + c_chunk, C)
            xc = x_ref[:, c0:c1, :].astype(jnp.float32)
            s = s + jnp.sum(xc, axis=1, keepdims=True)
            mx = jnp.maximum(mx, jnp.max(xc, axis=1, keepdims=True))
        avg = s * (1.0 / C)

        # ---- re-zero only the 3-wide border of the pad scratch; the interior is
        #      fully overwritten below every grid step ----
        pad_ref[:, :, :PAD, :] = jnp.zeros((Bblk, 2, PAD, Wp), jnp.float32)
        pad_ref[:, :, PAD + H:, :] = jnp.zeros((Bblk, 2, PAD, Wp), jnp.float32)
        pad_ref[:, :, PAD:PAD + H, :PAD] = jnp.zeros((Bblk, 2, H, PAD), jnp.float32)
        pad_ref[:, :, PAD:PAD + H, PAD + W:] = jnp.zeros((Bblk, 2, H, PAD), jnp.float32)

        # ---- scatter pooled rows into the [H, W] interior of the padded scratch ----
        for h in range(H):
            pad_ref[:, 0:1, PAD + h, PAD:PAD + W] = avg[:, :, h * W:(h + 1) * W]
            pad_ref[:, 1:2, PAD + h, PAD:PAD + W] = mx[:, :, h * W:(h + 1) * W]

        # ---- 7x7 conv (2 -> 1 channels): hoist the 7 kw lane shifts per channel,
        #      the inner kh loop only takes sublane slices of the loaded value ----
        acc = jnp.full((Bblk, 1, H, W), b_ref[0], dtype=jnp.float32)
        for ci in range(2):
            for kw in range(KSIZE):
                col = pad_ref[:, ci:ci + 1, :, kw:kw + W]        # [Bblk, 1, H+6, W]
                for kh in range(KSIZE):
                    wgt = w_ref[ci * KSIZE * KSIZE + kh * KSIZE + kw]
                    acc = acc + wgt * col[:, :, kh:kh + H, :]
        attn2d = jax.nn.sigmoid(acc)                             # [Bblk, 1, H, W]

        # ---- gather attention rows back to the flat lane-dense layout ----
        for h in range(H):
            attn_ref[:, :, h * W:(h + 1) * W] = attn2d[:, :, h, :]
        attn = attn_ref[...]                                     # [Bblk, 1, HW]

        # ---- x * attn, chunked over C; full-width lane-dense output stores ----
        for c0 in range(0, C, c_chunk):
            c1 = min(c0 + c_chunk, C)
            xc = x_ref[:, c0:c1, :].astype(jnp.float32)
            o_ref[:, c0:c1, :] = (xc * attn).astype(o_ref.dtype)

    return kernel


def _choose_bblk(B, bmax):
    """Largest divisor of B within the VMEM budget, preferring >= 2 grid steps."""
    divs = [d for d in range(1, B + 1) if B % d == 0 and d <= bmax]
    if not divs:
        return 1
    multi = [d for d in divs if B // d >= 2]
    return max(multi) if multi else max(divs)


def spatial_attention(x, conv_w, conv_b):
    """x: [B, C, H, W]; conv_w: [1, 2, 7, 7] (OIHW); conv_b: [1]."""
    B, C, H, W = x.shape
    HW = H * W
    x_flat = x.reshape(B, C, HW)                        # free: trailing-dims merge
    w_flat = conv_w.reshape(-1).astype(jnp.float32)     # [98]
    b = conv_b.astype(jnp.float32)                      # [1]

    itemsize = x.dtype.itemsize
    # in+out blocks, double buffered: 4 * block bytes. Budget is conservative so the
    # same sizing is safe on v7x's 64 MiB VMEM as well as v5e/v6e.
    data_budget = 32 * 1024 * 1024
    per_batch_elem = 4 * C * HW * itemsize
    bmax = max(1, data_budget // per_batch_elem)
    bblk = _choose_bblk(B, bmax)
    grid = (B // bblk,)

    block_bytes = bblk * C * HW * itemsize
    scratch_bytes = bblk * (2 * (H + 2 * PAD) * (W + 2 * PAD) + HW) * 4
    needed = 4 * block_bytes + scratch_bytes + (4 << 20)
    vmem_limit = int(min(48 << 20, max(32 << 20, needed)))

    c_chunk = max(1, min(C, 8))
    kernel = _make_kernel(C, H, W, c_chunk)

    grid_spec = pltpu.PrefetchScalarGridSpec(
        num_scalar_prefetch=0,
        grid=grid,
        in_specs=[
            pl.BlockSpec((bblk, C, HW), lambda i: (i, 0, 0)),
            pl.BlockSpec(memory_space=pltpu.MemorySpace.SMEM),
            pl.BlockSpec(memory_space=pltpu.MemorySpace.SMEM),
        ],
        out_specs=pl.BlockSpec((bblk, C, HW), lambda i: (i, 0, 0)),
        scratch_shapes=[
            pltpu.VMEM((bblk, 2, H + 2 * PAD, W + 2 * PAD), jnp.float32),
            pltpu.VMEM((bblk, 1, HW), jnp.float32),
        ],
    )

    out_flat = pl.pallas_call(
        kernel,
        out_shape=jax.ShapeDtypeStruct((B, C, HW), x.dtype),
        grid_spec=grid_spec,
        compiler_params=pltpu.CompilerParams(
            dimension_semantics=("parallel",),
            vmem_limit_bytes=vmem_limit,
        ),
    )(x_flat, w_flat, b)
    return out_flat.reshape(B, C, H, W)


def spatial_attention_ref(x, conv_w, conv_b):
    avg = jnp.mean(x, axis=1, keepdims=True)
    mx = jnp.max(x, axis=1, keepdims=True)
    att_in = jnp.concatenate([avg, mx], axis=1)
    conv = jax.lax.conv_general_dilated(
        att_in, conv_w, window_strides=(1, 1),
        padding=((PAD, PAD), (PAD, PAD)),
        dimension_numbers=("NCHW", "OIHW", "NCHW"),
    ) + conv_b.reshape(1, 1, 1, 1)
    attn = jax.nn.sigmoid(conv)
    return x * attn


if __name__ == "__main__":
    key = jax.random.PRNGKey(0)
    kx, kwt, kb = jax.random.split(key, 3)

    B, C, H, W = 2, 4, 16, 16
    x = jax.random.normal(kx, (B, C, H, W), dtype=jnp.float32)

    # Deterministic parameter init (shapes from nn.Conv2d(2, 1, 7, padding=3)).
    conv_w = jax.random.normal(kwt, (1, 2, KSIZE, KSIZE), dtype=jnp.float32) * 0.1
    conv_b = jax.random.normal(kb, (1,), dtype=jnp.float32) * 0.1

    out = spatial_attention(x, conv_w, conv_b)
    out = jax.block_until_ready(out)

    ref = spatial_attention_ref(x, conv_w, conv_b)
    assert out.shape == (B, C, H, W)
    assert jnp.allclose(out, ref, atol=1e-5, rtol=1e-5), "mismatch vs JAX reference"

    print("KERNEL_OK")
</pallas_src>

<mosaic_0001>
module attributes {stable_mosaic.version = 11 : i64} {
  func.func @kernel(%arg0: i32, %arg1: memref<1x4x256xf32, #tpu.memory_space<vmem>>, %arg2: memref<98xf32, #tpu.memory_space<smem>>, %arg3: memref<1xf32, #tpu.memory_space<smem>>, %arg4: memref<1x4x256xf32, #tpu.memory_space<vmem>>, %arg5: memref<1x2x22x22xf32, #tpu.memory_space<vmem>>, %arg6: memref<1x1x256xf32, #tpu.memory_space<vmem>>) attributes {dimension_semantics = [#tpu.dimension_semantics<parallel>], iteration_bounds = array<i64: 2>, scalar_prefetch = 0 : i64, scratch_operands = 2 : i64, tpu.core_type = #tpu.core_type<tc>, window_params = [{transform_indices = @transform_0, window_bounds = array<i64: 1, 4, 256>}, {transform_indices = @transform_1, window_bounds = array<i64: 98>}, {transform_indices = @transform_2, window_bounds = array<i64: 1>}, {transform_indices = @transform_3, window_bounds = array<i64: 1, 4, 256>}]} {
    %cst = arith.constant 0.000000e+00 : f32
    %0 = vector.broadcast %cst : f32 to vector<1x1x256xf32>
    %cst_0 = arith.constant 0xFF800000 : f32
    %1 = vector.broadcast %cst_0 : f32 to vector<1x1x256xf32>
    %c0 = arith.constant 0 : index
    %c0_1 = arith.constant 0 : index
    %c0_2 = arith.constant 0 : index
    %2 = vector.load %arg1[%c0, %c0_1, %c0_2] : memref<1x4x256xf32, #tpu.memory_space<vmem>>, vector<1x4x256xf32>
    %cst_3 = arith.constant dense<0.000000e+00> : vector<1x256xf32>
    %3 = vector.multi_reduction <add>, %2, %cst_3 [1] : vector<1x4x256xf32> to vector<1x256xf32>
    %4 = vector.shape_cast %3 : vector<1x256xf32> to vector<1x1x256xf32>
    %5 = arith.addf %0, %4 : vector<1x1x256xf32>
    %cst_4 = arith.constant dense<0xFF800000> : vector<1x256xf32>
    %6 = vector.multi_reduction <maximumf>, %2, %cst_4 [1] : vector<1x4x256xf32> to vector<1x256xf32>
    %7 = vector.shape_cast %6 : vector<1x256xf32> to vector<1x1x256xf32>
    %8 = arith.maximumf %1, %7 : vector<1x1x256xf32>
    %cst_5 = arith.constant 2.500000e-01 : f32
    %9 = vector.broadcast %cst_5 : f32 to vector<1x1x256xf32>
    %10 = arith.mulf %5, %9 : vector<1x1x256xf32>
    %cst_6 = arith.constant 0.000000e+00 : f32
    %11 = vector.broadcast %cst_6 : f32 to vector<1x2x3x22xf32>
    %c0_7 = arith.constant 0 : index
    %c0_8 = arith.constant 0 : index
    %c0_9 = arith.constant 0 : index
    %c0_10 = arith.constant 0 : index
    %12 = vector.load %arg5[%c0_7, %c0_8, %c0_9, %c0_10] : memref<1x2x22x22xf32, #tpu.memory_space<vmem>>, vector<1x2x3x22xf32>
    tpu.vector_store %arg5[%c0_7, %c0_8, %c0_9, %c0_10], %11 {strides = array<i32>} : memref<1x2x22x22xf32, #tpu.memory_space<vmem>>, vector<1x2x3x22xf32>,
    %cst_11 = arith.constant 0.000000e+00 : f32
    %13 = vector.broadcast %cst_11 : f32 to vector<1x2x3x22xf32>
    %c0_12 = arith.constant 0 : index
    %c0_13 = arith.constant 0 : index
    %c19 = arith.constant 19 : index
    %c0_14 = arith.constant 0 : index
    %14 = vector.load %arg5[%c0_12, %c0_13, %c19, %c0_14] : memref<1x2x22x22xf32, #tpu.memory_space<vmem>>, vector<1x2x3x22xf32>
    tpu.vector_store %arg5[%c0_12, %c0_13, %c19, %c0_14], %13 {strides = array<i32>} : memref<1x2x22x22xf32, #tpu.memory_space<vmem>>, vector<1x2x3x22xf32>,
    %cst_15 = arith.constant 0.000000e+00 : f32
    %15 = vector.broadcast %cst_15 : f32 to vector<1x2x16x3xf32>
    %c0_16 = arith.constant 0 : index
    %c0_17 = arith.constant 0 : index
    %c3 = arith.constant 3 : index
    %c0_18 = arith.constant 0 : index
    %16 = vector.load %arg5[%c0_16, %c0_17, %c3, %c0_18] : memref<1x2x22x22xf32, #tpu.memory_space<vmem>>, vector<1x2x16x3xf32>
    tpu.vector_store %arg5[%c0_16, %c0_17, %c3, %c0_18], %15 {strides = array<i32>} : memref<1x2x22x22xf32, #tpu.memory_space<vmem>>, vector<1x2x16x3xf32>,
    %cst_19 = arith.constant 0.000000e+00 : f32
    %17 = vector.broadcast %cst_19 : f32 to vector<1x2x16x3xf32>
    %c0_20 = arith.constant 0 : index
    %c0_21 = arith.constant 0 : index
    %c3_22 = arith.constant 3 : index
    %c19_23 = arith.constant 19 : index
    %18 = vector.load %arg5[%c0_20, %c0_21, %c3_22, %c19_23] : memref<1x2x22x22xf32, #tpu.memory_space<vmem>>, vector<1x2x16x3xf32>
    tpu.vector_store %arg5[%c0_20, %c0_21, %c3_22, %c19_23], %17 {strides = array<i32>} : memref<1x2x22x22xf32, #tpu.memory_space<vmem>>, vector<1x2x16x3xf32>,
    %19 = vector.extract_strided_slice %10 {offsets = [0, 0, 0], sizes = [1, 1, 16], strides = [1, 1, 1]} : vector<1x1x256xf32> to vector<1x1x16xf32>
    %c0_24 = arith.constant 0 : index
    %c0_25 = arith.constant 0 : index
    %c3_26 = arith.constant 3 : index
    %c3_27 = arith.constant 3 : index
    %20 = vector.load %arg5[%c0_24, %c0_25, %c3_26, %c3_27] : memref<1x2x22x22xf32, #tpu.memory_space<vmem>>, vector<1x1x1x16xf32>
    %21 = vector.shape_cast %20 : vector<1x1x1x16xf32> to vector<1x1x16xf32>
    %22 = vector.shape_cast %19 : vector<1x1x16xf32> to vector<1x1x1x16xf32>
    tpu.vector_store %arg5[%c0_24, %c0_25, %c3_26, %c3_27], %22 {strides = array<i32>} : memref<1x2x22x22xf32, #tpu.memory_space<vmem>>, vector<1x1x1x16xf32>,
    %23 = vector.extract_strided_slice %8 {offsets = [0, 0, 0], sizes = [1, 1, 16], strides = [1, 1, 1]} : vector<1x1x256xf32> to vector<1x1x16xf32>
    %c0_28 = arith.constant 0 : index
    %c1 = arith.constant 1 : index
    %c3_29 = arith.constant 3 : index
    %c3_30 = arith.constant 3 : index
    %24 = vector.load %arg5[%c0_28, %c1, %c3_29, %c3_30] : memref<1x2x22x22xf32, #tpu.memory_space<vmem>>, vector<1x1x1x16xf32>
    %25 = vector.shape_cast %24 : vector<1x1x1x16xf32> to vector<1x1x16xf32>
    %26 = vector.shape_cast %23 : vector<1x1x16xf32> to vector<1x1x1x16xf32>
    tpu.vector_store %arg5[%c0_28, %c1, %c3_29, %c3_30], %26 {strides = array<i32>} : memref<1x2x22x22xf32, #tpu.memory_space<vmem>>, vector<1x1x1x16xf32>,
    %27 = vector.extract_strided_slice %10 {offsets = [0, 0, 16], sizes = [1, 1, 16], strides = [1, 1, 1]} : vector<1x1x256xf32> to vector<1x1x16xf32>
    %c0_31 = arith.constant 0 : index
    %c0_32 = arith.constant 0 : index
    %c4 = arith.constant 4 : index
    %c3_33 = arith.constant 3 : index
    %28 = vector.load %arg5[%c0_31, %c0_32, %c4, %c3_33] : memref<1x2x22x22xf32, #tpu.memory_space<vmem>>, vector<1x1x1x16xf32>
    %29 = vector.shape_cast %28 : vector<1x1x1x16xf32> to vector<1x1x16xf32>
    %30 = vector.shape_cast %27 : vector<1x1x16xf32> to vector<1x1x1x16xf32>
    tpu.vector_store %arg5[%c0_31, %c0_32, %c4, %c3_33], %30 {strides = array<i32>} : memref<1x2x22x22xf32, #tpu.memory_space<vmem>>, vector<1x1x1x16xf32>,
    %31 = vector.extract_strided_slice %8 {offsets = [0, 0, 16], sizes = [1, 1, 16], strides = [1, 1, 1]} : vector<1x1x256xf32> to vector<1x1x16xf32>
    %c0_34 = arith.constant 0 : index
    %c1_35 = arith.constant 1 : index
    %c4_36 = arith.constant 4 : index
    %c3_37 = arith.constant 3 : index
    %32 = vector.load %arg5[%c0_34, %c1_35, %c4_36, %c3_37] : memref<1x2x22x22xf32, #tpu.memory_space<vmem>>, vector<1x1x1x16xf32>
    %33 = vector.shape_cast %32 : vector<1x1x1x16xf32> to vector<1x1x16xf32>
    %34 = vector.shape_cast %31 : vector<1x1x16xf32> to vector<1x1x1x16xf32>
    tpu.vector_store %arg5[%c0_34, %c1_35, %c4_36, %c3_37], %34 {strides = array<i32>} : memref<1x2x22x22xf32, #tpu.memory_space<vmem>>, vector<1x1x1x16xf32>,
    %35 = vector.extract_strided_slice %10 {offsets = [0, 0, 32], sizes = [1, 1, 16], strides = [1, 1, 1]} : vector<1x1x256xf32> to vector<1x1x16xf32>
    %c0_38 = arith.constant 0 : index
    %c0_39 = arith.constant 0 : index
    %c5 = arith.constant 5 : index
    %c3_40 = arith.constant 3 : index
    %36 = vector.load %arg5[%c0_38, %c0_39, %c5, %c3_40] : memref<1x2x22x22xf32, #tpu.memory_space<vmem>>, vector<1x1x1x16xf32>
    %37 = vector.shape_cast %36 : vector<1x1x1x16xf32> to vector<1x1x16xf32>
    %38 = vector.shape_cast %35 : vector<1x1x16xf32> to vector<1x1x1x16xf32>
    tpu.vector_store %arg5[%c0_38, %c0_39, %c5, %c3_40], %38 {strides = array<i32>} : memref<1x2x22x22xf32, #tpu.memory_space<vmem>>, vector<1x1x1x16xf32>,
    %39 = vector.extract_strided_slice %8 {offsets = [0, 0, 32], sizes = [1, 1, 16], strides = [1, 1, 1]} : vector<1x1x256xf32> to vector<1x1x16xf32>
    %c0_41 = arith.constant 0 : index
    %c1_42 = arith.constant 1 : index
    %c5_43 = arith.constant 5 : index
    %c3_44 = arith.constant 3 : index
    %40 = vector.load %arg5[%c0_41, %c1_42, %c5_43, %c3_44] : memref<1x2x22x22xf32, #tpu.memory_space<vmem>>, vector<1x1x1x16xf32>
    %41 = vector.shape_cast %40 : vector<1x1x1x16xf32> to vector<1x1x16xf32>
    %42 = vector.shape_cast %39 : vector<1x1x16xf32> to vector<1x1x1x16xf32>
    tpu.vector_store %arg5[%c0_41, %c1_42, %c5_43, %c3_44], %42 {strides = array<i32>} : memref<1x2x22x22xf32, #tpu.memory_space<vmem>>, vector<1x1x1x16xf32>,
    %43 = vector.extract_strided_slice %10 {offsets = [0, 0, 48], sizes = [1, 1, 16], strides = [1, 1, 1]} : vector<1x1x256xf32> to vector<1x1x16xf32>
    %c0_45 = arith.constant 0 : index
    %c0_46 = arith.constant 0 : index
    %c6 = arith.constant 6 : index
    %c3_47 = arith.constant 3 : index
    %44 = vector.load %arg5[%c0_45, %c0_46, %c6, %c3_47] : memref<1x2x22x22xf32, #tpu.memory_space<vmem>>, vector<1x1x1x16xf32>
    %45 = vector.shape_cast %44 : vector<1x1x1x16xf32> to vector<1x1x16xf32>
    %46 = vector.shape_cast %43 : vector<1x1x16xf32> to vector<1x1x1x16xf32>
    tpu.vector_store %arg5[%c0_45, %c0_46, %c6, %c3_47], %46 {strides = array<i32>} : memref<1x2x22x22xf32, #tpu.memory_space<vmem>>, vector<1x1x1x16xf32>,
    %47 = vector.extract_strided_slice %8 {offsets = [0, 0, 48], sizes = [1, 1, 16], strides = [1, 1, 1]} : vector<1x1x256xf32> to vector<1x1x16xf32>
    %c0_48 = arith.constant 0 : index
    %c1_49 = arith.constant 1 : index
    %c6_50 = arith.constant 6 : index
    %c3_51 = arith.constant 3 : index
    %48 = vector.load %arg5[%c0_48, %c1_49, %c6_50, %c3_51] : memref<1x2x22x22xf32, #tpu.memory_space<vmem>>, vector<1x1x1x16xf32>
    %49 = vector.shape_cast %48 : vector<1x1x1x16xf32> to vector<1x1x16xf32>
    %50 = vector.shape_cast %47 : vector<1x1x16xf32> to vector<1x1x1x16xf32>
    tpu.vector_store %arg5[%c0_48, %c1_49, %c6_50, %c3_51], %50 {strides = array<i32>} : memref<1x2x22x22xf32, #tpu.memory_space<vmem>>, vector<1x1x1x16xf32>,
    %51 = vector.extract_strided_slice %10 {offsets = [0, 0, 64], sizes = [1, 1, 16], strides = [1, 1, 1]} : vector<1x1x256xf32> to vector<1x1x16xf32>
    %c0_52 = arith.constant 0 : index
    %c0_53 = arith.constant 0 : index
    %c7 = arith.constant 7 : index
    %c3_54 = arith.constant 3 : index
    %52 = vector.load %arg5[%c0_52, %c0_53, %c7, %c3_54] : memref<1x2x22x22xf32, #tpu.memory_space<vmem>>, vector<1x1x1x16xf32>
    %53 = vector.shape_cast %52 : vector<1x1x1x16xf32> to vector<1x1x16xf32>
    %54 = vector.shape_cast %51 : vector<1x1x16xf32> to vector<1x1x1x16xf32>
    tpu.vector_store %arg5[%c0_52, %c0_53, %c7, %c3_54], %54 {strides = array<i32>} : memref<1x2x22x22xf32, #tpu.memory_space<vmem>>, vector<1x1x1x16xf32>,
    %55 = vector.extract_strided_slice %8 {offsets = [0, 0, 64], sizes = [1, 1, 16], strides = [1, 1, 1]} : vector<1x1x256xf32> to vector<1x1x16xf32>
    %c0_55 = arith.constant 0 : index
    %c1_56 = arith.constant 1 : index
    %c7_57 = arith.constant 7 : index
    %c3_58 = arith.constant 3 : index
    %56 = vector.load %arg5[%c0_55, %c1_56, %c7_57, %c3_58] : memref<1x2x22x22xf32, #tpu.memory_space<vmem>>, vector<1x1x1x16xf32>
    %57 = vector.shape_cast %56 : vector<1x1x1x16xf32> to vector<1x1x16xf32>
    %58 = vector.shape_cast %55 : vector<1x1x16xf32> to vector<1x1x1x16xf32>
    tpu.vector_store %arg5[%c0_55, %c1_56, %c7_57, %c3_58], %58 {strides = array<i32>} : memref<1x2x22x22xf32, #tpu.memory_space<vmem>>, vector<1x1x1x16xf32>,
    %59 = vector.extract_strided_slice %10 {offsets = [0, 0, 80], sizes = [1, 1, 16], strides = [1, 1, 1]} : vector<1x1x256xf32> to vector<1x1x16xf32>
    %c0_59 = arith.constant 0 : index
    %c0_60 = arith.constant 0 : index
    %c8 = arith.constant 8 : index
    %c3_61 = arith.constant 3 : index
    %60 = vector.load %arg5[%c0_59, %c0_60, %c8, %c3_61] : memref<1x2x22x22xf32, #tpu.memory_space<vmem>>, vector<1x1x1x16xf32>
    %61 = vector.shape_cast %60 : vector<1x1x1x16xf32> to vector<1x1x16xf32>
    %62 = vector.shape_cast %59 : vector<1x1x16xf32> to vector<1x1x1x16xf32>
    tpu.vector_store %arg5[%c0_59, %c0_60, %c8, %c3_61], %62 {strides = array<i32>} : memref<1x2x22x22xf32, #tpu.memory_space<vmem>>, vector<1x1x1x16xf32>,
    %63 = vector.extract_strided_slice %8 {offsets = [0, 0, 80], sizes = [1, 1, 16], strides = [1, 1, 1]} : vector<1x1x256xf32> to vector<1x1x16xf32>
    %c0_62 = arith.constant 0 : index
    %c1_63 = arith.constant 1 : index
    %c8_64 = arith.constant 8 : index
    %c3_65 = arith.constant 3 : index
    %64 = vector.load %arg5[%c0_62, %c1_63, %c8_64, %c3_65] : memref<1x2x22x22xf32, #tpu.memory_space<vmem>>, vector<1x1x1x16xf32>
    %65 = vector.shape_cast %64 : vector<1x1x1x16xf32> to vector<1x1x16xf32>
    %66 = vector.shape_cast %63 : vector<1x1x16xf32> to vector<1x1x1x16xf32>
    tpu.vector_store %arg5[%c0_62, %c1_63, %c8_64, %c3_65], %66 {strides = array<i32>} : memref<1x2x22x22xf32, #tpu.memory_space<vmem>>, vector<1x1x1x16xf32>,
    %67 = vector.extract_strided_slice %10 {offsets = [0, 0, 96], sizes = [1, 1, 16], strides = [1, 1, 1]} : vector<1x1x256xf32> to vector<1x1x16xf32>
    %c0_66 = arith.constant 0 : index
    %c0_67 = arith.constant 0 : index
    %c9 = arith.constant 9 : index
    %c3_68 = arith.constant 3 : index
    %68 = vector.load %arg5[%c0_66, %c0_67, %c9, %c3_68] : memref<1x2x22x22xf32, #tpu.memory_space<vmem>>, vector<1x1x1x16xf32>
    %69 = vector.shape_cast %68 : vector<1x1x1x16xf32> to vector<1x1x16xf32>
    %70 = vector.shape_cast %67 : vector<1x1x16xf32> to vector<1x1x1x16xf32>
    tpu.vector_store %arg5[%c0_66, %c0_67, %c9, %c3_68], %70 {strides = array<i32>} : memref<1x2x22x22xf32, #tpu.memory_space<vmem>>, vector<1x1x1x16xf32>,
    %71 = vector.extract_strided_slice %8 {offsets = [0, 0, 96], sizes = [1, 1, 16], strides = [1, 1, 1]} : vector<1x1x256xf32> to vector<1x1x16xf32>
    %c0_69 = arith.constant 0 : index
    %c1_70 = arith.constant 1 : index
    %c9_71 = arith.constant 9 : index
    %c3_72 = arith.constant 3 : index
    %72 = vector.load %arg5[%c0_69, %c1_70, %c9_71, %c3_72] : memref<1x2x22x22xf32, #tpu.memory_space<vmem>>, vector<1x1x1x16xf32>
    %73 = vector.shape_cast %72 : vector<1x1x1x16xf32> to vector<1x1x16xf32>
    %74 = vector.shape_cast %71 : vector<1x1x16xf32> to vector<1x1x1x16xf32>
    tpu.vector_store %arg5[%c0_69, %c1_70, %c9_71, %c3_72], %74 {strides = array<i32>} : memref<1x2x22x22xf32, #tpu.memory_space<vmem>>, vector<1x1x1x16xf32>,
    %75 = vector.extract_strided_slice %10 {offsets = [0, 0, 112], sizes = [1, 1, 16], strides = [1, 1, 1]} : vector<1x1x256xf32> to vector<1x1x16xf32>
    %c0_73 = arith.constant 0 : index
    %c0_74 = arith.constant 0 : index
    %c10 = arith.constant 10 : index
    %c3_75 = arith.constant 3 : index
    %76 = vector.load %arg5[%c0_73, %c0_74, %c10, %c3_75] : memref<1x2x22x22xf32, #tpu.memory_space<vmem>>, vector<1x1x1x16xf32>
    %77 = vector.shape_cast %76 : vector<1x1x1x16xf32> to vector<1x1x16xf32>
    %78 = vector.shape_cast %75 : vector<1x1x16xf32> to vector<1x1x1x16xf32>
    tpu.vector_store %arg5[%c0_73, %c0_74, %c10, %c3_75], %78 {strides = array<i32>} : memref<1x2x22x22xf32, #tpu.memory_space<vmem>>, vector<1x1x1x16xf32>,
    %79 = vector.extract_strided_slice %8 {offsets = [0, 0, 112], sizes = [1, 1, 16], strides = [1, 1, 1]} : vector<1x1x256xf32> to vector<1x1x16xf32>
    %c0_76 = arith.constant 0 : index
    %c1_77 = arith.constant 1 : index
    %c10_78 = arith.constant 10 : index
    %c3_79 = arith.constant 3 : index
    %80 = vector.load %arg5[%c0_76, %c1_77, %c10_78, %c3_79] : memref<1x2x22x22xf32, #tpu.memory_space<vmem>>, vector<1x1x1x16xf32>
    %81 = vector.shape_cast %80 : vector<1x1x1x16xf32> to vector<1x1x16xf32>
    %82 = vector.shape_cast %79 : vector<1x1x16xf32> to vector<1x1x1x16xf32>
    tpu.vector_store %arg5[%c0_76, %c1_77, %c10_78, %c3_79], %82 {strides = array<i32>} : memref<1x2x22x22xf32, #tpu.memory_space<vmem>>, vector<1x1x1x16xf32>,
    %83 = vector.extract_strided_slice %10 {offsets = [0, 0, 128], sizes = [1, 1, 16], strides = [1, 1, 1]} : vector<1x1x256xf32> to vector<1x1x16xf32>
    %c0_80 = arith.constant 0 : index
    %c0_81 = arith.constant 0 : index
    %c11 = arith.constant 11 : index
    %c3_82 = arith.constant 3 : index
    %84 = vector.load %arg5[%c0_80, %c0_81, %c11, %c3_82] : memref<1x2x22x22xf32, #tpu.memory_space<vmem>>, vector<1x1x1x16xf32>
    %85 = vector.shape_cast %84 : vector<1x1x1x16xf32> to vector<1x1x16xf32>
    %86 = vector.shape_cast %83 : vector<1x1x16xf32> to vector<1x1x1x16xf32>
    tpu.vector_store %arg5[%c0_80, %c0_81, %c11, %c3_82], %86 {strides = array<i32>} : memref<1x2x22x22xf32, #tpu.memory_space<vmem>>, vector<1x1x1x16xf32>,
    %87 = vector.extract_strided_slice %8 {offsets = [0, 0, 128], sizes = [1, 1, 16], strides = [1, 1, 1]} : vector<1x1x256xf32> to vector<1x1x16xf32>
    %c0_83 = arith.constant 0 : index
    %c1_84 = arith.constant 1 : index
    %c11_85 = arith.constant 11 : index
    %c3_86 = arith.constant 3 : index
    %88 = vector.load %arg5[%c0_83, %c1_84, %c11_85, %c3_86] : memref<1x2x22x22xf32, #tpu.memory_space<vmem>>, vector<1x1x1x16xf32>
    %89 = vector.shape_cast %88 : vector<1x1x1x16xf32> to vector<1x1x16xf32>
    %90 = vector.shape_cast %87 : vector<1x1x16xf32> to vector<1x1x1x16xf32>
    tpu.vector_store %arg5[%c0_83, %c1_84, %c11_85, %c3_86], %90 {strides = array<i32>} : memref<1x2x22x22xf32, #tpu.memory_space<vmem>>, vector<1x1x1x16xf32>,
    %91 = vector.extract_strided_slice %10 {offsets = [0, 0, 144], sizes = [1, 1, 16], strides = [1, 1, 1]} : vector<1x1x256xf32> to vector<1x1x16xf32>
    %c0_87 = arith.constant 0 : index
    %c0_88 = arith.constant 0 : index
    %c12 = arith.constant 12 : index
    %c3_89 = arith.constant 3 : index
    %92 = vector.load %arg5[%c0_87, %c0_88, %c12, %c3_89] : memref<1x2x22x22xf32, #tpu.memory_space<vmem>>, vector<1x1x1x16xf32>
    %93 = vector.shape_cast %92 : vector<1x1x1x16xf32> to vector<1x1x16xf32>
    %94 = vector.shape_cast %91 : vector<1x1x16xf32> to vector<1x1x1x16xf32>
    tpu.vector_store %arg5[%c0_87, %c0_88, %c12, %c3_89], %94 {strides = array<i32>} : memref<1x2x22x22xf32, #tpu.memory_space<vmem>>, vector<1x1x1x16xf32>,
    %95 = vector.extract_strided_slice %8 {offsets = [0, 0, 144], sizes = [1, 1, 16], strides = [1, 1, 1]} : vector<1x1x256xf32> to vector<1x1x16xf32>
    %c0_90 = arith.constant 0 : index
    %c1_91 = arith.constant 1 : index
    %c12_92 = arith.constant 12 : index
    %c3_93 = arith.constant 3 : index
    %96 = vector.load %arg5[%c0_90, %c1_91, %c12_92, %c3_93] : memref<1x2x22x22xf32, #tpu.memory_space<vmem>>, vector<1x1x1x16xf32>
    %97 = vector.shape_cast %96 : vector<1x1x1x16xf32> to vector<1x1x16xf32>
    %98 = vector.shape_cast %95 : vector<1x1x16xf32> to vector<1x1x1x16xf32>
    tpu.vector_store %arg5[%c0_90, %c1_91, %c12_92, %c3_93], %98 {strides = array<i32>} : memref<1x2x22x22xf32, #tpu.memory_space<vmem>>, vector<1x1x1x16xf32>,
    %99 = vector.extract_strided_slice %10 {offsets = [0, 0, 160], sizes = [1, 1, 16], strides = [1, 1, 1]} : vector<1x1x256xf32> to vector<1x1x16xf32>
    %c0_94 = arith.constant 0 : index
    %c0_95 = arith.constant 0 : index
    %c13 = arith.constant 13 : index
    %c3_96 = arith.constant 3 : index
    %100 = vector.load %arg5[%c0_94, %c0_95, %c13, %c3_96] : memref<1x2x22x22xf32, #tpu.memory_space<vmem>>, vector<1x1x1x16xf32>
    %101 = vector.shape_cast %100 : vector<1x1x1x16xf32> to vector<1x1x16xf32>
    %102 = vector.shape_cast %99 : vector<1x1x16xf32> to vector<1x1x1x16xf32>
    tpu.vector_store %arg5[%c0_94, %c0_95, %c13, %c3_96], %102 {strides = array<i32>} : memref<1x2x22x22xf32, #tpu.memory_space<vmem>>, vector<1x1x1x16xf32>,
    %103 = vector.extract_strided_slice %8 {offsets = [0, 0, 160], sizes = [1, 1, 16], strides = [1, 1, 1]} : vector<1x1x256xf32> to vector<1x1x16xf32>
    %c0_97 = arith.constant 0 : index
    %c1_98 = arith.constant 1 : index
    %c13_99 = arith.constant 13 : index
    %c3_100 = arith.constant 3 : index
    %104 = vector.load %arg5[%c0_97, %c1_98, %c13_99, %c3_100] : memref<1x2x22x22xf32, #tpu.memory_space<vmem>>, vector<1x1x1x16xf32>
    %105 = vector.shape_cast %104 : vector<1x1x1x16xf32> to vector<1x1x16xf32>
    %106 = vector.shape_cast %103 : vector<1x1x16xf32> to vector<1x1x1x16xf32>
    tpu.vector_store %arg5[%c0_97, %c1_98, %c13_99, %c3_100], %106 {strides = array<i32>} : memref<1x2x22x22xf32, #tpu.memory_space<vmem>>, vector<1x1x1x16xf32>,
    %107 = vector.extract_strided_slice %10 {offsets = [0, 0, 176], sizes = [1, 1, 16], strides = [1, 1, 1]} : vector<1x1x256xf32> to vector<1x1x16xf32>
    %c0_101 = arith.constant 0 : index
    %c0_102 = arith.constant 0 : index
    %c14 = arith.constant 14 : index
    %c3_103 = arith.constant 3 : index
    %108 = vector.load %arg5[%c0_101, %c0_102, %c14, %c3_103] : memref<1x2x22x22xf32, #tpu.memory_space<vmem>>, vector<1x1x1x16xf32>
    %109 = vector.shape_cast %108 : vector<1x1x1x16xf32> to vector<1x1x16xf32>
    %110 = vector.shape_cast %107 : vector<1x1x16xf32> to vector<1x1x1x16xf32>
    tpu.vector_store %arg5[%c0_101, %c0_102, %c14, %c3_103], %110 {strides = array<i32>} : memref<1x2x22x22xf32, #tpu.memory_space<vmem>>, vector<1x1x1x16xf32>,
    %111 = vector.extract_strided_slice %8 {offsets = [0, 0, 176], sizes = [1, 1, 16], strides = [1, 1, 1]} : vector<1x1x256xf32> to vector<1x1x16xf32>
    %c0_104 = arith.constant 0 : index
    %c1_105 = arith.constant 1 : index
    %c14_106 = arith.constant 14 : index
    %c3_107 = arith.constant 3 : index
    %112 = vector.load %arg5[%c0_104, %c1_105, %c14_106, %c3_107] : memref<1x2x22x22xf32, #tpu.memory_space<vmem>>, vector<1x1x1x16xf32>
    %113 = vector.shape_cast %112 : vector<1x1x1x16xf32> to vector<1x1x16xf32>
    %114 = vector.shape_cast %111 : vector<1x1x16xf32> to vector<1x1x1x16xf32>
    tpu.vector_store %arg5[%c0_104, %c1_105, %c14_106, %c3_107], %114 {strides = array<i32>} : memref<1x2x22x22xf32, #tpu.memory_space<vmem>>, vector<1x1x1x16xf32>,
    %115 = vector.extract_strided_slice %10 {offsets = [0, 0, 192], sizes = [1, 1, 16], strides = [1, 1, 1]} : vector<1x1x256xf32> to vector<1x1x16xf32>
    %c0_108 = arith.constant 0 : index
    %c0_109 = arith.constant 0 : index
    %c15 = arith.constant 15 : index
    %c3_110 = arith.constant 3 : index
    %116 = vector.load %arg5[%c0_108, %c0_109, %c15, %c3_110] : memref<1x2x22x22xf32, #tpu.memory_space<vmem>>, vector<1x1x1x16xf32>
    %117 = vector.shape_cast %116 : vector<1x1x1x16xf32> to vector<1x1x16xf32>
    %118 = vector.shape_cast %115 : vector<1x1x16xf32> to vector<1x1x1x16xf32>
    tpu.vector_store %arg5[%c0_108, %c0_109, %c15, %c3_110], %118 {strides = array<i32>} : memref<1x2x22x22xf32, #tpu.memory_space<vmem>>, vector<1x1x1x16xf32>,
    %119 = vector.extract_strided_slice %8 {offsets = [0, 0, 192], sizes = [1, 1, 16], strides = [1, 1, 1]} : vector<1x1x256xf32> to vector<1x1x16xf32>
    %c0_111 = arith.constant 0 : index
    %c1_112 = arith.constant 1 : index
    %c15_113 = arith.constant 15 : index
    %c3_114 = arith.constant 3 : index
    %120 = vector.load %arg5[%c0_111, %c1_112, %c15_113, %c3_114] : memref<1x2x22x22xf32, #tpu.memory_space<vmem>>, vector<1x1x1x16xf32>
    %121 = vector.shape_cast %120 : vector<1x1x1x16xf32> to vector<1x1x16xf32>
    %122 = vector.shape_cast %119 : vector<1x1x16xf32> to vector<1x1x1x16xf32>
    tpu.vector_store %arg5[%c0_111, %c1_112, %c15_113, %c3_114], %122 {strides = array<i32>} : memref<1x2x22x22xf32, #tpu.memory_space<vmem>>, vector<1x1x1x16xf32>,
    %123 = vector.extract_strided_slice %10 {offsets = [0, 0, 208], sizes = [1, 1, 16], strides = [1, 1, 1]} : vector<1x1x256xf32> to vector<1x1x16xf32>
    %c0_115 = arith.constant 0 : index
    %c0_116 = arith.constant 0 : index
    %c16 = arith.constant 16 : index
    %c3_117 = arith.constant 3 : index
    %124 = vector.load %arg5[%c0_115, %c0_116, %c16, %c3_117] : memref<1x2x22x22xf32, #tpu.memory_space<vmem>>, vector<1x1x1x16xf32>
    %125 = vector.shape_cast %124 : vector<1x1x1x16xf32> to vector<1x1x16xf32>
    %126 = vector.shape_cast %123 : vector<1x1x16xf32> to vector<1x1x1x16xf32>
    tpu.vector_store %arg5[%c0_115, %c0_116, %c16, %c3_117], %126 {strides = array<i32>} : memref<1x2x22x22xf32, #tpu.memory_space<vmem>>, vector<1x1x1x16xf32>,
    %127 = vector.extract_strided_slice %8 {offsets = [0, 0, 208], sizes = [1, 1, 16], strides = [1, 1, 1]} : vector<1x1x256xf32> to vector<1x1x16xf32>
    %c0_118 = arith.constant 0 : index
    %c1_119 = arith.constant 1 : index
    %c16_120 = arith.constant 16 : index
    %c3_121 = arith.constant 3 : index
    %128 = vector.load %arg5[%c0_118, %c1_119, %c16_120, %c3_121] : memref<1x2x22x22xf32, #tpu.memory_space<vmem>>, vector<1x1x1x16xf32>
    %129 = vector.shape_cast %128 : vector<1x1x1x16xf32> to vector<1x1x16xf32>
    %130 = vector.shape_cast %127 : vector<1x1x16xf32> to vector<1x1x1x16xf32>
    tpu.vector_store %arg5[%c0_118, %c1_119, %c16_120, %c3_121], %130 {strides = array<i32>} : memref<1x2x22x22xf32, #tpu.memory_space<vmem>>, vector<1x1x1x16xf32>,
    %131 = vector.extract_strided_slice %10 {offsets = [0, 0, 224], sizes = [1, 1, 16], strides = [1, 1, 1]} : vector<1x1x256xf32> to vector<1x1x16xf32>
    %c0_122 = arith.constant 0 : index
    %c0_123 = arith.constant 0 : index
    %c17 = arith.constant 17 : index
    %c3_124 = arith.constant 3 : index
    %132 = vector.load %arg5[%c0_122, %c0_123, %c17, %c3_124] : memref<1x2x22x22xf32, #tpu.memory_space<vmem>>, vector<1x1x1x16xf32>
    %133 = vector.shape_cast %132 : vector<1x1x1x16xf32> to vector<1x1x16xf32>
    %134 = vector.shape_cast %131 : vector<1x1x16xf32> to vector<1x1x1x16xf32>
    tpu.vector_store %arg5[%c0_122, %c0_123, %c17, %c3_124], %134 {strides = array<i32>} : memref<1x2x22x22xf32, #tpu.memory_space<vmem>>, vector<1x1x1x16xf32>,
    %135 = vector.extract_strided_slice %8 {offsets = [0, 0, 224], sizes = [1, 1, 16], strides = [1, 1, 1]} : vector<1x1x256xf32> to vector<1x1x16xf32>
    %c0_125 = arith.constant 0 : index
    %c1_126 = arith.constant 1 : index
    %c17_127 = arith.constant 17 : index
    %c3_128 = arith.constant 3 : index
    %136 = vector.load %arg5[%c0_125, %c1_126, %c17_127, %c3_128] : memref<1x2x22x22xf32, #tpu.memory_space<vmem>>, vector<1x1x1x16xf32>
    %137 = vector.shape_cast %136 : vector<1x1x1x16xf32> to vector<1x1x16xf32>
    %138 = vector.shape_cast %135 : vector<1x1x16xf32> to vector<1x1x1x16xf32>
    tpu.vector_store %arg5[%c0_125, %c1_126, %c17_127, %c3_128], %138 {strides = array<i32>} : memref<1x2x22x22xf32, #tpu.memory_space<vmem>>, vector<1x1x1x16xf32>,
    %139 = vector.extract_strided_slice %10 {offsets = [0, 0, 240], sizes = [1, 1, 16], strides = [1, 1, 1]} : vector<1x1x256xf32> to vector<1x1x16xf32>
    %c0_129 = arith.constant 0 : index
    %c0_130 = arith.constant 0 : index
    %c18 = arith.constant 18 : index
    %c3_131 = arith.constant 3 : index
    %140 = vector.load %arg5[%c0_129, %c0_130, %c18, %c3_131] : memref<1x2x22x22xf32, #tpu.memory_space<vmem>>, vector<1x1x1x16xf32>
    %141 = vector.shape_cast %140 : vector<1x1x1x16xf32> to vector<1x1x16xf32>
    %142 = vector.shape_cast %139 : vector<1x1x16xf32> to vector<1x1x1x16xf32>
    tpu.vector_store %arg5[%c0_129, %c0_130, %c18, %c3_131], %142 {strides = array<i32>} : memref<1x2x22x22xf32, #tpu.memory_space<vmem>>, vector<1x1x1x16xf32>,
    %143 = vector.extract_strided_slice %8 {offsets = [0, 0, 240], sizes = [1, 1, 16], strides = [1, 1, 1]} : vector<1x1x256xf32> to vector<1x1x16xf32>
    %c0_132 = arith.constant 0 : index
    %c1_133 = arith.constant 1 : index
    %c18_134 = arith.constant 18 : index
    %c3_135 = arith.constant 3 : index
    %144 = vector.load %arg5[%c0_132, %c1_133, %c18_134, %c3_135] : memref<1x2x22x22xf32, #tpu.memory_space<vmem>>, vector<1x1x1x16xf32>
    %145 = vector.shape_cast %144 : vector<1x1x1x16xf32> to vector<1x1x16xf32>
    %146 = vector.shape_cast %143 : vector<1x1x16xf32> to vector<1x1x1x16xf32>
    tpu.vector_store %arg5[%c0_132, %c1_133, %c18_134, %c3_135], %146 {strides = array<i32>} : memref<1x2x22x22xf32, #tpu.memory_space<vmem>>, vector<1x1x1x16xf32>,
    %c0_136 = arith.constant 0 : index
    %147 = memref.load %arg3[%c0_136] : memref<1xf32, #tpu.memory_space<smem>>
    %148 = vector.broadcast %147 : f32 to vector<1x1x16x16xf32>
    %c0_137 = arith.constant 0 : index
    %c0_138 = arith.constant 0 : index
    %c0_139 = arith.constant 0 : index
    %c0_140 = arith.constant 0 : index
    %149 = vector.load %arg5[%c0_137, %c0_138, %c0_139, %c0_140] : memref<1x2x22x22xf32, #tpu.memory_space<vmem>>, vector<1x1x22x16xf32>
    %c0_141 = arith.constant 0 : index
    %150 = memref.load %arg2[%c0_141] : memref<98xf32, #tpu.memory_space<smem>>
    %151 = vector.extract_strided_slice %149 {offsets = [0, 0, 0, 0], sizes = [1, 1, 16, 16], strides = [1, 1, 1, 1]} : vector<1x1x22x16xf32> to vector<1x1x16x16xf32>
    %152 = vector.broadcast %150 : f32 to vector<1x1x16x16xf32>
    %153 = arith.mulf %152, %151 : vector<1x1x16x16xf32>
    %154 = arith.addf %148, %153 : vector<1x1x16x16xf32>
    %c7_142 = arith.constant 7 : index
    %155 = memref.load %arg2[%c7_142] : memref<98xf32, #tpu.memory_space<smem>>
    %156 = vector.extract_strided_slice %149 {offsets = [0, 0, 1, 0], sizes = [1, 1, 16, 16], strides = [1, 1, 1, 1]} : vector<1x1x22x16xf32> to vector<1x1x16x16xf32>
    %157 = vector.broadcast %155 : f32 to vector<1x1x16x16xf32>
    %158 = arith.mulf %157, %156 : vector<1x1x16x16xf32>
    %159 = arith.addf %154, %158 : vector<1x1x16x16xf32>
    %c14_143 = arith.constant 14 : index
    %160 = memref.load %arg2[%c14_143] : memref<98xf32, #tpu.memory_space<smem>>
    %161 = vector.extract_strided_slice %149 {offsets = [0, 0, 2, 0], sizes = [1, 1, 16, 16], strides = [1, 1, 1, 1]} : vector<1x1x22x16xf32> to vector<1x1x16x16xf32>
    %162 = vector.broadcast %160 : f32 to vector<1x1x16x16xf32>
    %163 = arith.mulf %162, %161 : vector<1x1x16x16xf32>
    %164 = arith.addf %159, %163 : vector<1x1x16x16xf32>
    %c21 = arith.constant 21 : index
    %165 = memref.load %arg2[%c21] : memref<98xf32, #tpu.memory_space<smem>>
    %166 = vector.extract_strided_slice %149 {offsets = [0, 0, 3, 0], sizes = [1, 1, 16, 16], strides = [1, 1, 1, 1]} : vector<1x1x22x16xf32> to vector<1x1x16x16xf32>
    %167 = vector.broadcast %165 : f32 to vector<1x1x16x16xf32>
    %168 = arith.mulf %167, %166 : vector<1x1x16x16xf32>
    %169 = arith.addf %164, %168 : vector<1x1x16x16xf32>
    %c28 = arith.constant 28 : index
    %170 = memref.load %arg2[%c28] : memref<98xf32, #tpu.memory_space<smem>>
    %171 = vector.extract_strided_slice %149 {offsets = [0, 0, 4, 0], sizes = [1, 1, 16, 16], strides = [1, 1, 1, 1]} : vector<1x1x22x16xf32> to vector<1x1x16x16xf32>
    %172 = vector.broadcast %170 : f32 to vector<1x1x16x16xf32>
    %173 = arith.mulf %172, %171 : vector<1x1x16x16xf32>
    %174 = arith.addf %169, %173 : vector<1x1x16x16xf32>
    %c35 = arith.constant 35 : index
    %175 = memref.load %arg2[%c35] : memref<98xf32, #tpu.memory_space<smem>>
    %176 = vector.extract_strided_slice %149 {offsets = [0, 0, 5, 0], sizes = [1, 1, 16, 16], strides = [1, 1, 1, 1]} : vector<1x1x22x16xf32> to vector<1x1x16x16xf32>
    %177 = vector.broadcast %175 : f32 to vector<1x1x16x16xf32>
    %178 = arith.mulf %177, %176 : vector<1x1x16x16xf32>
    %179 = arith.addf %174, %178 : vector<1x1x16x16xf32>
    %c42 = arith.constant 42 : index
    %180 = memref.load %arg2[%c42] : memref<98xf32, #tpu.memory_space<smem>>
    %181 = vector.extract_strided_slice %149 {offsets = [0, 0, 6, 0], sizes = [1, 1, 16, 16], strides = [1, 1, 1, 1]} : vector<1x1x22x16xf32> to vector<1x1x16x16xf32>
    %182 = vector.broadcast %180 : f32 to vector<1x1x16x16xf32>
    %183 = arith.mulf %182, %181 : vector<1x1x16x16xf32>
    %184 = arith.addf %179, %183 : vector<1x1x16x16xf32>
    %c0_144 = arith.constant 0 : index
    %c0_145 = arith.constant 0 : index
    %c0_146 = arith.constant 0 : index
    %c1_147 = arith.constant 1 : index
    %185 = vector.load %arg5[%c0_144, %c0_145, %c0_146, %c1_147] : memref<1x2x22x22xf32, #tpu.memory_space<vmem>>, vector<1x1x22x16xf32>
    %c1_148 = arith.constant 1 : index
    %186 = memref.load %arg2[%c1_148] : memref<98xf32, #tpu.memory_space<smem>>
    %187 = vector.extract_strided_slice %185 {offsets = [0, 0, 0, 0], sizes = [1, 1, 16, 16], strides = [1, 1, 1, 1]} : vector<1x1x22x16xf32> to vector<1x1x16x16xf32>
    %188 = vector.broadcast %186 : f32 to vector<1x1x16x16xf32>
    %189 = arith.mulf %188, %187 : vector<1x1x16x16xf32>
    %190 = arith.addf %184, %189 : vector<1x1x16x16xf32>
    %c8_149 = arith.constant 8 : index
    %191 = memref.load %arg2[%c8_149] : memref<98xf32, #tpu.memory_space<smem>>
    %192 = vector.extract_strided_slice %185 {offsets = [0, 0, 1, 0], sizes = [1, 1, 16, 16], strides = [1, 1, 1, 1]} : vector<1x1x22x16xf32> to vector<1x1x16x16xf32>
    %193 = vector.broadcast %191 : f32 to vector<1x1x16x16xf32>
    %194 = arith.mulf %193, %192 : vector<1x1x16x16xf32>
    %195 = arith.addf %190, %194 : vector<1x1x16x16xf32>
    %c15_150 = arith.constant 15 : index
    %196 = memref.load %arg2[%c15_150] : memref<98xf32, #tpu.memory_space<smem>>
    %197 = vector.extract_strided_slice %185 {offsets = [0, 0, 2, 0], sizes = [1, 1, 16, 16], strides = [1, 1, 1, 1]} : vector<1x1x22x16xf32> to vector<1x1x16x16xf32>
    %198 = vector.broadcast %196 : f32 to vector<1x1x16x16xf32>
    %199 = arith.mulf %198, %197 : vector<1x1x16x16xf32>
    %200 = arith.addf %195, %199 : vector<1x1x16x16xf32>
    %c22 = arith.constant 22 : index
    %201 = memref.load %arg2[%c22] : memref<98xf32, #tpu.memory_space<smem>>
    %202 = vector.extract_strided_slice %185 {offsets = [0, 0, 3, 0], sizes = [1, 1, 16, 16], strides = [1, 1, 1, 1]} : vector<1x1x22x16xf32> to vector<1x1x16x16xf32>
    %203 = vector.broadcast %201 : f32 to vector<1x1x16x16xf32>
    %204 = arith.mulf %203, %202 : vector<1x1x16x16xf32>
    %205 = arith.addf %200, %204 : vector<1x1x16x16xf32>
    %c29 = arith.constant 29 : index
    %206 = memref.load %arg2[%c29] : memref<98xf32, #tpu.memory_space<smem>>
    %207 = vector.extract_strided_slice %185 {offsets = [0, 0, 4, 0], sizes = [1, 1, 16, 16], strides = [1, 1, 1, 1]} : vector<1x1x22x16xf32> to vector<1x1x16x16xf32>
    %208 = vector.broadcast %206 : f32 to vector<1x1x16x16xf32>
    %209 = arith.mulf %208, %207 : vector<1x1x16x16xf32>
    %210 = arith.addf %205, %209 : vector<1x1x16x16xf32>
    %c36 = arith.constant 36 : index
    %211 = memref.load %arg2[%c36] : memref<98xf32, #tpu.memory_space<smem>>
    %212 = vector.extract_strided_slice %185 {offsets = [0, 0, 5, 0], sizes = [1, 1, 16, 16], strides = [1, 1, 1, 1]} : vector<1x1x22x16xf32> to vector<1x1x16x16xf32>
    %213 = vector.broadcast %211 : f32 to vector<1x1x16x16xf32>
    %214 = arith.mulf %213, %212 : vector<1x1x16x16xf32>
    %215 = arith.addf %210, %214 : vector<1x1x16x16xf32>
    %c43 = arith.constant 43 : index
    %216 = memref.load %arg2[%c43] : memref<98xf32, #tpu.memory_space<smem>>
    %217 = vector.extract_strided_slice %185 {offsets = [0, 0, 6, 0], sizes = [1, 1, 16, 16], strides = [1, 1, 1, 1]} : vector<1x1x22x16xf32> to vector<1x1x16x16xf32>
    %218 = vector.broadcast %216 : f32 to vector<1x1x16x16xf32>
    %219 = arith.mulf %218, %217 : vector<1x1x16x16xf32>
    %220 = arith.addf %215, %219 : vector<1x1x16x16xf32>
    %c0_151 = arith.constant 0 : index
    %c0_152 = arith.constant 0 : index
    %c0_153 = arith.constant 0 : index
    %c2 = arith.constant 2 : index
    %221 = vector.load %arg5[%c0_151, %c0_152, %c0_153, %c2] : memref<1x2x22x22xf32, #tpu.memory_space<vmem>>, vector<1x1x22x16xf32>
    %c2_154 = arith.constant 2 : index
    %222 = memref.load %arg2[%c2_154] : memref<98xf32, #tpu.memory_space<smem>>
    %223 = vector.extract_strided_slice %221 {offsets = [0, 0, 0, 0], sizes = [1, 1, 16, 16], strides = [1, 1, 1, 1]} : vector<1x1x22x16xf32> to vector<1x1x16x16xf32>
    %224 = vector.broadcast %222 : f32 to vector<1x1x16x16xf32>
    %225 = arith.mulf %224, %223 : vector<1x1x16x16xf32>
    %226 = arith.addf %220, %225 : vector<1x1x16x16xf32>
    %c9_155 = arith.constant 9 : index
    %227 = memref.load %arg2[%c9_155] : memref<98xf32, #tpu.memory_space<smem>>
    %228 = vector.extract_strided_slice %221 {offsets = [0, 0, 1, 0], sizes = [1, 1, 16, 16], strides = [1, 1, 1, 1]} : vector<1x1x22x16xf32> to vector<1x1x16x16xf32>
    %229 = vector.broadcast %227 : f32 to vector<1x1x16x16xf32>
    %230 = arith.mulf %229, %228 : vector<1x1x16x16xf32>
    %231 = arith.addf %226, %230 : vector<1x1x16x16xf32>
    %c16_156 = arith.constant 16 : index
    %232 = memref.load %arg2[%c16_156] : memref<98xf32, #tpu.memory_space<smem>>
    %233 = vector.extract_strided_slice %221 {offsets = [0, 0, 2, 0], sizes = [1, 1, 16, 16], strides = [1, 1, 1, 1]} : vector<1x1x22x16xf32> to vector<1x1x16x16xf32>
    %234 = vector.broadcast %232 : f32 to vector<1x1x16x16xf32>
    %235 = arith.mulf %234, %233 : vector<1x1x16x16xf32>
    %236 = arith.addf %231, %235 : vector<1x1x16x16xf32>
    %c23 = arith.constant 23 : index
    %237 = memref.load %arg2[%c23] : memref<98xf32, #tpu.memory_space<smem>>
    %238 = vector.extract_strided_slice %221 {offsets = [0, 0, 3, 0], sizes = [1, 1, 16, 16], strides = [1, 1, 1, 1]} : vector<1x1x22x16xf32> to vector<1x1x16x16xf32>
    %239 = vector.broadcast %237 : f32 to vector<1x1x16x16xf32>
    %240 = arith.mulf %239, %238 : vector<1x1x16x16xf32>
    %241 = arith.addf %236, %240 : vector<1x1x16x16xf32>
    %c30 = arith.constant 30 : index
    %242 = memref.load %arg2[%c30] : memref<98xf32, #tpu.memory_space<smem>>
    %243 = vector.extract_strided_slice %221 {offsets = [0, 0, 4, 0], sizes = [1, 1, 16, 16], strides = [1, 1, 1, 1]} : vector<1x1x22x16xf32> to vector<1x1x16x16xf32>
    %244 = vector.broadcast %242 : f32 to vector<1x1x16x16xf32>
    %245 = arith.mulf %244, %243 : vector<1x1x16x16xf32>
    %246 = arith.addf %241, %245 : vector<1x1x16x16xf32>
    %c37 = arith.constant 37 : index
    %247 = memref.load %arg2[%c37] : memref<98xf32, #tpu.memory_space<smem>>
    %248 = vector.extract_strided_slice %221 {offsets = [0, 0, 5, 0], sizes = [1, 1, 16, 16], strides = [1, 1, 1, 1]} : vector<1x1x22x16xf32> to vector<1x1x16x16xf32>
    %249 = vector.broadcast %247 : f32 to vector<1x1x16x16xf32>
    %250 = arith.mulf %249, %248 : vector<1x1x16x16xf32>
    %251 = arith.addf %246, %250 : vector<1x1x16x16xf32>
    %c44 = arith.constant 44 : index
    %252 = memref.load %arg2[%c44] : memref<98xf32, #tpu.memory_space<smem>>
    %253 = vector.extract_strided_slice %221 {offsets = [0, 0, 6, 0], sizes = [1, 1, 16, 16], strides = [1, 1, 1, 1]} : vector<1x1x22x16xf32> to vector<1x1x16x16xf32>
    %254 = vector.broadcast %252 : f32 to vector<1x1x16x16xf32>
    %255 = arith.mulf %254, %253 : vector<1x1x16x16xf32>
    %256 = arith.addf %251, %255 : vector<1x1x16x16xf32>
    %c0_157 = arith.constant 0 : index
    %c0_158 = arith.constant 0 : index
    %c0_159 = arith.constant 0 : index
    %c3_160 = arith.constant 3 : index
    %257 = vector.load %arg5[%c0_157, %c0_158, %c0_159, %c3_160] : memref<1x2x22x22xf32, #tpu.memory_space<vmem>>, vector<1x1x22x16xf32>
    %c3_161 = arith.constant 3 : index
    %258 = memref.load %arg2[%c3_161] : memref<98xf32, #tpu.memory_space<smem>>
    %259 = vector.extract_strided_slice %257 {offsets = [0, 0, 0, 0], sizes = [1, 1, 16, 16], strides = [1, 1, 1, 1]} : vector<1x1x22x16xf32> to vector<1x1x16x16xf32>
    %260 = vector.broadcast %258 : f32 to vector<1x1x16x16xf32>
    %261 = arith.mulf %260, %259 : vector<1x1x16x16xf32>
    %262 = arith.addf %256, %261 : vector<1x1x16x16xf32>
    %c10_162 = arith.constant 10 : index
    %263 = memref.load %arg2[%c10_162] : memref<98xf32, #tpu.memory_space<smem>>
    %264 = vector.extract_strided_slice %257 {offsets = [0, 0, 1, 0], sizes = [1, 1, 16, 16], strides = [1, 1, 1, 1]} : vector<1x1x22x16xf32> to vector<1x1x16x16xf32>
    %265 = vector.broadcast %263 : f32 to vector<1x1x16x16xf32>
    %266 = arith.mulf %265, %264 : vector<1x1x16x16xf32>
    %267 = arith.addf %262, %266 : vector<1x1x16x16xf32>
    %c17_163 = arith.constant 17 : index
    %268 = memref.load %arg2[%c17_163] : memref<98xf32, #tpu.memory_space<smem>>
    %269 = vector.extract_strided_slice %257 {offsets = [0, 0, 2, 0], sizes = [1, 1, 16, 16], strides = [1, 1, 1, 1]} : vector<1x1x22x16xf32> to vector<1x1x16x16xf32>
    %270 = vector.broadcast %268 : f32 to vector<1x1x16x16xf32>
    %271 = arith.mulf %270, %269 : vector<1x1x16x16xf32>
    %272 = arith.addf %267, %271 : vector<1x1x16x16xf32>
    %c24 = arith.constant 24 : index
    %273 = memref.load %arg2[%c24] : memref<98xf32, #tpu.memory_space<smem>>
    %274 = vector.extract_strided_slice %257 {offsets = [0, 0, 3, 0], sizes = [1, 1, 16, 16], strides = [1, 1, 1, 1]} : vector<1x1x22x16xf32> to vector<1x1x16x16xf32>
    %275 = vector.broadcast %273 : f32 to vector<1x1x16x16xf32>
    %276 = arith.mulf %275, %274 : vector<1x1x16x16xf32>
    %277 = arith.addf %272, %276 : vector<1x1x16x16xf32>
    %c31 = arith.constant 31 : index
    %278 = memref.load %arg2[%c31] : memref<98xf32, #tpu.memory_space<smem>>
    %279 = vector.extract_strided_slice %257 {offsets = [0, 0, 4, 0], sizes = [1, 1, 16, 16], strides = [1, 1, 1, 1]} : vector<1x1x22x16xf32> to vector<1x1x16x16xf32>
    %280 = vector.broadcast %278 : f32 to vector<1x1x16x16xf32>
    %281 = arith.mulf %280, %279 : vector<1x1x16x16xf32>
    %282 = arith.addf %277, %281 : vector<1x1x16x16xf32>
    %c38 = arith.constant 38 : index
    %283 = memref.load %arg2[%c38] : memref<98xf32, #tpu.memory_space<smem>>
    %284 = vector.extract_strided_slice %257 {offsets = [0, 0, 5, 0], sizes = [1, 1, 16, 16], strides = [1, 1, 1, 1]} : vector<1x1x22x16xf32> to vector<1x1x16x16xf32>
    %285 = vector.broadcast %283 : f32 to vector<1x1x16x16xf32>
    %286 = arith.mulf %285, %284 : vector<1x1x16x16xf32>
    %287 = arith.addf %282, %286 : vector<1x1x16x16xf32>
    %c45 = arith.constant 45 : index
    %288 = memref.load %arg2[%c45] : memref<98xf32, #tpu.memory_space<smem>>
    %289 = vector.extract_strided_slice %257 {offsets = [0, 0, 6, 0], sizes = [1, 1, 16, 16], strides = [1, 1, 1, 1]} : vector<1x1x22x16xf32> to vector<1x1x16x16xf32>
    %290 = vector.broadcast %288 : f32 to vector<1x1x16x16xf32>
    %291 = arith.mulf %290, %289 : vector<1x1x16x16xf32>
    %292 = arith.addf %287, %291 : vector<1x1x16x16xf32>
    %c0_164 = arith.constant 0 : index
    %c0_165 = arith.constant 0 : index
    %c0_166 = arith.constant 0 : index
    %c4_167 = arith.constant 4 : index
    %293 = vector.load %arg5[%c0_164, %c0_165, %c0_166, %c4_167] : memref<1x2x22x22xf32, #tpu.memory_space<vmem>>, vector<1x1x22x16xf32>
    %c4_168 = arith.constant 4 : index
    %294 = memref.load %arg2[%c4_168] : memref<98xf32, #tpu.memory_space<smem>>
    %295 = vector.extract_strided_slice %293 {offsets = [0, 0, 0, 0], sizes = [1, 1, 16, 16], strides = [1, 1, 1, 1]} : vector<1x1x22x16xf32> to vector<1x1x16x16xf32>
    %296 = vector.broadcast %294 : f32 to vector<1x1x16x16xf32>
    %297 = arith.mulf %296, %295 : vector<1x1x16x16xf32>
    %298 = arith.addf %292, %297 : vector<1x1x16x16xf32>
    %c11_169 = arith.constant 11 : index
    %299 = memref.load %arg2[%c11_169] : memref<98xf32, #tpu.memory_space<smem>>
    %300 = vector.extract_strided_slice %293 {offsets = [0, 0, 1, 0], sizes = [1, 1, 16, 16], strides = [1, 1, 1, 1]} : vector<1x1x22x16xf32> to vector<1x1x16x16xf32>
    %301 = vector.broadcast %299 : f32 to vector<1x1x16x16xf32>
    %302 = arith.mulf %301, %300 : vector<1x1x16x16xf32>
    %303 = arith.addf %298, %302 : vector<1x1x16x16xf32>
    %c18_170 = arith.constant 18 : index
    %304 = memref.load %arg2[%c18_170] : memref<98xf32, #tpu.memory_space<smem>>
    %305 = vector.extract_strided_slice %293 {offsets = [0, 0, 2, 0], sizes = [1, 1, 16, 16], strides = [1, 1, 1, 1]} : vector<1x1x22x16xf32> to vector<1x1x16x16xf32>
    %306 = vector.broadcast %304 : f32 to vector<1x1x16x16xf32>
    %307 = arith.mulf %306, %305 : vector<1x1x16x16xf32>
    %308 = arith.addf %303, %307 : vector<1x1x16x16xf32>
    %c25 = arith.constant 25 : index
    %309 = memref.load %arg2[%c25] : memref<98xf32, #tpu.memory_space<smem>>
    %310 = vector.extract_strided_slice %293 {offsets = [0, 0, 3, 0], sizes = [1, 1, 16, 16], strides = [1, 1, 1, 1]} : vector<1x1x22x16xf32> to vector<1x1x16x16xf32>
    %311 = vector.broadcast %309 : f32 to vector<1x1x16x16xf32>
    %312 = arith.mulf %311, %310 : vector<1x1x16x16xf32>
    %313 = arith.addf %308, %312 : vector<1x1x16x16xf32>
    %c32 = arith.constant 32 : index
    %314 = memref.load %arg2[%c32] : memref<98xf32, #tpu.memory_space<smem>>
    %315 = vector.extract_strided_slice %293 {offsets = [0, 0, 4, 0], sizes = [1, 1, 16, 16], strides = [1, 1, 1, 1]} : vector<1x1x22x16xf32> to vector<1x1x16x16xf32>
    %316 = vector.broadcast %314 : f32 to vector<1x1x16x16xf32>
    %317 = arith.mulf %316, %315 : vector<1x1x16x16xf32>
    %318 = arith.addf %313, %317 : vector<1x1x16x16xf32>
    %c39 = arith.constant 39 : index
    %319 = memref.load %arg2[%c39] : memref<98xf32, #tpu.memory_space<smem>>
    %320 = vector.extract_strided_slice %293 {offsets = [0, 0, 5, 0], sizes = [1, 1, 16, 16], strides = [1, 1, 1, 1]} : vector<1x1x22x16xf32> to vector<1x1x16x16xf32>
    %321 = vector.broadcast %319 : f32 to vector<1x1x16x16xf32>
    %322 = arith.mulf %321, %320 : vector<1x1x16x16xf32>
    %323 = arith.addf %318, %322 : vector<1x1x16x16xf32>
    %c46 = arith.constant 46 : index
    %324 = memref.load %arg2[%c46] : memref<98xf32, #tpu.memory_space<smem>>
    %325 = vector.extract_strided_slice %293 {offsets = [0, 0, 6, 0], sizes = [1, 1, 16, 16], strides = [1, 1, 1, 1]} : vector<1x1x22x16xf32> to vector<1x1x16x16xf32>
    %326 = vector.broadcast %324 : f32 to vector<1x1x16x16xf32>
    %327 = arith.mulf %326, %325 : vector<1x1x16x16xf32>
    %328 = arith.addf %323, %327 : vector<1x1x16x16xf32>
    %c0_171 = arith.constant 0 : index
    %c0_172 = arith.constant 0 : index
    %c0_173 = arith.constant 0 : index
    %c5_174 = arith.constant 5 : index
    %329 = vector.load %arg5[%c0_171, %c0_172, %c0_173, %c5_174] : memref<1x2x22x22xf32, #tpu.memory_space<vmem>>, vector<1x1x22x16xf32>
    %c5_175 = arith.constant 5 : index
    %330 = memref.load %arg2[%c5_175] : memref<98xf32, #tpu.memory_space<smem>>
    %331 = vector.extract_strided_slice %329 {offsets = [0, 0, 0, 0], sizes = [1, 1, 16, 16], strides = [1, 1, 1, 1]} : vector<1x1x22x16xf32> to vector<1x1x16x16xf32>
    %332 = vector.broadcast %330 : f32 to vector<1x1x16x16xf32>
    %333 = arith.mulf %332, %331 : vector<1x1x16x16xf32>
    %334 = arith.addf %328, %333 : vector<1x1x16x16xf32>
    %c12_176 = arith.constant 12 : index
    %335 = memref.load %arg2[%c12_176] : memref<98xf32, #tpu.memory_space<smem>>
    %336 = vector.extract_strided_slice %329 {offsets = [0, 0, 1, 0], sizes = [1, 1, 16, 16], strides = [1, 1, 1, 1]} : vector<1x1x22x16xf32> to vector<1x1x16x16xf32>
    %337 = vector.broadcast %335 : f32 to vector<1x1x16x16xf32>
    %338 = arith.mulf %337, %336 : vector<1x1x16x16xf32>
    %339 = arith.addf %334, %338 : vector<1x1x16x16xf32>
    %c19_177 = arith.constant 19 : index
    %340 = memref.load %arg2[%c19_177] : memref<98xf32, #tpu.memory_space<smem>>
    %341 = vector.extract_strided_slice %329 {offsets = [0, 0, 2, 0], sizes = [1, 1, 16, 16], strides = [1, 1, 1, 1]} : vector<1x1x22x16xf32> to vector<1x1x16x16xf32>
    %342 = vector.broadcast %340 : f32 to vector<1x1x16x16xf32>
    %343 = arith.mulf %342, %341 : vector<1x1x16x16xf32>
    %344 = arith.addf %339, %343 : vector<1x1x16x16xf32>
    %c26 = arith.constant 26 : index
    %345 = memref.load %arg2[%c26] : memref<98xf32, #tpu.memory_space<smem>>
    %346 = vector.extract_strided_slice %329 {offsets = [0, 0, 3, 0], sizes = [1, 1, 16, 16], strides = [1, 1, 1, 1]} : vector<1x1x22x16xf32> to vector<1x1x16x16xf32>
    %347 = vector.broadcast %345 : f32 to vector<1x1x16x16xf32>
    %348 = arith.mulf %347, %346 : vector<1x1x16x16xf32>
    %349 = arith.addf %344, %348 : vector<1x1x16x16xf32>
    %c33 = arith.constant 33 : index
    %350 = memref.load %arg2[%c33] : memref<98xf32, #tpu.memory_space<smem>>
    %351 = vector.extract_strided_slice %329 {offsets = [0, 0, 4, 0], sizes = [1, 1, 16, 16], strides = [1, 1, 1, 1]} : vector<1x1x22x16xf32> to vector<1x1x16x16xf32>
    %352 = vector.broadcast %350 : f32 to vector<1x1x16x16xf32>
    %353 = arith.mulf %352, %351 : vector<1x1x16x16xf32>
    %354 = arith.addf %349, %353 : vector<1x1x16x16xf32>
    %c40 = arith.constant 40 : index
    %355 = memref.load %arg2[%c40] : memref<98xf32, #tpu.memory_space<smem>>
    %356 = vector.extract_strided_slice %329 {offsets = [0, 0, 5, 0], sizes = [1, 1, 16, 16], strides = [1, 1, 1, 1]} : vector<1x1x22x16xf32> to vector<1x1x16x16xf32>
    %357 = vector.broadcast %355 : f32 to vector<1x1x16x16xf32>
    %358 = arith.mulf %357, %356 : vector<1x1x16x16xf32>
    %359 = arith.addf %354, %358 : vector<1x1x16x16xf32>
    %c47 = arith.constant 47 : index
    %360 = memref.load %arg2[%c47] : memref<98xf32, #tpu.memory_space<smem>>
    %361 = vector.extract_strided_slice %329 {offsets = [0, 0, 6, 0], sizes = [1, 1, 16, 16], strides = [1, 1, 1, 1]} : vector<1x1x22x16xf32> to vector<1x1x16x16xf32>
    %362 = vector.broadcast %360 : f32 to vector<1x1x16x16xf32>
    %363 = arith.mulf %362, %361 : vector<1x1x16x16xf32>
    %364 = arith.addf %359, %363 : vector<1x1x16x16xf32>
    %c0_178 = arith.constant 0 : index
    %c0_179 = arith.constant 0 : index
    %c0_180 = arith.constant 0 : index
    %c6_181 = arith.constant 6 : index
    %365 = vector.load %arg5[%c0_178, %c0_179, %c0_180, %c6_181] : memref<1x2x22x22xf32, #tpu.memory_space<vmem>>, vector<1x1x22x16xf32>
    %c6_182 = arith.constant 6 : index
    %366 = memref.load %arg2[%c6_182] : memref<98xf32, #tpu.memory_space<smem>>
    %367 = vector.extract_strided_slice %365 {offsets = [0, 0, 0, 0], sizes = [1, 1, 16, 16], strides = [1, 1, 1, 1]} : vector<1x1x22x16xf32> to vector<1x1x16x16xf32>
    %368 = vector.broadcast %366 : f32 to vector<1x1x16x16xf32>
    %369 = arith.mulf %368, %367 : vector<1x1x16x16xf32>
    %370 = arith.addf %364, %369 : vector<1x1x16x16xf32>
    %c13_183 = arith.constant 13 : index
    %371 = memref.load %arg2[%c13_183] : memref<98xf32, #tpu.memory_space<smem>>
    %372 = vector.extract_strided_slice %365 {offsets = [0, 0, 1, 0], sizes = [1, 1, 16, 16], strides = [1, 1, 1, 1]} : vector<1x1x22x16xf32> to vector<1x1x16x16xf32>
    %373 = vector.broadcast %371 : f32 to vector<1x1x16x16xf32>
    %374 = arith.mulf %373, %372 : vector<1x1x16x16xf32>
    %375 = arith.addf %370, %374 : vector<1x1x16x16xf32>
    %c20 = arith.constant 20 : index
    %376 = memref.load %arg2[%c20] : memref<98xf32, #tpu.memory_space<smem>>
    %377 = vector.extract_strided_slice %365 {offsets = [0, 0, 2, 0], sizes = [1, 1, 16, 16], strides = [1, 1, 1, 1]} : vector<1x1x22x16xf32> to vector<1x1x16x16xf32>
    %378 = vector.broadcast %376 : f32 to vector<1x1x16x16xf32>
    %379 = arith.mulf %378, %377 : vector<1x1x16x16xf32>
    %380 = arith.addf %375, %379 : vector<1x1x16x16xf32>
    %c27 = arith.constant 27 : index
    %381 = memref.load %arg2[%c27] : memref<98xf32, #tpu.memory_space<smem>>
    %382 = vector.extract_strided_slice %365 {offsets = [0, 0, 3, 0], sizes = [1, 1, 16, 16], strides = [1, 1, 1, 1]} : vector<1x1x22x16xf32> to vector<1x1x16x16xf32>
    %383 = vector.broadcast %381 : f32 to vector<1x1x16x16xf32>
    %384 = arith.mulf %383, %382 : vector<1x1x16x16xf32>
    %385 = arith.addf %380, %384 : vector<1x1x16x16xf32>
    %c34 = arith.constant 34 : index
    %386 = memref.load %arg2[%c34] : memref<98xf32, #tpu.memory_space<smem>>
    %387 = vector.extract_strided_slice %365 {offsets = [0, 0, 4, 0], sizes = [1, 1, 16, 16], strides = [1, 1, 1, 1]} : vector<1x1x22x16xf32> to vector<1x1x16x16xf32>
    %388 = vector.broadcast %386 : f32 to vector<1x1x16x16xf32>
    %389 = arith.mulf %388, %387 : vector<1x1x16x16xf32>
    %390 = arith.addf %385, %389 : vector<1x1x16x16xf32>
    %c41 = arith.constant 41 : index
    %391 = memref.load %arg2[%c41] : memref<98xf32, #tpu.memory_space<smem>>
    %392 = vector.extract_strided_slice %365 {offsets = [0, 0, 5, 0], sizes = [1, 1, 16, 16], strides = [1, 1, 1, 1]} : vector<1x1x22x16xf32> to vector<1x1x16x16xf32>
    %393 = vector.broadcast %391 : f32 to vector<1x1x16x16xf32>
    %394 = arith.mulf %393, %392 : vector<1x1x16x16xf32>
    %395 = arith.addf %390, %394 : vector<1x1x16x16xf32>
    %c48 = arith.constant 48 : index
    %396 = memref.load %arg2[%c48] : memref<98xf32, #tpu.memory_space<smem>>
    %397 = vector.extract_strided_slice %365 {offsets = [0, 0, 6, 0], sizes = [1, 1, 16, 16], strides = [1, 1, 1, 1]} : vector<1x1x22x16xf32> to vector<1x1x16x16xf32>
    %398 = vector.broadcast %396 : f32 to vector<1x1x16x16xf32>
    %399 = arith.mulf %398, %397 : vector<1x1x16x16xf32>
    %400 = arith.addf %395, %399 : vector<1x1x16x16xf32>
    %c0_184 = arith.constant 0 : index
    %c1_185 = arith.constant 1 : index
    %c0_186 = arith.constant 0 : index
    %c0_187 = arith.constant 0 : index
    %401 = vector.load %arg5[%c0_184, %c1_185, %c0_186, %c0_187] : memref<1x2x22x22xf32, #tpu.memory_space<vmem>>, vector<1x1x22x16xf32>
    %c49 = arith.constant 49 : index
    %402 = memref.load %arg2[%c49] : memref<98xf32, #tpu.memory_space<smem>>
    %403 = vector.extract_strided_slice %401 {offsets = [0, 0, 0, 0], sizes = [1, 1, 16, 16], strides = [1, 1, 1, 1]} : vector<1x1x22x16xf32> to vector<1x1x16x16xf32>
    %404 = vector.broadcast %402 : f32 to vector<1x1x16x16xf32>
    %405 = arith.mulf %404, %403 : vector<1x1x16x16xf32>
    %406 = arith.addf %400, %405 : vector<1x1x16x16xf32>
    %c56 = arith.constant 56 : index
    %407 = memref.load %arg2[%c56] : memref<98xf32, #tpu.memory_space<smem>>
    %408 = vector.extract_strided_slice %401 {offsets = [0, 0, 1, 0], sizes = [1, 1, 16, 16], strides = [1, 1, 1, 1]} : vector<1x1x22x16xf32> to vector<1x1x16x16xf32>
    %409 = vector.broadcast %407 : f32 to vector<1x1x16x16xf32>
    %410 = arith.mulf %409, %408 : vector<1x1x16x16xf32>
    %411 = arith.addf %406, %410 : vector<1x1x16x16xf32>
    %c63 = arith.constant 63 : index
    %412 = memref.load %arg2[%c63] : memref<98xf32, #tpu.memory_space<smem>>
    %413 = vector.extract_strided_slice %401 {offsets = [0, 0, 2, 0], sizes = [1, 1, 16, 16], strides = [1, 1, 1, 1]} : vector<1x1x22x16xf32> to vector<1x1x16x16xf32>
    %414 = vector.broadcast %412 : f32 to vector<1x1x16x16xf32>
    %415 = arith.mulf %414, %413 : vector<1x1x16x16xf32>
    %416 = arith.addf %411, %415 : vector<1x1x16x16xf32>
    %c70 = arith.constant 70 : index
    %417 = memref.load %arg2[%c70] : memref<98xf32, #tpu.memory_space<smem>>
    %418 = vector.extract_strided_slice %401 {offsets = [0, 0, 3, 0], sizes = [1, 1, 16, 16], strides = [1, 1, 1, 1]} : vector<1x1x22x16xf32> to vector<1x1x16x16xf32>
    %419 = vector.broadcast %417 : f32 to vector<1x1x16x16xf32>
    %420 = arith.mulf %419, %418 : vector<1x1x16x16xf32>
    %421 = arith.addf %416, %420 : vector<1x1x16x16xf32>
    %c77 = arith.constant 77 : index
    %422 = memref.load %arg2[%c77] : memref<98xf32, #tpu.memory_space<smem>>
    %423 = vector.extract_strided_slice %401 {offsets = [0, 0, 4, 0], sizes = [1, 1, 16, 16], strides = [1, 1, 1, 1]} : vector<1x1x22x16xf32> to vector<1x1x16x16xf32>
    %424 = vector.broadcast %422 : f32 to vector<1x1x16x16xf32>
    %425 = arith.mulf %424, %423 : vector<1x1x16x16xf32>
    %426 = arith.addf %421, %425 : vector<1x1x16x16xf32>
    %c84 = arith.constant 84 : index
    %427 = memref.load %arg2[%c84] : memref<98xf32, #tpu.memory_space<smem>>
    %428 = vector.extract_strided_slice %401 {offsets = [0, 0, 5, 0], sizes = [1, 1, 16, 16], strides = [1, 1, 1, 1]} : vector<1x1x22x16xf32> to vector<1x1x16x16xf32>
    %429 = vector.broadcast %427 : f32 to vector<1x1x16x16xf32>
    %430 = arith.mulf %429, %428 : vector<1x1x16x16xf32>
    %431 = arith.addf %426, %430 : vector<1x1x16x16xf32>
    %c91 = arith.constant 91 : index
    %432 = memref.load %arg2[%c91] : memref<98xf32, #tpu.memory_space<smem>>
    %433 = vector.extract_strided_slice %401 {offsets = [0, 0, 6, 0], sizes = [1, 1, 16, 16], strides = [1, 1, 1, 1]} : vector<1x1x22x16xf32> to vector<1x1x16x16xf32>
    %434 = vector.broadcast %432 : f32 to vector<1x1x16x16xf32>
    %435 = arith.mulf %434, %433 : vector<1x1x16x16xf32>
    %436 = arith.addf %431, %435 : vector<1x1x16x16xf32>
    %c0_188 = arith.constant 0 : index
    %c1_189 = arith.constant 1 : index
    %c0_190 = arith.constant 0 : index
    %c1_191 = arith.constant 1 : index
    %437 = vector.load %arg5[%c0_188, %c1_189, %c0_190, %c1_191] : memref<1x2x22x22xf32, #tpu.memory_space<vmem>>, vector<1x1x22x16xf32>
    %c50 = arith.constant 50 : index
    %438 = memref.load %arg2[%c50] : memref<98xf32, #tpu.memory_space<smem>>
    %439 = vector.extract_strided_slice %437 {offsets = [0, 0, 0, 0], sizes = [1, 1, 16, 16], strides = [1, 1, 1, 1]} : vector<1x1x22x16xf32> to vector<1x1x16x16xf32>
    %440 = vector.broadcast %438 : f32 to vector<1x1x16x16xf32>
    %441 = arith.mulf %440, %439 : vector<1x1x16x16xf32>
    %442 = arith.addf %436, %441 : vector<1x1x16x16xf32>
    %c57 = arith.constant 57 : index
    %443 = memref.load %arg2[%c57] : memref<98xf32, #tpu.memory_space<smem>>
    %444 = vector.extract_strided_slice %437 {offsets = [0, 0, 1, 0], sizes = [1, 1, 16, 16], strides = [1, 1, 1, 1]} : vector<1x1x22x16xf32> to vector<1x1x16x16xf32>
    %445 = vector.broadcast %443 : f32 to vector<1x1x16x16xf32>
    %446 = arith.mulf %445, %444 : vector<1x1x16x16xf32>
    %447 = arith.addf %442, %446 : vector<1x1x16x16xf32>
    %c64 = arith.constant 64 : index
    %448 = memref.load %arg2[%c64] : memref<98xf32, #tpu.memory_space<smem>>
    %449 = vector.extract_strided_slice %437 {offsets = [0, 0, 2, 0], sizes = [1, 1, 16, 16], strides = [1, 1, 1, 1]} : vector<1x1x22x16xf32> to vector<1x1x16x16xf32>
    %450 = vector.broadcast %448 : f32 to vector<1x1x16x16xf32>
    %451 = arith.mulf %450, %449 : vector<1x1x16x16xf32>
    %452 = arith.addf %447, %451 : vector<1x1x16x16xf32>
    %c71 = arith.constant 71 : index
    %453 = memref.load %arg2[%c71] : memref<98xf32, #tpu.memory_space<smem>>
    %454 = vector.extract_strided_slice %437 {offsets = [0, 0, 3, 0], sizes = [1, 1, 16, 16], strides = [1, 1, 1, 1]} : vector<1x1x22x16xf32> to vector<1x1x16x16xf32>
    %455 = vector.broadcast %453 : f32 to vector<1x1x16x16xf32>
    %456 = arith.mulf %455, %454 : vector<1x1x16x16xf32>
    %457 = arith.addf %452, %456 : vector<1x1x16x16xf32>
    %c78 = arith.constant 78 : index
    %458 = memref.load %arg2[%c78] : memref<98xf32, #tpu.memory_space<smem>>
    %459 = vector.extract_strided_slice %437 {offsets = [0, 0, 4, 0], sizes = [1, 1, 16, 16], strides = [1, 1, 1, 1]} : vector<1x1x22x16xf32> to vector<1x1x16x16xf32>
    %460 = vector.broadcast %458 : f32 to vector<1x1x16x16xf32>
    %461 = arith.mulf %460, %459 : vector<1x1x16x16xf32>
    %462 = arith.addf %457, %461 : vector<1x1x16x16xf32>
    %c85 = arith.constant 85 : index
    %463 = memref.load %arg2[%c85] : memref<98xf32, #tpu.memory_space<smem>>
    %464 = vector.extract_strided_slice %437 {offsets = [0, 0, 5, 0], sizes = [1, 1, 16, 16], strides = [1, 1, 1, 1]} : vector<1x1x22x16xf32> to vector<1x1x16x16xf32>
    %465 = vector.broadcast %463 : f32 to vector<1x1x16x16xf32>
    %466 = arith.mulf %465, %464 : vector<1x1x16x16xf32>
    %467 = arith.addf %462, %466 : vector<1x1x16x16xf32>
    %c92 = arith.constant 92 : index
    %468 = memref.load %arg2[%c92] : memref<98xf32, #tpu.memory_space<smem>>
    %469 = vector.extract_strided_slice %437 {offsets = [0, 0, 6, 0], sizes = [1, 1, 16, 16], strides = [1, 1, 1, 1]} : vector<1x1x22x16xf32> to vector<1x1x16x16xf32>
    %470 = vector.broadcast %468 : f32 to vector<1x1x16x16xf32>
    %471 = arith.mulf %470, %469 : vector<1x1x16x16xf32>
    %472 = arith.addf %467, %471 : vector<1x1x16x16xf32>
    %c0_192 = arith.constant 0 : index
    %c1_193 = arith.constant 1 : index
    %c0_194 = arith.constant 0 : index
    %c2_195 = arith.constant 2 : index
    %473 = vector.load %arg5[%c0_192, %c1_193, %c0_194, %c2_195] : memref<1x2x22x22xf32, #tpu.memory_space<vmem>>, vector<1x1x22x16xf32>
    %c51 = arith.constant 51 : index
    %474 = memref.load %arg2[%c51] : memref<98xf32, #tpu.memory_space<smem>>
    %475 = vector.extract_strided_slice %473 {offsets = [0, 0, 0, 0], sizes = [1, 1, 16, 16], strides = [1, 1, 1, 1]} : vector<1x1x22x16xf32> to vector<1x1x16x16xf32>
    %476 = vector.broadcast %474 : f32 to vector<1x1x16x16xf32>
    %477 = arith.mulf %476, %475 : vector<1x1x16x16xf32>
    %478 = arith.addf %472, %477 : vector<1x1x16x16xf32>
    %c58 = arith.constant 58 : index
    %479 = memref.load %arg2[%c58] : memref<98xf32, #tpu.memory_space<smem>>
    %480 = vector.extract_strided_slice %473 {offsets = [0, 0, 1, 0], sizes = [1, 1, 16, 16], strides = [1, 1, 1, 1]} : vector<1x1x22x16xf32> to vector<1x1x16x16xf32>
    %481 = vector.broadcast %479 : f32 to vector<1x1x16x16xf32>
    %482 = arith.mulf %481, %480 : vector<1x1x16x16xf32>
    %483 = arith.addf %478, %482 : vector<1x1x16x16xf32>
    %c65 = arith.constant 65 : index
    %484 = memref.load %arg2[%c65] : memref<98xf32, #tpu.memory_space<smem>>
    %485 = vector.extract_strided_slice %473 {offsets = [0, 0, 2, 0], sizes = [1, 1, 16, 16], strides = [1, 1, 1, 1]} : vector<1x1x22x16xf32> to vector<1x1x16x16xf32>
    %486 = vector.broadcast %484 : f32 to vector<1x1x16x16xf32>
    %487 = arith.mulf %486, %485 : vector<1x1x16x16xf32>
    %488 = arith.addf %483, %487 : vector<1x1x16x16xf32>
    %c72 = arith.constant 72 : index
    %489 = memref.load %arg2[%c72] : memref<98xf32, #tpu.memory_space<smem>>
    %490 = vector.extract_strided_slice %473 {offsets = [0, 0, 3, 0], sizes = [1, 1, 16, 16], strides = [1, 1, 1, 1]} : vector<1x1x22x16xf32> to vector<1x1x16x16xf32>
    %491 = vector.broadcast %489 : f32 to vector<1x1x16x16xf32>
    %492 = arith.mulf %491, %490 : vector<1x1x16x16xf32>
    %493 = arith.addf %488, %492 : vector<1x1x16x16xf32>
    %c79 = arith.constant 79 : index
    %494 = memref.load %arg2[%c79] : memref<98xf32, #tpu.memory_space<smem>>
    %495 = vector.extract_strided_slice %473 {offsets = [0, 0, 4, 0], sizes = [1, 1, 16, 16], strides = [1, 1, 1, 1]} : vector<1x1x22x16xf32> to vector<1x1x16x16xf32>
    %496 = vector.broadcast %494 : f32 to vector<1x1x16x16xf32>
    %497 = arith.mulf %496, %495 : vector<1x1x16x16xf32>
    %498 = arith.addf %493, %497 : vector<1x1x16x16xf32>
    %c86 = arith.constant 86 : index
    %499 = memref.load %arg2[%c86] : memref<98xf32, #tpu.memory_space<smem>>
    %500 = vector.extract_strided_slice %473 {offsets = [0, 0, 5, 0], sizes = [1, 1, 16, 16], strides = [1, 1, 1, 1]} : vector<1x1x22x16xf32> to vector<1x1x16x16xf32>
    %501 = vector.broadcast %499 : f32 to vector<1x1x16x16xf32>
    %502 = arith.mulf %501, %500 : vector<1x1x16x16xf32>
    %503 = arith.addf %498, %502 : vector<1x1x16x16xf32>
    %c93 = arith.constant 93 : index
    %504 = memref.load %arg2[%c93] : memref<98xf32, #tpu.memory_space<smem>>
    %505 = vector.extract_strided_slice %473 {offsets = [0, 0, 6, 0], sizes = [1, 1, 16, 16], strides = [1, 1, 1, 1]} : vector<1x1x22x16xf32> to vector<1x1x16x16xf32>
    %506 = vector.broadcast %504 : f32 to vector<1x1x16x16xf32>
    %507 = arith.mulf %506, %505 : vector<1x1x16x16xf32>
    %508 = arith.addf %503, %507 : vector<1x1x16x16xf32>
    %c0_196 = arith.constant 0 : index
    %c1_197 = arith.constant 1 : index
    %c0_198 = arith.constant 0 : index
    %c3_199 = arith.constant 3 : index
    %509 = vector.load %arg5[%c0_196, %c1_197, %c0_198, %c3_199] : memref<1x2x22x22xf32, #tpu.memory_space<vmem>>, vector<1x1x22x16xf32>
    %c52 = arith.constant 52 : index
    %510 = memref.load %arg2[%c52] : memref<98xf32, #tpu.memory_space<smem>>
    %511 = vector.extract_strided_slice %509 {offsets = [0, 0, 0, 0], sizes = [1, 1, 16, 16], strides = [1, 1, 1, 1]} : vector<1x1x22x16xf32> to vector<1x1x16x16xf32>
    %512 = vector.broadcast %510 : f32 to vector<1x1x16x16xf32>
    %513 = arith.mulf %512, %511 : vector<1x1x16x16xf32>
    %514 = arith.addf %508, %513 : vector<1x1x16x16xf32>
    %c59 = arith.constant 59 : index
    %515 = memref.load %arg2[%c59] : memref<98xf32, #tpu.memory_space<smem>>
    %516 = vector.extract_strided_slice %509 {offsets = [0, 0, 1, 0], sizes = [1, 1, 16, 16], strides = [1, 1, 1, 1]} : vector<1x1x22x16xf32> to vector<1x1x16x16xf32>
    %517 = vector.broadcast %515 : f32 to vector<1x1x16x16xf32>
    %518 = arith.mulf %517, %516 : vector<1x1x16x16xf32>
    %519 = arith.addf %514, %518 : vector<1x1x16x16xf32>
    %c66 = arith.constant 66 : index
    %520 = memref.load %arg2[%c66] : memref<98xf32, #tpu.memory_space<smem>>
    %521 = vector.extract_strided_slice %509 {offsets = [0, 0, 2, 0], sizes = [1, 1, 16, 16], strides = [1, 1, 1, 1]} : vector<1x1x22x16xf32> to vector<1x1x16x16xf32>
    %522 = vector.broadcast %520 : f32 to vector<1x1x16x16xf32>
    %523 = arith.mulf %522, %521 : vector<1x1x16x16xf32>
    %524 = arith.addf %519, %523 : vector<1x1x16x16xf32>
    %c73 = arith.constant 73 : index
    %525 = memref.load %arg2[%c73] : memref<98xf32, #tpu.memory_space<smem>>
    %526 = vector.extract_strided_slice %509 {offsets = [0, 0, 3, 0], sizes = [1, 1, 16, 16], strides = [1, 1, 1, 1]} : vector<1x1x22x16xf32> to vector<1x1x16x16xf32>
    %527 = vector.broadcast %525 : f32 to vector<1x1x16x16xf32>
    %528 = arith.mulf %527, %526 : vector<1x1x16x16xf32>
    %529 = arith.addf %524, %528 : vector<1x1x16x16xf32>
    %c80 = arith.constant 80 : index
    %530 = memref.load %arg2[%c80] : memref<98xf32, #tpu.memory_space<smem>>
    %531 = vector.extract_strided_slice %509 {offsets = [0, 0, 4, 0], sizes = [1, 1, 16, 16], strides = [1, 1, 1, 1]} : vector<1x1x22x16xf32> to vector<1x1x16x16xf32>
    %532 = vector.broadcast %530 : f32 to vector<1x1x16x16xf32>
    %533 = arith.mulf %532, %531 : vector<1x1x16x16xf32>
    %534 = arith.addf %529, %533 : vector<1x1x16x16xf32>
    %c87 = arith.constant 87 : index
    %535 = memref.load %arg2[%c87] : memref<98xf32, #tpu.memory_space<smem>>
    %536 = vector.extract_strided_slice %509 {offsets = [0, 0, 5, 0], sizes = [1, 1, 16, 16], strides = [1, 1, 1, 1]} : vector<1x1x22x16xf32> to vector<1x1x16x16xf32>
    %537 = vector.broadcast %535 : f32 to vector<1x1x16x16xf32>
    %538 = arith.mulf %537, %536 : vector<1x1x16x16xf32>
    %539 = arith.addf %534, %538 : vector<1x1x16x16xf32>
    %c94 = arith.constant 94 : index
    %540 = memref.load %arg2[%c94] : memref<98xf32, #tpu.memory_space<smem>>
    %541 = vector.extract_strided_slice %509 {offsets = [0, 0, 6, 0], sizes = [1, 1, 16, 16], strides = [1, 1, 1, 1]} : vector<1x1x22x16xf32> to vector<1x1x16x16xf32>
    %542 = vector.broadcast %540 : f32 to vector<1x1x16x16xf32>
    %543 = arith.mulf %542, %541 : vector<1x1x16x16xf32>
    %544 = arith.addf %539, %543 : vector<1x1x16x16xf32>
    %c0_200 = arith.constant 0 : index
    %c1_201 = arith.constant 1 : index
    %c0_202 = arith.constant 0 : index
    %c4_203 = arith.constant 4 : index
    %545 = vector.load %arg5[%c0_200, %c1_201, %c0_202, %c4_203] : memref<1x2x22x22xf32, #tpu.memory_space<vmem>>, vector<1x1x22x16xf32>
    %c53 = arith.constant 53 : index
    %546 = memref.load %arg2[%c53] : memref<98xf32, #tpu.memory_space<smem>>
    %547 = vector.extract_strided_slice %545 {offsets = [0, 0, 0, 0], sizes = [1, 1, 16, 16], strides = [1, 1, 1, 1]} : vector<1x1x22x16xf32> to vector<1x1x16x16xf32>
    %548 = vector.broadcast %546 : f32 to vector<1x1x16x16xf32>
    %549 = arith.mulf %548, %547 : vector<1x1x16x16xf32>
    %550 = arith.addf %544, %549 : vector<1x1x16x16xf32>
    %c60 = arith.constant 60 : index
    %551 = memref.load %arg2[%c60] : memref<98xf32, #tpu.memory_space<smem>>
    %552 = vector.extract_strided_slice %545 {offsets = [0, 0, 1, 0], sizes = [1, 1, 16, 16], strides = [1, 1, 1, 1]} : vector<1x1x22x16xf32> to vector<1x1x16x16xf32>
    %553 = vector.broadcast %551 : f32 to vector<1x1x16x16xf32>
    %554 = arith.mulf %553, %552 : vector<1x1x16x16xf32>
    %555 = arith.addf %550, %554 : vector<1x1x16x16xf32>
    %c67 = arith.constant 67 : index
    %556 = memref.load %arg2[%c67] : memref<98xf32, #tpu.memory_space<smem>>
    %557 = vector.extract_strided_slice %545 {offsets = [0, 0, 2, 0], sizes = [1, 1, 16, 16], strides = [1, 1, 1, 1]} : vector<1x1x22x16xf32> to vector<1x1x16x16xf32>
    %558 = vector.broadcast %556 : f32 to vector<1x1x16x16xf32>
    %559 = arith.mulf %558, %557 : vector<1x1x16x16xf32>
    %560 = arith.addf %555, %559 : vector<1x1x16x16xf32>
    %c74 = arith.constant 74 : index
    %561 = memref.load %arg2[%c74] : memref<98xf32, #tpu.memory_space<smem>>
    %562 = vector.extract_strided_slice %545 {offsets = [0, 0, 3, 0], sizes = [1, 1, 16, 16], strides = [1, 1, 1, 1]} : vector<1x1x22x16xf32> to vector<1x1x16x16xf32>
    %563 = vector.broadcast %561 : f32 to vector<1x1x16x16xf32>
    %564 = arith.mulf %563, %562 : vector<1x1x16x16xf32>
    %565 = arith.addf %560, %564 : vector<1x1x16x16xf32>
    %c81 = arith.constant 81 : index
    %566 = memref.load %arg2[%c81] : memref<98xf32, #tpu.memory_space<smem>>
    %567 = vector.extract_strided_slice %545 {offsets = [0, 0, 4, 0], sizes = [1, 1, 16, 16], strides = [1, 1, 1, 1]} : vector<1x1x22x16xf32> to vector<1x1x16x16xf32>
    %568 = vector.broadcast %566 : f32 to vector<1x1x16x16xf32>
    %569 = arith.mulf %568, %567 : vector<1x1x16x16xf32>
    %570 = arith.addf %565, %569 : vector<1x1x16x16xf32>
    %c88 = arith.constant 88 : index
    %571 = memref.load %arg2[%c88] : memref<98xf32, #tpu.memory_space<smem>>
    %572 = vector.extract_strided_slice %545 {offsets = [0, 0, 5, 0], sizes = [1, 1, 16, 16], strides = [1, 1, 1, 1]} : vector<1x1x22x16xf32> to vector<1x1x16x16xf32>
    %573 = vector.broadcast %571 : f32 to vector<1x1x16x16xf32>
    %574 = arith.mulf %573, %572 : vector<1x1x16x16xf32>
    %575 = arith.addf %570, %574 : vector<1x1x16x16xf32>
    %c95 = arith.constant 95 : index
    %576 = memref.load %arg2[%c95] : memref<98xf32, #tpu.memory_space<smem>>
    %577 = vector.extract_strided_slice %545 {offsets = [0, 0, 6, 0], sizes = [1, 1, 16, 16], strides = [1, 1, 1, 1]} : vector<1x1x22x16xf32> to vector<1x1x16x16xf32>
    %578 = vector.broadcast %576 : f32 to vector<1x1x16x16xf32>
    %579 = arith.mulf %578, %577 : vector<1x1x16x16xf32>
    %580 = arith.addf %575, %579 : vector<1x1x16x16xf32>
    %c0_204 = arith.constant 0 : index
    %c1_205 = arith.constant 1 : index
    %c0_206 = arith.constant 0 : index
    %c5_207 = arith.constant 5 : index
    %581 = vector.load %arg5[%c0_204, %c1_205, %c0_206, %c5_207] : memref<1x2x22x22xf32, #tpu.memory_space<vmem>>, vector<1x1x22x16xf32>
    %c54 = arith.constant 54 : index
    %582 = memref.load %arg2[%c54] : memref<98xf32, #tpu.memory_space<smem>>
    %583 = vector.extract_strided_slice %581 {offsets = [0, 0, 0, 0], sizes = [1, 1, 16, 16], strides = [1, 1, 1, 1]} : vector<1x1x22x16xf32> to vector<1x1x16x16xf32>
    %584 = vector.broadcast %582 : f32 to vector<1x1x16x16xf32>
    %585 = arith.mulf %584, %583 : vector<1x1x16x16xf32>
    %586 = arith.addf %580, %585 : vector<1x1x16x16xf32>
    %c61 = arith.constant 61 : index
    %587 = memref.load %arg2[%c61] : memref<98xf32, #tpu.memory_space<smem>>
    %588 = vector.extract_strided_slice %581 {offsets = [0, 0, 1, 0], sizes = [1, 1, 16, 16], strides = [1, 1, 1, 1]} : vector<1x1x22x16xf32> to vector<1x1x16x16xf32>
    %589 = vector.broadcast %587 : f32 to vector<1x1x16x16xf32>
    %590 = arith.mulf %589, %588 : vector<1x1x16x16xf32>
    %591 = arith.addf %586, %590 : vector<1x1x16x16xf32>
    %c68 = arith.constant 68 : index
    %592 = memref.load %arg2[%c68] : memref<98xf32, #tpu.memory_space<smem>>
    %593 = vector.extract_strided_slice %581 {offsets = [0, 0, 2, 0], sizes = [1, 1, 16, 16], strides = [1, 1, 1, 1]} : vector<1x1x22x16xf32> to vector<1x1x16x16xf32>
    %594 = vector.broadcast %592 : f32 to vector<1x1x16x16xf32>
    %595 = arith.mulf %594, %593 : vector<1x1x16x16xf32>
    %596 = arith.addf %591, %595 : vector<1x1x16x16xf32>
    %c75 = arith.constant 75 : index
    %597 = memref.load %arg2[%c75] : memref<98xf32, #tpu.memory_space<smem>>
    %598 = vector.extract_strided_slice %581 {offsets = [0, 0, 3, 0], sizes = [1, 1, 16, 16], strides = [1, 1, 1, 1]} : vector<1x1x22x16xf32> to vector<1x1x16x16xf32>
    %599 = vector.broadcast %597 : f32 to vector<1x1x16x16xf32>
    %600 = arith.mulf %599, %598 : vector<1x1x16x16xf32>
    %601 = arith.addf %596, %600 : vector<1x1x16x16xf32>
    %c82 = arith.constant 82 : index
    %602 = memref.load %arg2[%c82] : memref<98xf32, #tpu.memory_space<smem>>
    %603 = vector.extract_strided_slice %581 {offsets = [0, 0, 4, 0], sizes = [1, 1, 16, 16], strides = [1, 1, 1, 1]} : vector<1x1x22x16xf32> to vector<1x1x16x16xf32>
    %604 = vector.broadcast %602 : f32 to vector<1x1x16x16xf32>
    %605 = arith.mulf %604, %603 : vector<1x1x16x16xf32>
    %606 = arith.addf %601, %605 : vector<1x1x16x16xf32>
    %c89 = arith.constant 89 : index
    %607 = memref.load %arg2[%c89] : memref<98xf32, #tpu.memory_space<smem>>
    %608 = vector.extract_strided_slice %581 {offsets = [0, 0, 5, 0], sizes = [1, 1, 16, 16], strides = [1, 1, 1, 1]} : vector<1x1x22x16xf32> to vector<1x1x16x16xf32>
    %609 = vector.broadcast %607 : f32 to vector<1x1x16x16xf32>
    %610 = arith.mulf %609, %608 : vector<1x1x16x16xf32>
    %611 = arith.addf %606, %610 : vector<1x1x16x16xf32>
    %c96 = arith.constant 96 : index
    %612 = memref.load %arg2[%c96] : memref<98xf32, #tpu.memory_space<smem>>
    %613 = vector.extract_strided_slice %581 {offsets = [0, 0, 6, 0], sizes = [1, 1, 16, 16], strides = [1, 1, 1, 1]} : vector<1x1x22x16xf32> to vector<1x1x16x16xf32>
    %614 = vector.broadcast %612 : f32 to vector<1x1x16x16xf32>
    %615 = arith.mulf %614, %613 : vector<1x1x16x16xf32>
    %616 = arith.addf %611, %615 : vector<1x1x16x16xf32>
    %c0_208 = arith.constant 0 : index
    %c1_209 = arith.constant 1 : index
    %c0_210 = arith.constant 0 : index
    %c6_211 = arith.constant 6 : index
    %617 = vector.load %arg5[%c0_208, %c1_209, %c0_210, %c6_211] : memref<1x2x22x22xf32, #tpu.memory_space<vmem>>, vector<1x1x22x16xf32>
    %c55 = arith.constant 55 : index
    %618 = memref.load %arg2[%c55] : memref<98xf32, #tpu.memory_space<smem>>
    %619 = vector.extract_strided_slice %617 {offsets = [0, 0, 0, 0], sizes = [1, 1, 16, 16], strides = [1, 1, 1, 1]} : vector<1x1x22x16xf32> to vector<1x1x16x16xf32>
    %620 = vector.broadcast %618 : f32 to vector<1x1x16x16xf32>
    %621 = arith.mulf %620, %619 : vector<1x1x16x16xf32>
    %622 = arith.addf %616, %621 : vector<1x1x16x16xf32>
    %c62 = arith.constant 62 : index
    %623 = memref.load %arg2[%c62] : memref<98xf32, #tpu.memory_space<smem>>
    %624 = vector.extract_strided_slice %617 {offsets = [0, 0, 1, 0], sizes = [1, 1, 16, 16], strides = [1, 1, 1, 1]} : vector<1x1x22x16xf32> to vector<1x1x16x16xf32>
    %625 = vector.broadcast %623 : f32 to vector<1x1x16x16xf32>
    %626 = arith.mulf %625, %624 : vector<1x1x16x16xf32>
    %627 = arith.addf %622, %626 : vector<1x1x16x16xf32>
    %c69 = arith.constant 69 : index
    %628 = memref.load %arg2[%c69] : memref<98xf32, #tpu.memory_space<smem>>
    %629 = vector.extract_strided_slice %617 {offsets = [0, 0, 2, 0], sizes = [1, 1, 16, 16], strides = [1, 1, 1, 1]} : vector<1x1x22x16xf32> to vector<1x1x16x16xf32>
    %630 = vector.broadcast %628 : f32 to vector<1x1x16x16xf32>
    %631 = arith.mulf %630, %629 : vector<1x1x16x16xf32>
    %632 = arith.addf %627, %631 : vector<1x1x16x16xf32>
    %c76 = arith.constant 76 : index
    %633 = memref.load %arg2[%c76] : memref<98xf32, #tpu.memory_space<smem>>
    %634 = vector.extract_strided_slice %617 {offsets = [0, 0, 3, 0], sizes = [1, 1, 16, 16], strides = [1, 1, 1, 1]} : vector<1x1x22x16xf32> to vector<1x1x16x16xf32>
    %635 = vector.broadcast %633 : f32 to vector<1x1x16x16xf32>
    %636 = arith.mulf %635, %634 : vector<1x1x16x16xf32>
    %637 = arith.addf %632, %636 : vector<1x1x16x16xf32>
    %c83 = arith.constant 83 : index
    %638 = memref.load %arg2[%c83] : memref<98xf32, #tpu.memory_space<smem>>
    %639 = vector.extract_strided_slice %617 {offsets = [0, 0, 4, 0], sizes = [1, 1, 16, 16], strides = [1, 1, 1, 1]} : vector<1x1x22x16xf32> to vector<1x1x16x16xf32>
    %640 = vector.broadcast %638 : f32 to vector<1x1x16x16xf32>
    %641 = arith.mulf %640, %639 : vector<1x1x16x16xf32>
    %642 = arith.addf %637, %641 : vector<1x1x16x16xf32>
    %c90 = arith.constant 90 : index
    %643 = memref.load %arg2[%c90] : memref<98xf32, #tpu.memory_space<smem>>
    %644 = vector.extract_strided_slice %617 {offsets = [0, 0, 5, 0], sizes = [1, 1, 16, 16], strides = [1, 1, 1, 1]} : vector<1x1x22x16xf32> to vector<1x1x16x16xf32>
    %645 = vector.broadcast %643 : f32 to vector<1x1x16x16xf32>
    %646 = arith.mulf %645, %644 : vector<1x1x16x16xf32>
    %647 = arith.addf %642, %646 : vector<1x1x16x16xf32>
    %c97 = arith.constant 97 : index
    %648 = memref.load %arg2[%c97] : memref<98xf32, #tpu.memory_space<smem>>
    %649 = vector.extract_strided_slice %617 {offsets = [0, 0, 6, 0], sizes = [1, 1, 16, 16], strides = [1, 1, 1, 1]} : vector<1x1x22x16xf32> to vector<1x1x16x16xf32>
    %650 = vector.broadcast %648 : f32 to vector<1x1x16x16xf32>
    %651 = arith.mulf %650, %649 : vector<1x1x16x16xf32>
    %652 = arith.addf %647, %651 : vector<1x1x16x16xf32>
    %653 = arith.negf %652 : vector<1x1x16x16xf32>
    %654 = math.exp %653 : vector<1x1x16x16xf32>
    %cst_212 = arith.constant 1.000000e+00 : f32
    %655 = vector.broadcast %cst_212 : f32 to vector<1x1x16x16xf32>
    %656 = arith.addf %655, %654 : vector<1x1x16x16xf32>
    %657 = arith.divf %655, %656 : vector<1x1x16x16xf32>
    %658 = vector.extract_strided_slice %657 {offsets = [0, 0, 0, 0], sizes = [1, 1, 1, 16], strides = [1, 1, 1, 1]} : vector<1x1x16x16xf32> to vector<1x1x1x16xf32>
    %659 = vector.shape_cast %658 : vector<1x1x1x16xf32> to vector<1x1x16xf32>
    %c0_213 = arith.constant 0 : index
    %c0_214 = arith.constant 0 : index
    %c0_215 = arith.constant 0 : index
    %660 = vector.load %arg6[%c0_213, %c0_214, %c0_215] : memref<1x1x256xf32, #tpu.memory_space<vmem>>, vector<1x1x16xf32>
    tpu.vector_store %arg6[%c0_213, %c0_214, %c0_215], %659 {strides = array<i32>} : memref<1x1x256xf32, #tpu.memory_space<vmem>>, vector<1x1x16xf32>,
    %661 = vector.extract_strided_slice %657 {offsets = [0, 0, 1, 0], sizes = [1, 1, 1, 16], strides = [1, 1, 1, 1]} : vector<1x1x16x16xf32> to vector<1x1x1x16xf32>
    %662 = vector.shape_cast %661 : vector<1x1x1x16xf32> to vector<1x1x16xf32>
    %c0_216 = arith.constant 0 : index
    %c0_217 = arith.constant 0 : index
    %c16_218 = arith.constant 16 : index
    %663 = vector.load %arg6[%c0_216, %c0_217, %c16_218] : memref<1x1x256xf32, #tpu.memory_space<vmem>>, vector<1x1x16xf32>
    tpu.vector_store %arg6[%c0_216, %c0_217, %c16_218], %662 {strides = array<i32>} : memref<1x1x256xf32, #tpu.memory_space<vmem>>, vector<1x1x16xf32>,
    %664 = vector.extract_strided_slice %657 {offsets = [0, 0, 2, 0], sizes = [1, 1, 1, 16], strides = [1, 1, 1, 1]} : vector<1x1x16x16xf32> to vector<1x1x1x16xf32>
    %665 = vector.shape_cast %664 : vector<1x1x1x16xf32> to vector<1x1x16xf32>
    %c0_219 = arith.constant 0 : index
    %c0_220 = arith.constant 0 : index
    %c32_221 = arith.constant 32 : index
    %666 = vector.load %arg6[%c0_219, %c0_220, %c32_221] : memref<1x1x256xf32, #tpu.memory_space<vmem>>, vector<1x1x16xf32>
    tpu.vector_store %arg6[%c0_219, %c0_220, %c32_221], %665 {strides = array<i32>} : memref<1x1x256xf32, #tpu.memory_space<vmem>>, vector<1x1x16xf32>,
    %667 = vector.extract_strided_slice %657 {offsets = [0, 0, 3, 0], sizes = [1, 1, 1, 16], strides = [1, 1, 1, 1]} : vector<1x1x16x16xf32> to vector<1x1x1x16xf32>
    %668 = vector.shape_cast %667 : vector<1x1x1x16xf32> to vector<1x1x16xf32>
    %c0_222 = arith.constant 0 : index
    %c0_223 = arith.constant 0 : index
    %c48_224 = arith.constant 48 : index
    %669 = vector.load %arg6[%c0_222, %c0_223, %c48_224] : memref<1x1x256xf32, #tpu.memory_space<vmem>>, vector<1x1x16xf32>
    tpu.vector_store %arg6[%c0_222, %c0_223, %c48_224], %668 {strides = array<i32>} : memref<1x1x256xf32, #tpu.memory_space<vmem>>, vector<1x1x16xf32>,
    %670 = vector.extract_strided_slice %657 {offsets = [0, 0, 4, 0], sizes = [1, 1, 1, 16], strides = [1, 1, 1, 1]} : vector<1x1x16x16xf32> to vector<1x1x1x16xf32>
    %671 = vector.shape_cast %670 : vector<1x1x1x16xf32> to vector<1x1x16xf32>
    %c0_225 = arith.constant 0 : index
    %c0_226 = arith.constant 0 : index
    %c64_227 = arith.constant 64 : index
    %672 = vector.load %arg6[%c0_225, %c0_226, %c64_227] : memref<1x1x256xf32, #tpu.memory_space<vmem>>, vector<1x1x16xf32>
    tpu.vector_store %arg6[%c0_225, %c0_226, %c64_227], %671 {strides = array<i32>} : memref<1x1x256xf32, #tpu.memory_space<vmem>>, vector<1x1x16xf32>,
    %673 = vector.extract_strided_slice %657 {offsets = [0, 0, 5, 0], sizes = [1, 1, 1, 16], strides = [1, 1, 1, 1]} : vector<1x1x16x16xf32> to vector<1x1x1x16xf32>
    %674 = vector.shape_cast %673 : vector<1x1x1x16xf32> to vector<1x1x16xf32>
    %c0_228 = arith.constant 0 : index
    %c0_229 = arith.constant 0 : index
    %c80_230 = arith.constant 80 : index
    %675 = vector.load %arg6[%c0_228, %c0_229, %c80_230] : memref<1x1x256xf32, #tpu.memory_space<vmem>>, vector<1x1x16xf32>
    tpu.vector_store %arg6[%c0_228, %c0_229, %c80_230], %674 {strides = array<i32>} : memref<1x1x256xf32, #tpu.memory_space<vmem>>, vector<1x1x16xf32>,
    %676 = vector.extract_strided_slice %657 {offsets = [0, 0, 6, 0], sizes = [1, 1, 1, 16], strides = [1, 1, 1, 1]} : vector<1x1x16x16xf32> to vector<1x1x1x16xf32>
    %677 = vector.shape_cast %676 : vector<1x1x1x16xf32> to vector<1x1x16xf32>
    %c0_231 = arith.constant 0 : index
    %c0_232 = arith.constant 0 : index
    %c96_233 = arith.constant 96 : index
    %678 = vector.load %arg6[%c0_231, %c0_232, %c96_233] : memref<1x1x256xf32, #tpu.memory_space<vmem>>, vector<1x1x16xf32>
    tpu.vector_store %arg6[%c0_231, %c0_232, %c96_233], %677 {strides = array<i32>} : memref<1x1x256xf32, #tpu.memory_space<vmem>>, vector<1x1x16xf32>,
    %679 = vector.extract_strided_slice %657 {offsets = [0, 0, 7, 0], sizes = [1, 1, 1, 16], strides = [1, 1, 1, 1]} : vector<1x1x16x16xf32> to vector<1x1x1x16xf32>
    %680 = vector.shape_cast %679 : vector<1x1x1x16xf32> to vector<1x1x16xf32>
    %c0_234 = arith.constant 0 : index
    %c0_235 = arith.constant 0 : index
    %c112 = arith.constant 112 : index
    %681 = vector.load %arg6[%c0_234, %c0_235, %c112] : memref<1x1x256xf32, #tpu.memory_space<vmem>>, vector<1x1x16xf32>
    tpu.vector_store %arg6[%c0_234, %c0_235, %c112], %680 {strides = array<i32>} : memref<1x1x256xf32, #tpu.memory_space<vmem>>, vector<1x1x16xf32>,
    %682 = vector.extract_strided_slice %657 {offsets = [0, 0, 8, 0], sizes = [1, 1, 1, 16], strides = [1, 1, 1, 1]} : vector<1x1x16x16xf32> to vector<1x1x1x16xf32>
    %683 = vector.shape_cast %682 : vector<1x1x1x16xf32> to vector<1x1x16xf32>
    %c0_236 = arith.constant 0 : index
    %c0_237 = arith.constant 0 : index
    %c128 = arith.constant 128 : index
    %684 = vector.load %arg6[%c0_236, %c0_237, %c128] : memref<1x1x256xf32, #tpu.memory_space<vmem>>, vector<1x1x16xf32>
    tpu.vector_store %arg6[%c0_236, %c0_237, %c128], %683 {strides = array<i32>} : memref<1x1x256xf32, #tpu.memory_space<vmem>>, vector<1x1x16xf32>,
    %685 = vector.extract_strided_slice %657 {offsets = [0, 0, 9, 0], sizes = [1, 1, 1, 16], strides = [1, 1, 1, 1]} : vector<1x1x16x16xf32> to vector<1x1x1x16xf32>
    %686 = vector.shape_cast %685 : vector<1x1x1x16xf32> to vector<1x1x16xf32>
    %c0_238 = arith.constant 0 : index
    %c0_239 = arith.constant 0 : index
    %c144 = arith.constant 144 : index
    %687 = vector.load %arg6[%c0_238, %c0_239, %c144] : memref<1x1x256xf32, #tpu.memory_space<vmem>>, vector<1x1x16xf32>
    tpu.vector_store %arg6[%c0_238, %c0_239, %c144], %686 {strides = array<i32>} : memref<1x1x256xf32, #tpu.memory_space<vmem>>, vector<1x1x16xf32>,
    %688 = vector.extract_strided_slice %657 {offsets = [0, 0, 10, 0], sizes = [1, 1, 1, 16], strides = [1, 1, 1, 1]} : vector<1x1x16x16xf32> to vector<1x1x1x16xf32>
    %689 = vector.shape_cast %688 : vector<1x1x1x16xf32> to vector<1x1x16xf32>
    %c0_240 = arith.constant 0 : index
    %c0_241 = arith.constant 0 : index
    %c160 = arith.constant 160 : index
    %690 = vector.load %arg6[%c0_240, %c0_241, %c160] : memref<1x1x256xf32, #tpu.memory_space<vmem>>, vector<1x1x16xf32>
    tpu.vector_store %arg6[%c0_240, %c0_241, %c160], %689 {strides = array<i32>} : memref<1x1x256xf32, #tpu.memory_space<vmem>>, vector<1x1x16xf32>,
    %691 = vector.extract_strided_slice %657 {offsets = [0, 0, 11, 0], sizes = [1, 1, 1, 16], strides = [1, 1, 1, 1]} : vector<1x1x16x16xf32> to vector<1x1x1x16xf32>
    %692 = vector.shape_cast %691 : vector<1x1x1x16xf32> to vector<1x1x16xf32>
    %c0_242 = arith.constant 0 : index
    %c0_243 = arith.constant 0 : index
    %c176 = arith.constant 176 : index
    %693 = vector.load %arg6[%c0_242, %c0_243, %c176] : memref<1x1x256xf32, #tpu.memory_space<vmem>>, vector<1x1x16xf32>
    tpu.vector_store %arg6[%c0_242, %c0_243, %c176], %692 {strides = array<i32>} : memref<1x1x256xf32, #tpu.memory_space<vmem>>, vector<1x1x16xf32>,
    %694 = vector.extract_strided_slice %657 {offsets = [0, 0, 12, 0], sizes = [1, 1, 1, 16], strides = [1, 1, 1, 1]} : vector<1x1x16x16xf32> to vector<1x1x1x16xf32>
    %695 = vector.shape_cast %694 : vector<1x1x1x16xf32> to vector<1x1x16xf32>
    %c0_244 = arith.constant 0 : index
    %c0_245 = arith.constant 0 : index
    %c192 = arith.constant 192 : index
    %696 = vector.load %arg6[%c0_244, %c0_245, %c192] : memref<1x1x256xf32, #tpu.memory_space<vmem>>, vector<1x1x16xf32>
    tpu.vector_store %arg6[%c0_244, %c0_245, %c192], %695 {strides = array<i32>} : memref<1x1x256xf32, #tpu.memory_space<vmem>>, vector<1x1x16xf32>,
    %697 = vector.extract_strided_slice %657 {offsets = [0, 0, 13, 0], sizes = [1, 1, 1, 16], strides = [1, 1, 1, 1]} : vector<1x1x16x16xf32> to vector<1x1x1x16xf32>
    %698 = vector.shape_cast %697 : vector<1x1x1x16xf32> to vector<1x1x16xf32>
    %c0_246 = arith.constant 0 : index
    %c0_247 = arith.constant 0 : index
    %c208 = arith.constant 208 : index
    %699 = vector.load %arg6[%c0_246, %c0_247, %c208] : memref<1x1x256xf32, #tpu.memory_space<vmem>>, vector<1x1x16xf32>
    tpu.vector_store %arg6[%c0_246, %c0_247, %c208], %698 {strides = array<i32>} : memref<1x1x256xf32, #tpu.memory_space<vmem>>, vector<1x1x16xf32>,
    %700 = vector.extract_strided_slice %657 {offsets = [0, 0, 14, 0], sizes = [1, 1, 1, 16], strides = [1, 1, 1, 1]} : vector<1x1x16x16xf32> to vector<1x1x1x16xf32>
    %701 = vector.shape_cast %700 : vector<1x1x1x16xf32> to vector<1x1x16xf32>
    %c0_248 = arith.constant 0 : index
    %c0_249 = arith.constant 0 : index
    %c224 = arith.constant 224 : index
    %702 = vector.load %arg6[%c0_248, %c0_249, %c224] : memref<1x1x256xf32, #tpu.memory_space<vmem>>, vector<1x1x16xf32>
    tpu.vector_store %arg6[%c0_248, %c0_249, %c224], %701 {strides = array<i32>} : memref<1x1x256xf32, #tpu.memory_space<vmem>>, vector<1x1x16xf32>,
    %703 = vector.extract_strided_slice %657 {offsets = [0, 0, 15, 0], sizes = [1, 1, 1, 16], strides = [1, 1, 1, 1]} : vector<1x1x16x16xf32> to vector<1x1x1x16xf32>
    %704 = vector.shape_cast %703 : vector<1x1x1x16xf32> to vector<1x1x16xf32>
    %c0_250 = arith.constant 0 : index
    %c0_251 = arith.constant 0 : index
    %c240 = arith.constant 240 : index
    %705 = vector.load %arg6[%c0_250, %c0_251, %c240] : memref<1x1x256xf32, #tpu.memory_space<vmem>>, vector<1x1x16xf32>
    tpu.vector_store %arg6[%c0_250, %c0_251, %c240], %704 {strides = array<i32>} : memref<1x1x256xf32, #tpu.memory_space<vmem>>, vector<1x1x16xf32>,
    %c0_252 = arith.constant 0 : index
    %c0_253 = arith.constant 0 : index
    %c0_254 = arith.constant 0 : index
    %706 = vector.load %arg6[%c0_252, %c0_253, %c0_254] : memref<1x1x256xf32, #tpu.memory_space<vmem>>, vector<1x1x256xf32>
    %c0_255 = arith.constant 0 : index
    %c0_256 = arith.constant 0 : index
    %c0_257 = arith.constant 0 : index
    %707 = vector.load %arg1[%c0_255, %c0_256, %c0_257] : memref<1x4x256xf32, #tpu.memory_space<vmem>>, vector<1x4x256xf32>
    %708 = vector.broadcast %706 : vector<1x1x256xf32> to vector<1x4x256xf32>
    %709 = arith.mulf %707, %708 : vector<1x4x256xf32>
    %c0_258 = arith.constant 0 : index
    %c0_259 = arith.constant 0 : index
    %c0_260 = arith.constant 0 : index
    %710 = vector.load %arg4[%c0_258, %c0_259, %c0_260] : memref<1x4x256xf32, #tpu.memory_space<vmem>>, vector<1x4x256xf32>
    tpu.vector_store %arg4[%c0_258, %c0_259, %c0_260], %709 {strides = array<i32>} : memref<1x4x256xf32, #tpu.memory_space<vmem>>, vector<1x4x256xf32>,
    return
  }
  func.func @transform_0(%arg0: i32) -> (i32, i32, i32) {
    %c0_i32 = arith.constant 0 : i32
    %c0_i32_0 = arith.constant 0 : i32
    %c0_i32_1 = arith.constant 0 : i32
    return %arg0, %c0_i32, %c0_i32_0 : i32, i32, i32
  }
  func.func @transform_1(%arg0: i32) -> i32 {
    %c0_i32 = arith.constant 0 : i32
    %c0_i32_0 = arith.constant 0 : i32
    return %c0_i32 : i32
  }
  func.func @transform_2(%arg0: i32) -> i32 {
    %c0_i32 = arith.constant 0 : i32
    %c0_i32_0 = arith.constant 0 : i32
    return %c0_i32 : i32
  }
  func.func @transform_3(%arg0: i32) -> (i32, i32, i32) {
    %c0_i32 = arith.constant 0 : i32
    %c0_i32_0 = arith.constant 0 : i32
    %c0_i32_1 = arith.constant 0 : i32
    return %arg0, %c0_i32, %c0_i32_0 : i32, i32, i32
  }
}

</mosaic_0001>

<bundles_post_ra>
// kernel: tpu_custom_call.1
= control target key start
LH: loop header
LB: loop body
LE: loop exit
PB: predicated region body
PF: predicated region fallthrough
CT: control target
= control target key end

     0   :  { %s5145_s0 = inlined_call_operand.hbm [shape: f32[2,4,256], index: 0, kind: input, shape index: {}]   ;;  %s5146_s1 = inlined_call_operand.vmem [shape: f32[98], index: 1, kind: input, shape index: {}]   ;;  %s5147_s2 = inlined_call_operand.<no memory space> [shape: f32[1], index: 2, kind: input, shape index: {}]   ;;  %s5148_s3 = inlined_call_operand.hbm [shape: f32[2,4,256], index: 3, kind: output, shape index: {}]  }
   0x1   :  { %8 = sst [smem:[#allocation4]] %s5147_s2 }
   0x2   :  { %9 = vsyncpa [#allocation6], 0 }
   0x3   :  { %11 = vsyncpa [#allocation6 + $0x1], 0 }
   0x4   :  { %12 = vsyncpa [#allocation8], 0 }
   0x5   :  { %13 = vsyncpa [#allocation7], 0 }
   0x6   :  { %15 = vsyncpa [#allocation7 + $0x1], 0  ;;  %s2953_s14 = smov 0   ;;  %s2955_s15 = smov 0  }
   0x7   :  { %s2957_s16 = smov 0   ;;  %s2959_s17 = smov 0  }
   0x8 LB: > { %s2974_s2 = sadd.s32 4294967295, %s2905_s17   ;;  %s2581_s18 = sadd.s32 4294967294, %s2905_s17   ;;  %s2905_s17 = sphi %s2959_s17, %s5509_s17   ;;  %s2901_s16 = sphi %s2957_s16, %s5508_s16   ;;  %s2897_s15 = sphi %s2955_s15, %s5507_s15   ;;  %s2893_s14 = sphi %s2953_s14, %s5506_s14  }
   0x9   : > { %p41_p0 = scmp.ne.s32.totalorder %s2897_s15, %s2893_s14  ;;  %p42_p1 = scmp.eq.s32.totalorder %s2974_s2, 0 }
   0xa   : > { %p107_p2 = scmp.eq.s32.totalorder %s2974_s2, 1  ;;  %p113_p3 = scmp.eq.s32.totalorder %s2581_s18, 1 }
   0xb   : > { %p2983_p4 = por %p42_p1, %p41_p0  ;;  %p2582_p5 = scmp.ge.s32.totalorder %s2905_s17, 1 }
   0xc   : > { %p2988_p6 = por %p113_p3, %p41_p0  ;;  %p120_p7 = scmp.lt.s32.totalorder %s2905_s17, 3 }
   0xd   : > { %s132_s23 = sshll.u32 %s5146_s1, 4  ;;  %s3004_s25 = sadd.s32 1, %s2905_s17   ;;  %s133_s23 = int_to_ptr.vmem [resolvable:$true] %s132_s23 }
   0xe   : > { %p2996_p8 = pnand %p2582_p5, %p120_p7  ;;  %s25_s26 = ssub.s32 %s2905_s17, %s3004_s25 }
   0xf   : > { %p26_p12 = scmp.eq.s32.totalorder %s25_s26, 0  ;;  %s28_s27 = sadd.s32 1, %s2901_s16 }
  0x10   : > { %p2706_p10 = pneg %p2996_p8  ;;  %p35_p13 = scmp.ne.s32.totalorder %s2901_s16, %s2897_s15 }
  0x11   : > { %s2907_s28 = smov [#allocation9]   ;;  %p36_p0 = scmp.eq.s32.totalorder %s2905_s17, 0 }
  0x12   : > { %p2707_p11 = pnand %p2706_p10, %p42_p1  ;;  %p3019_p3 = por %p107_p2, %p35_p13 }
  0x13   : > { %s3014_s29 = scalar_select %p26_p12, %s2901_s16, %s28_s27  }
  0x14   : > { %2709 = dma.vmem_to_smem (!%p2707_p11), %s133_s23, 16, %s2907_s28, [#allocation8]  }
  0x15   : > { %s146_s4 = sand.u32 1, %s2901_s16   ;;  %p37_p5 = por %p36_p0, %p35_p13 }
  0x16   : > { %p2719_p7 = scmp.lt.s32.totalorder %s2905_s17, 2  ;;  %s2585_s5 = sshll.u32 %s146_s4, 3 }
  0x17   : > { %s2696_s6 = sshll.u32 %s2905_s17, 3  ;;  %s150_s11 = scalar_lea.vmem [#allocation5], %s2585_s5 }
  0x18   : > { %s155_s9 = scalar_lea.hbm %s5145_s0, %s2696_s6  ;;  %s159_s12 = sshll.u32 %s150_s11, 4  ;;  %s160_s12 = int_to_ptr.vmem [resolvable:$true] %s159_s12 }
  0x19   : > { %s157_s10 = sshll.u32 %s155_s9, 4  ;;  %p3029_p10 = pnand %p2719_p7, %p37_p5  ;;  %s158_s10 = int_to_ptr.hbm [resolvable:$true] %s157_s10 }
  0x1a   : > { %s147_s18 = scalar_lea.sflag [#allocation6], %s146_s4  ;;  %s2805_s21 = sshra.s32 %s158_s10, 4  ;;  %s2806_s21 = int_to_ptr.hbm [resolvable:$true] %s2805_s21 }
  0x1b   : > { %s2807_s22 = scalar_lea.hbm %s2806_s21, 8  ;;  %p2809_p11 = pneg %p3029_p10 }
  0x1c   : > { %p2808_p2 = scmp.ne.s32.totalorder %s2806_s21, %s2807_s22  ;;  %s2812_s27 = scalar_lea.hbm %s5145_s0, 16 }
  0x1d   : > { %p2813_p0 = scmp.lt.s32.totalorder %s2806_s21, %s5145_s0  ;;  %p2814_p5 = scmp.lt.s32.totalorder %s2812_s27, %s2807_s22 }
  0x1e   : > { %p2810_p12 = pnand %p2809_p11, %p2808_p2 }
  0x1f   : > { %p2815_p7 = por %p2814_p5, %p2813_p0 }
  0x20   : > { %p2811_p13 = pneg %p2810_p12 }
  0x22   : > { %p2816_p9 = pnand %p2815_p7, %p2811_p13 }
  0x24   : > { %2819 = shalt.err (!%p2816_p9)
}
  0x25   : > { %2713 = dma.hbm_to_vmem [thread:$0]  (!%p3029_p10), %s158_s10, 128, %s160_s12, %s147_s18  }
  0x26   : > { %168 = sbr.rel (%p2996_p8) target bundleno = 1044 (0x414), region = 32 }
  0x2b   : > { %s3046_s4 = sand.u32 1, %s2897_s15  }
  0x2c   : > { %s5149_s6 = sshll.u32 %s3046_s4, 3  ;;  %s171_s7 = scalar_lea.sflag [#allocation6], %s3046_s4 }
  0x2d   : > { %s3052_s8 = scalar_lea.vmem [#allocation5], %s5149_s6 }
  0x2e   : > { %2880 = dma.done.wait (%p2983_p4), %s171_s7, 128  }
  0x2f   : > { %2882 = vsyncadd (%p2983_p4), %s171_s7, 4294967168 }
  0x30   : > { %2884 = dma.done.wait (%p42_p1), [#allocation8], 16  }
  0x31   : > { %2886 = vsyncadd (%p42_p1), [#allocation8], 4294967280 }
  0x32   : > { %185 = sfence }
  0x33   : > { %v204_v0 = vld [vmem:[%s3052_s8] sm:$0xff]  ;;  %vm211_vm0 = vcmask 1043456   ;;  %s2908_s19 = smov 115   ;;  %s2909_s24 = smov 3   ;;  %vm254_vm1 = vcmask 23552   ;;  %vm259_vm2 = vcmask 179352  }
  0x34   : > { %206 = vst [vmem:[#allocation1] ss:$2 sm:$0xff] %v204_v0  ;;  %s2910_s9 = smov 99   ;;  %s2911_s10 = smov 51   ;;  %v2916_v35 = vmov 0.0   ;;  %vm268_vm3 = vcmask 147480  }
  0x35   : > { %s2912_s11 = smov 83   ;;  %s2913_s12 = smov 67   ;;  %255 = vst.msk [vmem:[#allocation2 + $0x3] sm:$0xff] %vm254_vm1, %v2916_v35  ;;  %vm249_vm4 = vcmask 174080   ;;  %vm417_vm5 = vcmask 1046528   ;;  %vm435_vm6 = vcmask 1045504  }
  0x36   : > { %s2914_s13 = smov 35   ;;  %s2915_s18 = smov 19   ;;  %260 = vst.msk [vmem:[#allocation2 + $0x3] sm:$0xff] %vm259_vm2, %v2916_v35  ;;  %vm453_vm7 = vcmask 1044480   ;;  %vm488_vm8 = vcmask 1042432   ;;  %vm506_vm9 = vcmask 1041408  }
  0x37   : > { %256 = vst.msk [vmem:[#allocation2 + $0xb] sm:$0xff] %vm254_vm1, %v2916_v35  ;;  %s3105_s21 = sld [smem:[#allocation9 + $0x2]]  ;;  %s5152_s23 = smov 126  }
  0x38   : > { %257 = vst.msk [vmem:[#allocation2 + $0x1b] sm:$0xff] %vm254_vm1, %v2916_v35  ;;  %s3107_s22 = sld [smem:[#allocation9 + $0x1]]  ;;  %s5154_s26 = smov 127  }
  0x39   : > { %258 = vst.msk [vmem:[#allocation2 + $0x23] sm:$0xff] %vm254_vm1, %v2916_v35  ;;  %s2599_s27 = sld [smem:[#allocation9 + $0x8]] }
  0x3a   : > { %261 = vst.msk [vmem:[#allocation2 + $0xb] sm:$0xff] %vm259_vm2, %v2916_v35  ;;  %s2600_s28 = sld [smem:[#allocation9 + $0xf]] }
  0x3b   : > { %v207_v1 = vld.sshfl [vmem:[#allocation1] sm:$0xff pattern:$0x75316420]  ;;  %v208_v2 = vld.sshfl [vmem:[#allocation1 + $0x8] sm:$0xff pattern:$0x75316420] }
  0x3c   : > { %v212_v3 = vsel %vm211_vm0, %v207_v1, 0.0  ;;  %228 = vst [vmem:[#allocation1] ss:$2 sm:$0xff] %v204_v0  ;;  %v219_v18 = vsel %vm211_vm0, %v208_v2, 0.0  ;;  %s2601_s5 = sld [smem:[#allocation9 + $0x16]] }
  0x3d   : > { %v213_v4 = vrot.slane %v212_v3, 4  ;;  %v220_v20 = vrot.slane %v219_v18, 4  ;;  %262 = vst.msk [vmem:[#allocation2 + $0x1b] sm:$0xff] %vm259_vm2, %v2916_v35  ;;  %v657_v45 = vstv %s3105_s21  ;;  %s2603_s7 = sld [smem:[#allocation9 + $0x24]] }
  0x3e   : > { %263 = vst.msk [vmem:[#allocation2 + $0x23] sm:$0xff] %vm259_vm2, %v2916_v35  ;;  %v517_v46 = vstv %s3107_s22  ;;  %s3186_s21 = sld [smem:[#allocation9 + $0x23]] }
  0x3f   : > { %v214_v5 = vadd.f32 %v213_v4, %v212_v3  ;;  %v221_v22 = vadd.f32 %v220_v20, %v219_v18  ;;  %250 = vst.msk [vmem:[#allocation2] sm:$0x7] %vm249_vm4, %v2916_v35  ;;  %s2597_s22 = sld [smem:[#allocation9 + $0x2a]] }
  0x40   : > { %251 = vst.msk [vmem:[#allocation2 + $0x18] sm:$0x7] %vm249_vm4, %v2916_v35  ;;  %s3654_s6 = sld [smem:[#allocation9 + $0x60]] }
  0x41   : > { %v215_v6 = vrot.slane %v214_v5, 2  ;;  %v222_v25 = vrot.slane %v221_v22, 2  ;;  %252 = vst.msk [vmem:[#allocation2 + $0x13] sm:$0x7] %vm249_vm4, %v2916_v35 }
  0x42   : > { %253 = vst.msk [vmem:[#allocation2 + $0x2b] sm:$0x7] %vm249_vm4, %v2916_v35 }
  0x43   : > { %v216_v7 = vadd.f32 %v215_v6, %v214_v5  ;;  %v229_v8 = vld.sshfl [vmem:[#allocation1] sm:$0xff pattern:$0x75316420]  ;;  %v230_v21 = vld.sshfl [vmem:[#allocation1 + $0x8] sm:$0xff pattern:$0x75316420]  ;;  %v223_v27 = vadd.f32 %v222_v25, %v221_v22  ;;  %v531_v5 = vstv %s2599_s27 }
  0x44   : > { %v233_v9 = vsel %vm211_vm0, %v229_v8, -inf  ;;  %v240_v23 = vsel %vm211_vm0, %v230_v21, -inf  ;;  %s2606_s27 = sld [smem:[#allocation9 + $0x9]] }
  0x45   : > { %v217_v10 = vrot.slane %v216_v7, 1  ;;  %v234_v11 = vrot.slane %v233_v9, 4  ;;  %v241_v24 = vrot.slane %v240_v23, 4  ;;  %v224_v29 = vrot.slane %v223_v27, 1 }
  0x47   : > { %v218_v12 = vadd.f32 %v217_v10, %v216_v7  ;;  %v235_v13 = vmax.f32 %v233_v9, %v234_v11  ;;  %v242_v26 = vmax.f32 %v240_v23, %v241_v24  ;;  %v225_v31 = vadd.f32 %v224_v29, %v223_v27 }
  0x48   : > { %v573_v24 = vstv %s2601_s5  ;;  %s3253_s5 = sld [smem:[#allocation9 + $0x17]] }
  0x49   : > { %v247_v14 = vmul.f32 0.25, %v218_v12  ;;  %v236_v15 = vrot.slane %v235_v13, 2  ;;  %v243_v28 = vrot.slane %v242_v26, 2  ;;  %v248_v33 = vmul.f32 0.25, %v225_v31 }
  0x4b   : > { %276 = vrot.lane.b32.xlu1 %v247_v14, %s2908_s19  ;;  %265 = vrot.lane.b32.xlu0 %v247_v14, %s2909_s24  ;;  %v237_v16 = vmax.f32 %v235_v13, %v236_v15  ;;  %v244_v30 = vmax.f32 %v242_v26, %v243_v28  ;;  %v552_v13 = vstv %s2600_s28  ;;  %s3237_s28 = sld [smem:[#allocation9 + $0x10]] }
  0x4c   : > { %284 = vrot.lane.b32.xlu2 %v247_v14, %s2910_s9 }
  0x4d   : > { %v238_v17 = vrot.slane %v237_v16, 1  ;;  %v245_v32 = vrot.slane %v244_v30, 1 }
  0x4f   : > { %v239_v19 = vmax.f32 %v237_v16, %v238_v17  ;;  %v246_v34 = vmax.f32 %v244_v30, %v245_v32  ;;  %v615_v30 = vstv %s2603_s7  ;;  %s2609_s7 = sld [smem:[#allocation9 + $0x1e]] }
  0x53   : > { %308 = vrot.lane.b32.xlu1 %v247_v14, %s2911_s10  ;;  %292 = vrot.lane.b32.xlu0 %v247_v14, %s2912_s11 }
  0x54   : > { %300 = vrot.lane.b32.xlu2 %v247_v14, %s2913_s12 }
  0x5b   : > { %280 = vrot.lane.b32.xlu1 %v239_v19, %s2908_s19  ;;  %271 = vrot.lane.b32.xlu0 %v239_v19, %s2909_s24 }
  0x5c   : > { %288 = vrot.lane.b32.xlu2 %v239_v19, %s2910_s9 }
  0x63   : > { %296 = vrot.lane.b32.xlu1 %v239_v19, %s2912_s11  ;;  %304 = vrot.lane.b32.xlu0 %v239_v19, %s2913_s12 }
  0x64   : > { %312 = vrot.lane.b32.xlu2 %v239_v19, %s2911_s10 }
  0x6b   : > { %320 = vrot.lane.b32.xlu1 %v239_v19, %s2914_s13  ;;  %316 = vrot.lane.b32.xlu0 %v247_v14, %s2914_s13 }
  0x6c   : > { %324 = vrot.lane.b32.xlu2 %v247_v14, %s2915_s18 }
  0x73   : > { %333 = vrot.lane.b32.xlu1 %v248_v33, %s2909_s24  ;;  %328 = vrot.lane.b32.xlu0 %v239_v19, %s2915_s18 }
  0x74   : > { %338 = vrot.lane.b32.xlu2 %v246_v34, %s2909_s24  ;;  %s3158_s24 = sld [smem:[#allocation4]] }
  0x7b   : > { %346 = vrot.lane.b32.xlu1 %v246_v34, %s2908_s19  ;;  %342 = vrot.lane.b32.xlu0 %v248_v33, %s2908_s19  ;;  %s2602_s19 = sld [smem:[#allocation9 + $0x1d]] }
  0x7c   : > { %350 = vrot.lane.b32.xlu2 %v248_v33, %s2910_s9 }
  0x83   : > { %358 = vrot.lane.b32.xlu1 %v248_v33, %s2912_s11  ;;  %354 = vrot.lane.b32.xlu0 %v246_v34, %s2910_s9  ;;  %s3162_s9 = sld [smem:[#allocation9]] }
  0x84   : > { %362 = vrot.lane.b32.xlu2 %v246_v34, %s2912_s11  ;;  %s3169_s11 = sld [smem:[#allocation9 + $0xe]] }
  0x8b   : > { %370 = vrot.lane.b32.xlu1 %v246_v34, %s2913_s12  ;;  %366 = vrot.lane.b32.xlu0 %v248_v33, %s2913_s12  ;;  %s3171_s12 = sld [smem:[#allocation9 + $0x15]] }
  0x8c   : > { %374 = vrot.lane.b32.xlu2 %v248_v33, %s2911_s10 }
  0x93   : > { %382 = vrot.lane.b32.xlu1 %v248_v33, %s2914_s13  ;;  %378 = vrot.lane.b32.xlu0 %v246_v34, %s2911_s10  ;;  %s3167_s10 = sld [smem:[#allocation9 + $0x7]] }
  0x94   : > { %386 = vrot.lane.b32.xlu2 %v246_v34, %s2914_s13  ;;  %s2604_s13 = sld [smem:[#allocation9 + $0x2b]] }
  0x9b   : > { %394 = vrot.lane.b32.xlu1 %v246_v34, %s2915_s18  ;;  %390 = vrot.lane.b32.xlu0 %v248_v33, %s2915_s18  ;;  %s3182_s18 = sld [smem:[#allocation9 + $0x1c]] }
  0xa6   : > { %v285_v36 = vpop.permute.xlu2 %284 }
  0xa7   : > { %287 = vst.msk [vmem:[#allocation2 + $0x5] sm:$0x1] %vm268_vm3, %v285_v36  ;;  %v594_v36 = vstv %s2602_s19  ;;  %s2610_s19 = sld [smem:[#allocation9 + $0x25]] }
  0xae   : > { %v301_v37 = vpop.permute.xlu2 %300 }
  0xaf   : > { %303 = vst.msk [vmem:[#allocation2 + $0x7] sm:$0x1] %vm268_vm3, %v301_v37 }
  0xb6   : > { %v289_v38 = vpop.permute.xlu2 %288 }
  0xb7   : > { %291 = vst.msk [vmem:[#allocation2 + $0x1d] sm:$0x1] %vm268_vm3, %v289_v38 }
  0xbd   : > { %v277_v39 = vpop.permute.xlu1 %276  ;;  %v266_v40 = vpop.permute.xlu0 %265 }
  0xbe   : > { %279 = vst.msk [vmem:[#allocation2 + $0x4] sm:$0x1] %vm268_vm3, %v277_v39  ;;  %v313_v41 = vpop.permute.xlu2 %312 }
  0xbf   : > { %269 = vst.msk [vmem:[#allocation2 + $0x3] sm:$0x1] %vm268_vm3, %v266_v40 }
  0xc0   : > { %315 = vst.msk [vmem:[#allocation2 + $0x20] sm:$0x1] %vm268_vm3, %v313_v41 }
  0xc5   : > { %v309_v42 = vpop.permute.xlu1 %308  ;;  %v293_v43 = vpop.permute.xlu0 %292 }
  0xc6   : > { %311 = vst.msk [vmem:[#allocation2 + $0x8] sm:$0x1] %vm268_vm3, %v309_v42  ;;  %v325_v44 = vpop.permute.xlu2 %324 }
  0xc7   : > { %295 = vst.msk [vmem:[#allocation2 + $0x6] sm:$0x1] %vm268_vm3, %v293_v43 }
  0xc8   : > { %327 = vst.msk [vmem:[#allocation2 + $0xa] sm:$0x1] %vm268_vm3, %v325_v44 }
  0xcd   : > { %v281_v47 = vpop.permute.xlu1 %280  ;;  %v272_v48 = vpop.permute.xlu0 %271 }
  0xce   : > { %v3114_v49 = vld [vmem:[#allocation2] sm:$0xff]  ;;  %283 = vst.msk [vmem:[#allocation2 + $0x1c] sm:$0x1] %vm268_vm3, %v281_v47  ;;  %v339_v50 = vpop.permute.xlu2 %338 }
  0xcf   : > { %275 = vst.msk [vmem:[#allocation2 + $0x1b] sm:$0x1] %vm268_vm3, %v272_v48  ;;  %v658_v51 = vmul.f32 %v657_v45, %v3114_v49  ;;  %v518_v52 = vmul.f32 %v517_v46, %v3114_v49  ;;  %v532_v8 = vmul.f32 %v531_v5, %v3114_v49  ;;  %v553_v17 = vmul.f32 %v552_v13, %v3114_v49 }
  0xd0   : > { %341 = vst.msk [vmem:[#allocation2 + $0x23] sm:$0x1] %vm268_vm3, %v339_v50  ;;  %v616_v41 = vmul.f32 %v615_v30, %v3114_v49  ;;  %v595_v42 = vmul.f32 %v594_v36, %v3114_v49  ;;  %v574_v43 = vmul.f32 %v573_v24, %v3114_v49  ;;  %v404_v48 = vstv %s3162_s9  ;;  %s3449_s9 = sld [smem:[#allocation9 + $0x20]] }
  0xd1   : > { %662 = vrot.lane.b32.xlu1 %v658_v51, %s5152_s23  ;;  %522 = vrot.lane.b32.xlu2 %v518_v52, %s5154_s26  ;;  %v538_v15 = vrot.slane %v532_v8, 1  ;;  %v559_v22 = vrot.slane %v553_v17, 2  ;;  %v3196_v51 = vstv %s3167_s10  ;;  %v3199_v52 = vstv %s3169_s11  ;;  %s2611_s10 = sld [smem:[#allocation9 + $0x2c]] }
  0xd2   : > { %v601_v47 = vrot.slane %v595_v42, 4  ;;  %v580_v50 = vrot.slane %v574_v43, 3  ;;  %s2612_s11 = sld [smem:[#allocation9 + $0x3]] }
  0xd5   : > { %v297_v53 = vpop.permute.xlu1 %296  ;;  %v305_v54 = vpop.permute.xlu0 %304 }
  0xd6   : > { %299 = vst.msk [vmem:[#allocation2 + $0x1e] sm:$0x1] %vm268_vm3, %v297_v53  ;;  %v351_v55 = vpop.permute.xlu2 %350  ;;  %v636_v53 = vstv %s2604_s13  ;;  %s2614_s13 = sld [smem:[#allocation9 + $0x11]] }
  0xd7   : > { %307 = vst.msk [vmem:[#allocation2 + $0x1f] sm:$0x1] %vm268_vm3, %v305_v54 }
  0xd8   : > { %353 = vst.msk [vmem:[#allocation2 + $0xd] sm:$0x1] %vm268_vm3, %v351_v55 }
  0xdd   : > { %v321_v56 = vpop.permute.xlu1 %320  ;;  %v317_v57 = vpop.permute.xlu0 %316 }
  0xde   : > { %323 = vst.msk [vmem:[#allocation2 + $0x21] sm:$0x1] %vm268_vm3, %v321_v56  ;;  %v363_v58 = vpop.permute.xlu2 %362 }
  0xdf   : > { %319 = vst.msk [vmem:[#allocation2 + $0x9] sm:$0x1] %vm268_vm3, %v317_v57 }
  0xe0   : > { %365 = vst.msk [vmem:[#allocation2 + $0x26] sm:$0x1] %vm268_vm3, %v363_v58 }
  0xe5   : > { %v334_v59 = vpop.permute.xlu1 %333  ;;  %v329_v60 = vpop.permute.xlu0 %328 }
  0xe6   : > { %336 = vst.msk [vmem:[#allocation2 + $0xb] sm:$0x1] %vm268_vm3, %v334_v59  ;;  %v375_v61 = vpop.permute.xlu2 %374  ;;  %v3209_v59 = vstv %s3171_s12  ;;  %s2613_s12 = sld [smem:[#allocation9 + $0xa]] }
  0xe7   : > { %331 = vst.msk [vmem:[#allocation2 + $0x22] sm:$0x1] %vm268_vm3, %v329_v60 }
  0xe8   : > { %377 = vst.msk [vmem:[#allocation2 + $0x10] sm:$0x1] %vm268_vm3, %v375_v61 }
  0xed   : > { %v347_v62 = vpop.permute.xlu1 %346  ;;  %v343_v63 = vpop.permute.xlu0 %342 }
  0xee   : > { %349 = vst.msk [vmem:[#allocation2 + $0x24] sm:$0x1] %vm268_vm3, %v347_v62  ;;  %v387_v0 = vpop.permute.xlu2 %386  ;;  %v399_v62 = vstv %s3158_s24  ;;  %s3465_s24 = sld [smem:[#allocation9 + $0x5]] }
  0xef   : > { %345 = vst.msk [vmem:[#allocation2 + $0xc] sm:$0x1] %vm268_vm3, %v343_v63  ;;  %v3219_v63 = vstv %s3182_s18  ;;  %s2615_s18 = sld [smem:[#allocation9 + $0x18]] }
  0xf0   : > { %389 = vst.msk [vmem:[#allocation2 + $0x29] sm:$0x1] %vm268_vm3, %v387_v0 }
  0xf5   : > { %v359_v1 = vpop.permute.xlu1 %358  ;;  %v355_v2 = vpop.permute.xlu0 %354 }
  0xf6   : > { %361 = vst.msk [vmem:[#allocation2 + $0xe] sm:$0x1] %vm268_vm3, %v359_v1 }
  0xf7   : > { %357 = vst.msk [vmem:[#allocation2 + $0x25] sm:$0x1] %vm268_vm3, %v355_v2  ;;  %v3229_v2 = vstv %s3186_s21  ;;  %s5150_s21 = smov 125  }
  0xfd   : > { %v371_v3 = vpop.permute.xlu1 %370  ;;  %v367_v4 = vpop.permute.xlu0 %366 }
  0xfe   : > { %373 = vst.msk [vmem:[#allocation2 + $0x27] sm:$0x1] %vm268_vm3, %v371_v3  ;;  %v3231_v3 = vstv %s2597_s22  ;;  %s2616_s22 = sld [smem:[#allocation9 + $0x1f]] }
  0xff   : > { %369 = vst.msk [vmem:[#allocation2 + $0xf] sm:$0x1] %vm268_vm3, %v367_v4  ;;  %v671_v4 = vstv %s2606_s27  ;;  %s2617_s27 = sld [smem:[#allocation9 + $0x26]] }
 0x105   : > { %v383_v6 = vpop.permute.xlu1 %382  ;;  %v379_v7 = vpop.permute.xlu0 %378 }
 0x106   : > { %v3140_v9 = vld [vmem:[#allocation2 + $0x8] sm:$0xff]  ;;  %385 = vst.msk [vmem:[#allocation2 + $0x11] sm:$0x1] %vm268_vm3, %v383_v6 }
 0x107   : > { %381 = vst.msk [vmem:[#allocation2 + $0x28] sm:$0x1] %vm268_vm3, %v379_v7  ;;  %v659_v10 = vmul.f32 %v657_v45, %v3140_v9  ;;  %v519_v11 = vmul.f32 %v517_v46, %v3140_v9  ;;  %v533_v12 = vmul.f32 %v531_v5, %v3140_v9  ;;  %v554_v14 = vmul.f32 %v552_v13, %v3140_v9 }
 0x108   : > { %v575_v25 = vmul.f32 %v573_v24, %v3140_v9  ;;  %v3174_v35 = vmul.f32 %v615_v30, %v3140_v9  ;;  %v3180_v40 = vmul.f32 %v594_v36, %v3140_v9  ;;  %v622_v46 = vrot.slane %v616_v41, 5 }
 0x109   : > { %664 = vrot.lane.b32.xlu2 %v659_v10, %s5152_s23  ;;  %524 = vrot.lane.b32.xlu0 %v519_v11, %s5154_s26  ;;  %v539_v16 = vrot.slane %v533_v12, 1  ;;  %v560_v19 = vrot.slane %v554_v14, 2  ;;  %v3213_v60 = vmul.f32 %v3196_v51, %v3140_v9  ;;  %v3223_v0 = vmul.f32 %v3199_v52, %v3140_v9 }
 0x10a   : > { %v581_v31 = vrot.slane %v575_v25, 3  ;;  %v623_v44 = vrot.slane %v3174_v35, 5  ;;  %v602_v45 = vrot.slane %v3180_v40, 4  ;;  %v3226_v1 = vmul.f32 %v636_v53, %v3140_v9 }
 0x10b   : > { %v540_v18 = vsel %vm417_vm5, %v538_v15, %v539_v16  ;;  %v561_v23 = vsel %vm435_vm6, %v559_v22, %v560_v19  ;;  %v406_v8 = vmul.f32 %v404_v48, %v3140_v9  ;;  %v419_v10 = vrot.slane %v3213_v60, 1 }
 0x10c   : > { %543 = vrot.lane.b32.xlu1 %v540_v18, %s5154_s26  ;;  %v624_v54 = vsel %vm488_vm8, %v622_v46, %v623_v44  ;;  %v603_v55 = vsel %vm211_vm0, %v601_v47, %v602_v45  ;;  %v582_v58 = vsel %vm453_vm7, %v580_v50, %v581_v31  ;;  %v437_v14 = vrot.slane %v3223_v0, 2 }
 0x10d   : > { %v395_v20 = vpop.permute.xlu1 %394  ;;  %v391_v21 = vpop.permute.xlu0 %390  ;;  %v3250_v15 = vmul.f32 %v3219_v63, %v3140_v9  ;;  %v673_v18 = vmul.f32 %v671_v4, %v3140_v9  ;;  %v408_v25 = vadd.f32 %v406_v8, %v399_v62  ;;  %v3279_v35 = vmul.f32 %v3229_v2, %v3140_v9 }
 0x10e   : > { %397 = vst.msk [vmem:[#allocation2 + $0x2a] sm:$0x1] %vm268_vm3, %v395_v20  ;;  %v692_v41 = vstv %s3237_s28  ;;  %s2635_s28 = sld [smem:[#allocation9 + $0x14]] }
 0x10f   : > { %393 = vst.msk [vmem:[#allocation2 + $0x12] sm:$0x1] %vm268_vm3, %v391_v21  ;;  %v472_v43 = vrot.slane %v3250_v15, 4 }
 0x111   : > { %564 = vrot.lane.b32.xlu0 %v561_v23, %s5154_s26 }
 0x116   : > { %v3160_v26 = vld [vmem:[#allocation2 + $0x10] sm:$0x3f] }
 0x117   : > { %v576_v27 = vmul.f32 %v573_v24, %v3160_v26  ;;  %v555_v28 = vmul.f32 %v552_v13, %v3160_v26  ;;  %v534_v29 = vmul.f32 %v531_v5, %v3160_v26  ;;  %v639_v56 = vmul.f32 %v636_v53, %v3160_v26 }
 0x118   : > { %v618_v57 = vmul.f32 %v615_v30, %v3160_v26  ;;  %v597_v61 = vmul.f32 %v594_v36, %v3160_v26  ;;  %v3235_v5 = vmul.f32 %v3209_v59, %v3140_v9  ;;  %v413_v12 = vmul.f32 %v3196_v51, %v3160_v26 }
 0x119   : > { %v583_v32 = vrot.slane %v576_v27, 3  ;;  %v562_v33 = vrot.slane %v555_v28, 2  ;;  %v541_v34 = vrot.slane %v534_v29, 1  ;;  %v646_v6 = vrot.slane %v639_v56, 6 }
 0x11a   : > { %v625_v7 = vrot.slane %v618_v57, 5  ;;  %v604_v11 = vrot.slane %v597_v61, 4  ;;  %v431_v13 = vmul.f32 %v3199_v52, %v3160_v26  ;;  %v449_v17 = vmul.f32 %v3209_v59, %v3160_v26 }
 0x11b   : > { %v584_v37 = vsel %vm453_vm7, %v581_v31, %v583_v32  ;;  %v563_v38 = vsel %vm435_vm6, %v560_v19, %v562_v33  ;;  %v542_v39 = vsel %vm417_vm5, %v539_v16, %v541_v34  ;;  %v644_v16 = vrot.slane %v3226_v1, 6 }
 0x11c   : > { %587 = vrot.lane.b32.xlu0 %v584_v37, %s5154_s26  ;;  %566 = vrot.lane.b32.xlu1 %v563_v38, %s5154_s26  ;;  %v421_v19 = vrot.slane %v413_v12, 1  ;;  %v439_v20 = vrot.slane %v431_v13, 2  ;;  %v467_v21 = vmul.f32 %v3219_v63, %v3160_v26  ;;  %v626_v23 = vsel %vm488_vm8, %v623_v44, %v625_v7 }
 0x11d   : > { %545 = vrot.lane.b32.xlu2 %v542_v39, %s5154_s26  ;;  %v647_v22 = vsel %vm506_vm9, %v644_v16, %v646_v6  ;;  %v674_v24 = vmul.f32 %v671_v4, %v3160_v26  ;;  %v605_v27 = vsel %vm211_vm0, %v602_v45, %v604_v11  ;;  %v457_v29 = vrot.slane %v449_v17, 3 }
 0x11e   : > { %v422_v28 = vsel %vm417_vm5, %v419_v10, %v421_v19  ;;  %v484_v30 = vmul.f32 %v3229_v2, %v3160_v26  ;;  %v455_v31 = vrot.slane %v3235_v5, 3  ;;  %v672_v32 = vmul.f32 %v671_v4, %v3114_v49 }
 0x11f   : > { %v637_v33 = vmul.f32 %v636_v53, %v3114_v49  ;;  %v426_v34 = vadd.f32 %v422_v28, %v408_v25  ;;  %v440_v36 = vsel %vm435_vm6, %v437_v14, %v439_v20  ;;  %v474_v37 = vrot.slane %v467_v21, 4 }
 0x120   : > { %v502_v38 = vmul.f32 %v3231_v3, %v3160_v26  ;;  %v679_v39 = vrot.slane %v673_v18, 1  ;;  %v681_v40 = vrot.slane %v674_v24, 1  ;;  %v3290_v44 = vmul.f32 %v3231_v3, %v3140_v9 }
 0x121   : > { %v444_v42 = vadd.f32 %v440_v36, %v426_v34  ;;  %v458_v45 = vsel %vm453_vm7, %v455_v31, %v457_v29  ;;  %v492_v46 = vrot.slane %v484_v30, 5  ;;  %v678_v47 = vrot.slane %v672_v32, 1 }
 0x122   : > { %v643_v50 = vrot.slane %v637_v33, 6  ;;  %v713_v53 = vstv %s3253_s5  ;;  %v475_v57 = vsel %vm211_vm0, %v472_v43, %v474_v37  ;;  %v682_v1 = vsel %vm417_vm5, %v679_v39, %v681_v40  ;;  %s2634_s5 = sld [smem:[#allocation9 + $0xd]] }
 0x123   : > { %v715_v56 = vmul.f32 %v713_v53, %v3140_v9  ;;  %v680_v61 = vsel %vm417_vm5, %v678_v47, %v679_v39  ;;  %v695_v4 = vmul.f32 %v692_v41, %v3160_v26  ;;  %v508_v7 = vrot.slane %v3290_v44, 6 }
 0x124   : > { %627 = vrot.lane.b32.xlu0 %v624_v54, %s5154_s26  ;;  %606 = vrot.lane.b32.xlu1 %v603_v55, %s5154_s26  ;;  %v462_v54 = vadd.f32 %v458_v45, %v444_v42  ;;  %v490_v55 = vrot.slane %v3279_v35, 5  ;;  %v645_v8 = vsel %vm506_vm9, %v643_v50, %v644_v16  ;;  %v694_v11 = vmul.f32 %v692_v41, %v3140_v9 }
 0x125   : > { %585 = vrot.lane.b32.xlu2 %v582_v58, %s5154_s26  ;;  %v510_v58 = vrot.slane %v502_v38, 6  ;;  %v714_v13 = vmul.f32 %v713_v53, %v3114_v49  ;;  %v693_v18 = vmul.f32 %v692_v41, %v3114_v49  ;;  %v702_v20 = vrot.slane %v695_v4, 2 }
 0x126   : > { %v479_v6 = vadd.f32 %v475_v57, %v462_v54  ;;  %v493_v12 = vsel %vm488_vm8, %v490_v55, %v492_v46  ;;  %v721_v21 = vrot.slane %v715_v56, 3  ;;  %v734_v25 = vstv %s2609_s7  ;;  %s2618_s7 = sld [smem:[#allocation9 + $0x2d]] }
 0x127   : > { %v511_v19 = vsel %vm506_vm9, %v508_v7, %v510_v58  ;;  %v699_v24 = vrot.slane %v693_v18, 2  ;;  %v736_v29 = vmul.f32 %v734_v25, %v3140_v9  ;;  %v737_v30 = vmul.f32 %v734_v25, %v3160_v26 }
 0x128   : > { %v497_v17 = vadd.f32 %v493_v12, %v479_v6  ;;  %v716_v33 = vmul.f32 %v713_v53, %v3160_v26  ;;  %v735_v34 = vmul.f32 %v734_v25, %v3114_v49  ;;  %v755_v40 = vstv %s2610_s19  ;;  %s2620_s19 = sld [smem:[#allocation9 + $0xb]] }
 0x129   : > { %v742_v36 = vrot.slane %v736_v29, 4  ;;  %v744_v37 = vrot.slane %v737_v30, 4  ;;  %v776_v41 = vstv %s2611_s10  ;;  %v758_v46 = vmul.f32 %v755_v40, %v3160_v26  ;;  %s3422_s10 = sld [smem:[#allocation9 + $0x4]] }
 0x12a   : > { %v3318_v16 = vadd.f32 %v511_v19, %v497_v17  ;;  %v723_v38 = vrot.slane %v716_v33, 3  ;;  %v741_v39 = vrot.slane %v735_v34, 4  ;;  %v778_v47 = vmul.f32 %v776_v41, %v3140_v9 }
 0x12b   : > { %v745_v45 = vsel %vm211_vm0, %v742_v36, %v744_v37  ;;  %v757_v53 = vmul.f32 %v755_v40, %v3140_v9  ;;  %v777_v54 = vmul.f32 %v776_v41, %v3114_v49  ;;  %v756_v56 = vmul.f32 %v755_v40, %v3114_v49 }
 0x12c   : > { %650 = vrot.lane.b32.xlu0 %v647_v22, %s5154_s26  ;;  %629 = vrot.lane.b32.xlu1 %v626_v23, %s5154_s26  ;;  %v700_v22 = vrot.slane %v694_v11, 2  ;;  %v720_v23 = vrot.slane %v714_v13, 3  ;;  %v743_v42 = vsel %vm211_vm0, %v741_v39, %v742_v36  ;;  %v724_v50 = vsel %vm453_vm7, %v721_v21, %v723_v38 }
 0x12d   : > { %608 = vrot.lane.b32.xlu2 %v605_v27, %s5154_s26  ;;  %v765_v57 = vrot.slane %v758_v46, 5  ;;  %v784_v58 = vrot.slane %v778_v47, 6  ;;  %v762_v4 = vrot.slane %v756_v56, 5  ;;  %v779_v12 = vmul.f32 %v776_v41, %v3160_v26 }
 0x12e   : > { %v703_v27 = vsel %vm435_vm6, %v700_v22, %v702_v20  ;;  %v722_v28 = vsel %vm453_vm7, %v720_v23, %v721_v21  ;;  %v701_v32 = vsel %vm435_vm6, %v699_v24, %v700_v22  ;;  %v797_v13 = vstv %s2612_s11  ;;  %s2621_s11 = sld [smem:[#allocation9 + $0x12]] }
 0x12f   : > { %v786_v17 = vrot.slane %v779_v12, 6  ;;  %v798_v18 = vmul.f32 %v797_v13, %v3114_v49  ;;  %v799_v19 = vmul.f32 %v797_v13, %v3140_v9  ;;  %v811_v20 = vstv %s2613_s12  ;;  %s3441_s12 = sld [smem:[#allocation9 + $0x19]] }
 0x130   : > { %v832_v21 = vstv %s2614_s13  ;;  %v814_v22 = vmul.f32 %v811_v20, %v3160_v26  ;;  %v813_v25 = vmul.f32 %v811_v20, %v3140_v9  ;;  %v853_v36 = vstv %s2615_s18  ;;  %s3454_s13 = sld [smem:[#allocation9 + $0x27]] }
 0x131   : > { %v834_v23 = vmul.f32 %v832_v21, %v3140_v9  ;;  %v787_v24 = vsel %vm506_vm9, %v784_v58, %v786_v17  ;;  %v855_v39 = vmul.f32 %v853_v36, %v3140_v9  ;;  %v856_v40 = vmul.f32 %v853_v36, %v3160_v26  ;;  %s3459_s18 = sld [smem:[#allocation9 + $0x2e]] }
 0x132   : > { %v821_v29 = vrot.slane %v814_v22, 1  ;;  %v895_v56 = vstv %s2617_s27  ;;  %v3380_v12 = vstv %s2635_s28  ;;  %v3382_v13 = vstv %s2634_s5  ;;  %s3474_s27 = sld [smem:[#allocation9 + $0xc]] }
 0x133   : > { %v840_v30 = vrot.slane %v834_v23, 2  ;;  %v861_v46 = vrot.slane %v855_v39, 3  ;;  %v863_v47 = vrot.slane %v856_v40, 3  ;;  %5239 = vst [vmem:[#allocation14_spill] sm:$0xff] %v3380_v12  ;;  %v3386_v17 = vmul.f32 %v3380_v12, %v3140_v9  ;;  %s3483_s28 = sld [smem:[#allocation9 + $0x1a]] }
 0x134   : > { %683 = vrot.lane.b32.xlu0 %v680_v61, %s5152_s23  ;;  %685 = vrot.lane.b32.xlu1 %v682_v1, %s5152_s23  ;;  %v763_v61 = vrot.slane %v757_v53, 5  ;;  %v783_v1 = vrot.slane %v777_v54, 6  ;;  %v874_v54 = vstv %s2616_s22  ;;  %5240 = vst [vmem:[#allocation15_spill] sm:$0xff] %v3382_v13  ;;  %v916_v23 = vstv %s2618_s7  ;;  %s2920_s22 = smov 124   ;;  %s3487_s5 = sld [smem:[#allocation9 + $0x13]] }
 0x135   : > { %648 = vrot.lane.b32.xlu2 %v645_v8, %s5154_s26  ;;  %5241 = vst [vmem:[#allocation16_spill] sm:$0xff] %v3386_v17  ;;  %v898_v39 = vmul.f32 %v895_v56, %v3160_v26  ;;  %s3497_s7 = sld [smem:[#allocation9 + $0x21]] }
 0x136   : > { %v766_v6 = vsel %vm488_vm8, %v763_v61, %v765_v57  ;;  %v785_v8 = vsel %vm506_vm9, %v783_v1, %v784_v58  ;;  %v764_v11 = vsel %vm488_vm8, %v762_v4, %v763_v61  ;;  %v864_v58 = vsel %vm453_vm7, %v861_v46, %v863_v47  ;;  %s3704_s26 = sld [smem:[#allocation9 + $0x4c]] }
 0x137   : > { %v877_v61 = vmul.f32 %v874_v54, %v3160_v26  ;;  %v897_v1 = vmul.f32 %v895_v56, %v3140_v9 }
 0x13c   : > { %706 = vrot.lane.b32.xlu0 %v703_v27, %s5152_s23  ;;  %725 = vrot.lane.b32.xlu1 %v722_v28, %s5152_s23  ;;  %v833_v27 = vmul.f32 %v832_v21, %v3114_v49  ;;  %v812_v28 = vmul.f32 %v811_v20, %v3114_v49  ;;  %v884_v20 = vrot.slane %v877_v61, 4 }
 0x13d   : > { %704 = vrot.lane.b32.xlu2 %v701_v32, %s5152_s23  ;;  %v819_v32 = vrot.slane %v813_v25, 1  ;;  %v1234_v25 = vmul.f32 %v3382_v13, %v3160_v26 }
 0x13e   : > { %v839_v33 = vrot.slane %v833_v27, 2  ;;  %v818_v34 = vrot.slane %v812_v28, 1 }
 0x13f   : > { %v822_v37 = vsel %vm417_vm5, %v819_v32, %v821_v29  ;;  %v918_v29 = vmul.f32 %v916_v23, %v3140_v9 }
 0x140   : > { %v841_v38 = vsel %vm435_vm6, %v839_v33, %v840_v30  ;;  %v820_v41 = vsel %vm417_vm5, %v818_v34, %v819_v32  ;;  %v1241_v34 = vrot.slane %v1234_v25, 1 }
 0x141   : > { %v924_v47 = vrot.slane %v918_v29, 6 }
 0x144   : > { %746 = vrot.lane.b32.xlu0 %v743_v42, %s5152_s23  ;;  %748 = vrot.lane.b32.xlu1 %v745_v45, %s5152_s23  ;;  %v835_v42 = vmul.f32 %v832_v21, %v3160_v26  ;;  %v854_v45 = vmul.f32 %v853_v36, %v3114_v49  ;;  %v903_v21 = vrot.slane %v897_v1, 5 }
 0x145   : > { %727 = vrot.lane.b32.xlu2 %v724_v50, %s5152_s23 }
 0x146   : > { %v842_v50 = vrot.slane %v835_v42, 2  ;;  %v860_v53 = vrot.slane %v854_v45, 3  ;;  %v917_v45 = vmul.f32 %v916_v23, %v3114_v49 }
 0x148   : > { %v862_v57 = vsel %vm453_vm7, %v860_v53, %v861_v46  ;;  %v843_v4 = vsel %vm435_vm6, %v840_v30, %v842_v50  ;;  %v5157_v30 = vrot.slane %v3386_v17, 2  ;;  %v905_v53 = vrot.slane %v898_v39, 5 }
 0x14c   : > { %769 = vrot.lane.b32.xlu0 %v766_v6, %s5152_s23  ;;  %788 = vrot.lane.b32.xlu1 %v785_v8, %s5152_s23  ;;  %v876_v6 = vmul.f32 %v874_v54, %v3140_v9  ;;  %v896_v8 = vmul.f32 %v895_v56, %v3114_v49  ;;  %v923_v56 = vrot.slane %v917_v45, 6  ;;  %v3485_v45 = vpop.permute.xlu1 %662 }
 0x14d   : > { %767 = vrot.lane.b32.xlu2 %v764_v11, %s5152_s23  ;;  %v875_v11 = vmul.f32 %v874_v54, %v3114_v49  ;;  %v411_v54 = vmul.f32 %v3196_v51, %v3114_v49  ;;  %v906_v51 = vsel %vm488_vm8, %v903_v21, %v905_v53  ;;  %5246 = vst [vmem:[#allocation21_spill] sm:$0xff] %v3485_v45  ;;  %v1014_v53 = vstv %s3449_s9  ;;  %s3574_s9 = sld [smem:[#allocation9 + $0x38]] }
 0x14e   : > { %v882_v22 = vrot.slane %v876_v6, 4  ;;  %v902_v27 = vrot.slane %v896_v8, 5  ;;  %v429_v8 = vmul.f32 %v3199_v52, %v3114_v49 }
 0x14f   : > { %v881_v28 = vrot.slane %v875_v11, 4  ;;  %v418_v6 = vrot.slane %v411_v54, 1  ;;  %v3495_v54 = vmul.f32 %v3231_v3, %v3114_v49  ;;  %v1015_v3 = vmul.f32 %v1014_v53, %v3114_v49 }
 0x150   : > { %v885_v36 = vsel %vm211_vm0, %v882_v22, %v884_v20  ;;  %v436_v52 = vrot.slane %v429_v8, 2 }
 0x151   : > { %v883_v40 = vsel %vm211_vm0, %v881_v28, %v882_v22 }
 0x154   : > { %802 = vrot.lane.b32.xlu0 %v798_v18, %s5150_s21  ;;  %804 = vrot.lane.b32.xlu1 %v799_v19, %s5150_s21  ;;  %v3390_v18 = vmul.f32 %v3382_v13, %v3140_v9  ;;  %v3392_v19 = vpop.permute.xlu2 %522 }
 0x155   : > { %790 = vrot.lane.b32.xlu2 %v787_v24, %s5152_s23  ;;  %v1255_v24 = vmul.f32 %v3380_v12, %v3160_v26  ;;  %s3688_s23 = sld [smem:[#allocation9 + $0x3e]] }
 0x156   : > { %5242 = vst [vmem:[#allocation17_spill] sm:$0xff] %v3390_v18  ;;  %v5156_v32 = vrot.slane %v3390_v18, 1  ;;  %v3824_v18 = vstv %s3704_s26  ;;  %s4068_s26 = sld [smem:[#allocation9 + $0x29]] }
 0x157   : > { %v1262_v33 = vrot.slane %v1255_v24, 2  ;;  %5266 = vst [vmem:[#allocation41_spill] sm:$0xff] %v3824_v18 }
 0x158   : > { %v3416_v42 = vsel %vm417_vm5, %v5156_v32, %v1241_v34  ;;  %v465_v34 = vmul.f32 %v3219_v63, %v3114_v49  ;;  %v482_v63 = vmul.f32 %v3229_v2, %v3114_v49 }
 0x159   : > { %5244 = vst [vmem:[#allocation19_spill] sm:$0xff] %v3416_v42 }
 0x15a   : > { %v471_v2 = vrot.slane %v465_v34, 4 }
 0x15c   : > { %825 = vrot.lane.b32.xlu0 %v822_v37, %s5150_s21  ;;  %844 = vrot.lane.b32.xlu1 %v841_v38, %s5150_s21  ;;  %v904_v37 = vsel %vm488_vm8, %v902_v27, %v903_v21  ;;  %v919_v38 = vmul.f32 %v916_v23, %v3160_v26  ;;  %v937_v23 = vstv %s3422_s10  ;;  %v447_v27 = vmul.f32 %v3209_v59, %v3114_v49  ;;  %s3536_s10 = sld [smem:[#allocation9 + $0x28]] }
 0x15d   : > { %823 = vrot.lane.b32.xlu2 %v820_v41, %s5150_s21  ;;  %v3411_v41 = vsel %vm435_vm6, %v5157_v30, %v1262_v33  ;;  %v939_v60 = vmul.f32 %v937_v23, %v3140_v9  ;;  %v938_v29 = vmul.f32 %v937_v23, %v3114_v49 }
 0x15e   : > { %5243 = vst [vmem:[#allocation18_spill] sm:$0xff] %v3411_v41  ;;  %v926_v50 = vrot.slane %v919_v38, 6 }
 0x160   : > { %v927_v61 = vsel %vm506_vm9, %v924_v47, %v926_v50  ;;  %v993_v50 = vstv %s3441_s12  ;;  %s3569_s12 = sld [smem:[#allocation9 + $0x3d]] }
 0x161   : > { %v996_v8 = vmul.f32 %v993_v50, %v3160_v26 }
 0x163   : > { %v3420_v46 = vpop.permute.xlu2 %664 }
 0x164   : > { %865 = vrot.lane.b32.xlu0 %v862_v57, %s5150_s21  ;;  %867 = vrot.lane.b32.xlu1 %v864_v58, %s5150_s21  ;;  %5245 = vst [vmem:[#allocation20_spill] sm:$0xff] %v3420_v46  ;;  %v951_v57 = vstv %s2620_s19  ;;  %v925_v58 = vsel %vm506_vm9, %v923_v56, %v924_v47  ;;  %s3503_s19 = sld [smem:[#allocation9 + $0x2f]] }
 0x165   : > { %846 = vrot.lane.b32.xlu2 %v843_v4, %s5150_s21  ;;  %v3429_v1 = vmul.f32 %v951_v57, %v3140_v9  ;;  %v405_v4 = vmul.f32 %v404_v48, %v3114_v49  ;;  %v952_v11 = vmul.f32 %v951_v57, %v3114_v49  ;;  %v420_v48 = vsel %vm417_vm5, %v418_v6, %v419_v10 }
 0x166   : > { %v972_v10 = vstv %s2621_s11  ;;  %v954_v59 = vmul.f32 %v951_v57, %v3160_v26  ;;  %v994_v6 = vmul.f32 %v993_v50, %v3114_v49  ;;  %s3557_s11 = sld [smem:[#allocation9 + $0x5f]] }
 0x167   : > { %v959_v22 = vrot.slane %v3429_v1, 1  ;;  %v407_v21 = vadd.f32 %v405_v4, %v399_v62  ;;  %v958_v24 = vrot.slane %v952_v11, 1  ;;  %v974_v62 = vmul.f32 %v972_v10, %v3140_v9 }
 0x168   : > { %v975_v33 = vmul.f32 %v972_v10, %v3160_v26  ;;  %v973_v38 = vmul.f32 %v972_v10, %v3114_v49  ;;  %v961_v56 = vrot.slane %v954_v59, 1  ;;  %v1035_v1 = vstv %s3454_s13  ;;  %s3582_s13 = sld [smem:[#allocation9 + $0x3f]] }
 0x169   : > { %v425_v25 = vadd.f32 %v420_v48, %v407_v21  ;;  %v960_v28 = vsel %vm417_vm5, %v958_v24, %v959_v22  ;;  %v980_v0 = vrot.slane %v974_v62, 2  ;;  %v3512_v11 = vmul.f32 %v1014_v53, %v3140_v9 }
 0x16a   : > { %v507_v48 = vrot.slane %v3495_v54, 6  ;;  %v962_v21 = vsel %vm417_vm5, %v959_v22, %v961_v56  ;;  %v3519_v23 = vmul.f32 %v1035_v1, %v3114_v49  ;;  %v473_v24 = vsel %vm211_vm0, %v471_v2, %v472_v43 }
 0x16b   : > { %v1021_v62 = vrot.slane %v1015_v3, 4  ;;  %v1003_v43 = vrot.slane %v996_v8, 3  ;;  %v1022_v34 = vrot.slane %v3512_v11, 4  ;;  %v1000_v59 = vrot.slane %v994_v6, 3 }
 0x16c   : > { %888 = vrot.lane.b32.xlu0 %v885_v36, %s5150_s21  ;;  %907 = vrot.lane.b32.xlu1 %v904_v37, %s5150_s21  ;;  %v438_v37 = vsel %vm435_vm6, %v436_v52, %v437_v14  ;;  %v982_v14 = vrot.slane %v975_v33, 2  ;;  %v1077_v52 = vstv %s3465_s24  ;;  %v1112_v33 = vstv %s3487_s5  ;;  %s3624_s5 = sld [smem:[#allocation9 + $0x4d]] }
 0x16d   : > { %886 = vrot.lane.b32.xlu2 %v883_v40, %s5150_s21  ;;  %v443_v39 = vadd.f32 %v438_v37, %v425_v25  ;;  %v454_v40 = vrot.slane %v447_v27, 3  ;;  %v1056_v25 = vstv %s3459_s18  ;;  %v1091_v27 = vstv %s3474_s27  ;;  %s3590_s18 = sld [smem:[#allocation9 + $0x4b]] }
 0x16e   : > { %v3544_v37 = vmul.f32 %v1077_v52, %v3114_v49  ;;  %v3567_v2 = vstv %s3503_s19  ;;  %v1093_v6 = vmul.f32 %v1091_v27, %v3140_v9  ;;  %s3599_s27 = sld [smem:[#allocation9 + $0x44]]  ;;  %v1115_v44 = vmul.f32 %v1112_v33, %v3160_v26 }
 0x16f   : > { %v456_v57 = vsel %vm453_vm7, %v454_v40, %v455_v31  ;;  %v983_v31 = vsel %vm435_vm6, %v980_v0, %v982_v14  ;;  %v3563_v14 = vmul.f32 %v1112_v33, %v3114_v49  ;;  %5247 = vst [vmem:[#allocation22_spill] sm:$0xff] %v3567_v2  ;;  %s3633_s19 = sld [smem:[#allocation9 + $0x5b]] }
 0x170   : > { %v461_v4 = vadd.f32 %v456_v57, %v443_v39  ;;  %v3551_v39 = vmul.f32 %v1091_v27, %v3114_v49  ;;  %s3674_s24 = sld [smem:[#allocation9 + $0x45]] }
 0x172   : > { %v478_v10 = vadd.f32 %v473_v24, %v461_v4  ;;  %v1038_v4 = vmul.f32 %v1035_v1, %v3160_v26 }
 0x174   : > { %928 = vrot.lane.b32.xlu0 %v925_v58, %s5150_s21  ;;  %930 = vrot.lane.b32.xlu1 %v927_v61, %s5150_s21  ;;  %v489_v58 = vrot.slane %v482_v63, 5  ;;  %v979_v61 = vrot.slane %v973_v38, 2  ;;  %v1042_v63 = vrot.slane %v3519_v23, 5  ;;  %v3548_v38 = vmul.f32 %v1056_v25, %v3114_v49 }
 0x175   : > { %909 = vrot.lane.b32.xlu2 %v906_v51, %s5150_s21  ;;  %v995_v51 = vmul.f32 %v993_v50, %v3140_v9  ;;  %v1154_v50 = vstv %s3497_s7  ;;  %s3626_s7 = sld [smem:[#allocation9 + $0x54]] }
 0x176   : > { %v981_v5 = vsel %vm435_vm6, %v979_v61, %v980_v0  ;;  %v491_v0 = vsel %vm488_vm8, %v489_v58, %v490_v55  ;;  %v1037_v61 = vmul.f32 %v1035_v1, %v3140_v9  ;;  %v1023_v55 = vsel %vm211_vm0, %v1021_v62, %v1022_v34  ;;  %s3666_s21 = sld [smem:[#allocation9 + $0x59]] }
 0x177   : > { %v3446_v20 = vpop.permute.xlu2 %545  ;;  %v1001_v22 = vrot.slane %v995_v51, 3  ;;  %v496_v56 = vadd.f32 %v491_v0, %v478_v10  ;;  %v1017_v58 = vmul.f32 %v1014_v53, %v3160_v26  ;;  %v1058_v51 = vmul.f32 %v1056_v25, %v3140_v9 }
 0x178   : > { %v1059_v1 = vmul.f32 %v1056_v25, %v3160_v26  ;;  %v1063_v3 = vrot.slane %v3548_v38, 6  ;;  %v1098_v53 = vrot.slane %v3551_v39, 1  ;;  %v1043_v25 = vrot.slane %v1037_v61, 5 }
 0x179   : > { %v1002_v57 = vsel %vm453_vm7, %v1000_v59, %v1001_v22  ;;  %v1004_v35 = vsel %vm453_vm7, %v1001_v22, %v1003_v43  ;;  %v3610_v10 = vmul.f32 %v3567_v2, %v3114_v49  ;;  %v3613_v22 = vstv %s3536_s10  ;;  %s3642_s10 = sld [smem:[#allocation9 + $0x52]] }
 0x17a   : > { %v509_v62 = vsel %vm506_vm9, %v507_v48, %v508_v7  ;;  %v1045_v59 = vrot.slane %v1038_v4, 5  ;;  %v1024_v38 = vrot.slane %v1017_v58, 4  ;;  %v1064_v39 = vrot.slane %v1058_v51, 6 }
 0x17b   : > { %v3469_v36 = vpop.permute.xlu0 %524  ;;  %5248 = vst [vmem:[#allocation23_spill] sm:$0xff] %v3610_v10  ;;  %v514_v0 = vadd.f32 %v509_v62, %v496_v56  ;;  %v1156_v48 = vmul.f32 %v1154_v50, %v3140_v9  ;;  %v1044_v56 = vsel %vm488_vm8, %v1042_v63, %v1043_v25  ;;  %v1157_v4 = vmul.f32 %v1154_v50, %v3160_v26 }
 0x17c   : > { %944 = vrot.lane.b32.xlu0 %v939_v60, %s2920_s22  ;;  %963 = vrot.lane.b32.xlu1 %v960_v28, %s2920_s22  ;;  %v3529_v60 = vstv %s3483_s28  ;;  %s3615_s28 = sld [smem:[#allocation9 + $0x46]]  ;;  %v1065_v58 = vsel %vm506_vm9, %v1063_v3, %v1064_v39  ;;  %v1122_v63 = vrot.slane %v1115_v44, 2  ;;  %v3696_v62 = vstv %s3569_s12 }
 0x17d   : > { %942 = vrot.lane.b32.xlu2 %v938_v29, %s2920_s22  ;;  %v3555_v40 = vmul.f32 %v3529_v60, %v3114_v49  ;;  %v1135_v7 = vmul.f32 %v3529_v60, %v3140_v9  ;;  %v3636_v61 = vadd.f32 %v3392_v19, %v514_v0  ;;  %v3652_v19 = vmul.f32 %v1077_v52, %v3140_v9  ;;  %v3668_v52 = vld [vmem:[#allocation2 + $0x20] sm:$0xff]  ;;  %s3737_s12 = sld [smem:[#allocation9 + $0x53]] }
 0x17e   : > { %v3531_v28 = vpop.permute.xlu1 %543  ;;  %5252 = vst [vmem:[#allocation27_spill] sm:$0xff] %v3696_v62  ;;  %v3732_v44 = vstv %s3599_s27  ;;  %v3807_v42 = vstv %s3666_s21  ;;  %v3810_v41 = vstv %s3674_s24  ;;  %s4074_s21 = sld [smem:[#allocation9 + $0x30]]  ;;  %s2922_s27 = smov 122  }
 0x17f   : > { %v3489_v47 = vpop.permute.xlu2 %585  ;;  %v1140_v8 = vrot.slane %v3555_v40, 3  ;;  %v3765_v40 = vstv %s3624_s5  ;;  %5262 = vst [vmem:[#allocation37_spill] sm:$0xff] %v3807_v42  ;;  %v549_v13 = vadd.f32 %v3531_v28, %v3636_v61  ;;  %v3846_v46 = vmul.f32 %v3807_v42, %v3668_v52  ;;  %s4165_s5 = sld [smem:[#allocation9 + $0x32]] }
 0x180   : > { %5263 = vst [vmem:[#allocation38_spill] sm:$0xff] %v3810_v41  ;;  %s2653_s24 = sld [smem:[#allocation9 + $0x5c]] }
 0x181   : > { %5270 = vst [vmem:[#allocation45_spill] sm:$0xff] %v3846_v46 }
 0x183   : > { %v3533_v29 = vpop.permute.xlu0 %564 }
 0x184   : > { %984 = vrot.lane.b32.xlu0 %v981_v5, %s2920_s22  ;;  %986 = vrot.lane.b32.xlu1 %v983_v31, %s2920_s22  ;;  %v1094_v5 = vmul.f32 %v1091_v27, %v3160_v26  ;;  %v3595_v31 = vmul.f32 %v1112_v33, %v3140_v9  ;;  %v3606_v27 = vmul.f32 %v1154_v50, %v3114_v49  ;;  %v1066_v49 = vrot.slane %v1059_v1, 6 }
 0x185   : > { %965 = vrot.lane.b32.xlu2 %v962_v21, %s2920_s22  ;;  %v1119_v21 = vrot.slane %v3563_v14, 2  ;;  %v1099_v14 = vrot.slane %v1093_v6, 1  ;;  %v1046_v33 = vsel %vm488_vm8, %v1043_v25, %v1045_v59  ;;  %v1141_v50 = vrot.slane %v1135_v7, 3 }
 0x186   : > { %v1120_v54 = vrot.slane %v3595_v31, 2  ;;  %v1162_v1 = vrot.slane %v1156_v48, 4  ;;  %v3682_v31 = vmul.f32 %v3567_v2, %v3140_v9  ;;  %v3686_v25 = vmul.f32 %v3613_v22, %v3140_v9 }
 0x187   : > { %v3538_v15 = vpop.permute.xlu2 %608  ;;  %v3699_v59 = vstv %s3574_s9  ;;  %v3712_v9 = vmul.f32 %v3696_v62, %v3668_v52  ;;  %v3735_v7 = vstv %s3615_s28  ;;  %s2921_s9 = smov 123   ;;  %v3821_v2 = vstv %s3688_s23  ;;  %s4000_s23 = sld [smem:[#allocation9 + $0x1b]] }
 0x188   : > { %v3672_v51 = vsel %vm435_vm6, %v1119_v21, %v1120_v54  ;;  %5250 = vst [vmem:[#allocation25_spill] sm:$0xff] %v3686_v25  ;;  %v3716_v0 = vmul.f32 %v3699_v59, %v3668_v52  ;;  %v3740_v48 = vsel %vm435_vm6, %v1120_v54, %v1122_v63  ;;  %v3804_v63 = vstv %s3654_s6  ;;  %s3977_s6 = sld [smem:[#allocation9 + $0x6]] }
 0x189   : > { %5253 = vst [vmem:[#allocation28_spill] sm:$0xff] %v3699_v59  ;;  %v3842_v12 = vmul.f32 %v3804_v63, %v3668_v52  ;;  %v3855_v45 = vmul.f32 %v3821_v2, %v3668_v52  ;;  %v570_v10 = vadd.f32 %v3533_v29, %v549_v13  ;;  %s4128_s28 = sld [smem:[#allocation9 + $0x39]] }
 0x18a   : > { %5255 = vst [vmem:[#allocation30_spill] sm:$0xff] %v3716_v0 }
 0x18b   : > { %5261 = vst [vmem:[#allocation36_spill] sm:$0xff] %v3804_v63  ;;  %v591_v25 = vadd.f32 %v3489_v47, %v570_v10 }
 0x18c   : > { %1007 = vrot.lane.b32.xlu0 %v1004_v35, %s2920_s22  ;;  %1026 = vrot.lane.b32.xlu1 %v1023_v55, %s2920_s22  ;;  %v1136_v35 = vmul.f32 %v3529_v60, %v3160_v26  ;;  %v1025_v55 = vsel %vm211_vm0, %v1022_v34, %v1024_v38  ;;  %v1067_v26 = vsel %vm506_vm9, %v1064_v39, %v1066_v49  ;;  %v1161_v34 = vrot.slane %v3606_v27, 4 }
 0x18d   : > { %1005 = vrot.lane.b32.xlu2 %v1002_v57, %s2920_s22  ;;  %v1101_v57 = vrot.slane %v1094_v5, 1  ;;  %v3660_v60 = vsel %vm417_vm5, %v1098_v53, %v1099_v14  ;;  %v1164_v5 = vrot.slane %v1157_v4, 4  ;;  %v3693_v27 = vstv %s3557_s11  ;;  %s3721_s11 = sld [smem:[#allocation9 + $0x5a]]  ;;  %5265 = vst [vmem:[#allocation40_spill] sm:$0xff] %v3821_v2 }
 0x18e   : > { %v3601_v23 = vpop.permute.xlu1 %566  ;;  %v3603_v24 = vpop.permute.xlu0 %587  ;;  %v1143_v53 = vrot.slane %v1136_v35, 3  ;;  %v3702_v38 = vstv %s3582_s13  ;;  %v3708_v39 = vmul.f32 %v3693_v27, %v3668_v52  ;;  %v3719_v49 = vstv %s3590_s18  ;;  %s3812_s13 = sld [smem:[#allocation9 + $0x61]]  ;;  %5269 = vst [vmem:[#allocation44_spill] sm:$0xff] %v3842_v12 }
 0x18f   : > { %v3622_v43 = vpop.permute.xlu2 %648  ;;  %v3663_v11 = vsel %vm417_vm5, %v1099_v14, %v1101_v57  ;;  %5254 = vst [vmem:[#allocation29_spill] sm:$0xff] %v3702_v38  ;;  %v3725_v14 = vmul.f32 %v3702_v38, %v3668_v52  ;;  %v3729_v57 = vmul.f32 %v3719_v49, %v3668_v52  ;;  %v3749_v4 = vmul.f32 %v3732_v44, %v3668_v52  ;;  %s2637_s18 = sld [smem:[#allocation9 + $0x22]] }
 0x190   : > { %5249 = vst [vmem:[#allocation24_spill] sm:$0xff] %v3622_v43  ;;  %v3753_v35 = vmul.f32 %v3735_v7, %v3668_v52  ;;  %v3762_v54 = vsel %vm453_vm7, %v1141_v50, %v1143_v53 }
 0x191   : > { %5256 = vst [vmem:[#allocation31_spill] sm:$0xff] %v3725_v14 }
 0x192   : > { %5272 = vst [vmem:[#allocation47_spill] sm:$0xff] %v3855_v45 }
 0x194   : > { %1047 = vrot.lane.b32.xlu0 %v1044_v56, %s2920_s22  ;;  %1049 = vrot.lane.b32.xlu1 %v1046_v33, %s2920_s22  ;;  %v3745_v56 = vsel %vm453_vm7, %v1140_v8, %v1141_v50  ;;  %v3756_v33 = vsel %vm211_vm0, %v1161_v34, %v1162_v1  ;;  %v3774_v50 = vstv %s3626_s7  ;;  %v3797_v8 = vstv %s3642_s10  ;;  %s4168_s7 = sld [smem:[#allocation9 + $0x47]] }
 0x195   : > { %1028 = vrot.lane.b32.xlu2 %v1025_v55, %s2920_s22  ;;  %v3759_v55 = vsel %vm211_vm0, %v1162_v1, %v1164_v5  ;;  %5257 = vst [vmem:[#allocation32_spill] sm:$0xff] %v3774_v50  ;;  %v3785_v5 = vmul.f32 %v3774_v50, %v3668_v52  ;;  %v3794_v1 = vstv %s3633_s19  ;;  %v529_v34 = vadd.f32 %v3469_v36, %v3318_v16  ;;  %s4170_s19 = sld [smem:[#allocation9 + $0x4e]] }
 0x196   : > { %v3676_v3 = vpop.permute.xlu1 %606  ;;  %v3678_v6 = vpop.permute.xlu0 %627  ;;  %5259 = vst [vmem:[#allocation34_spill] sm:$0xff] %v3794_v1  ;;  %v3818_v30 = vmul.f32 %v3794_v1, %v3668_v52  ;;  %v3827_v16 = vstv %s3721_s11  ;;  %v3833_v17 = vmul.f32 %v3797_v8, %v3668_v52  ;;  %v3892_v13 = vstv %s3812_s13  ;;  %s2649_s10 = sld [smem:[#allocation9 + $0x40]] }
 0x197   : > { %v3690_v21 = vpop.permute.xlu2 %704  ;;  %5267 = vst [vmem:[#allocation42_spill] sm:$0xff] %v3827_v16  ;;  %v550_v36 = vadd.f32 %v3446_v20, %v529_v34  ;;  %v3869_v34 = vmul.f32 %v3824_v18, %v3668_v52  ;;  %s2652_s11 = sld [smem:[#allocation9 + $0x55]] }
 0x198   : > { %5251 = vst [vmem:[#allocation26_spill] sm:$0xff] %v3690_v21  ;;  %v3836_v21 = vstv %s3737_s12  ;;  %s5337_s12 = smov 127   ;;  %s4245_s13 = sld [smem:[#allocation9 + $0x33]] }
 0x199   : > { %5264 = vst [vmem:[#allocation39_spill] sm:$0xff] %v3818_v30 }
 0x19a   : > { %5268 = vst [vmem:[#allocation43_spill] sm:$0xff] %v3836_v21 }
 0x19b   : > { %5273 = vst [vmem:[#allocation48_spill] sm:$0xff] %v3869_v34 }
 0x19c   : > { %1070 = vrot.lane.b32.xlu0 %v1067_v26, %s2920_s22  ;;  %1082 = vrot.lane.b32.xlu1 %v3544_v37, %s2921_s9  ;;  %v3781_v37 = vmul.f32 %v3765_v40, %v3668_v52  ;;  %5276 = vst [vmem:[#allocation51_spill] sm:$0xff] %v3892_v13 }
 0x19d   : > { %1068 = vrot.lane.b32.xlu2 %v1065_v58, %s2920_s22  ;;  %v3814_v58 = vld [vmem:[#allocation2 + $0x28] sm:$0x3f] }
 0x19e   : > { %v3787_v53 = vpop.permute.xlu1 %629  ;;  %v3789_v32 = vpop.permute.xlu0 %650  ;;  %v1369_v28 = vmul.f32 %v3699_v59, %v3814_v58  ;;  %v1386_v61 = vmul.f32 %v3702_v38, %v3814_v58  ;;  %v3873_v59 = vmul.f32 %v3836_v21, %v3668_v52  ;;  %v571_v38 = vadd.f32 %v3601_v23, %v550_v36 }
 0x19f   : > { %5258 = vst [vmem:[#allocation33_spill] sm:$0xff] %v3789_v32  ;;  %v3801_v26 = vpop.permute.xlu2 %727  ;;  %v2045_v23 = vmul.f32 %v3696_v62, %v3814_v58  ;;  %v5279_v32 = vrot.slane %v3725_v14, 2  ;;  %v1403_v47 = vmul.f32 %v3735_v7, %v3814_v58  ;;  %v1420_v10 = vmul.f32 %v3765_v40, %v3814_v58 }
 0x1a0   : > { %5260 = vst [vmem:[#allocation35_spill] sm:$0xff] %v3801_v26  ;;  %v3850_v26 = vmul.f32 %v3810_v41, %v3668_v52  ;;  %v1376_v29 = vrot.slane %v1369_v28, 1  ;;  %v5277_v28 = vrot.slane %v3716_v0, 1  ;;  %v592_v0 = vadd.f32 %v3603_v24, %v571_v38 }
 0x1a1   : > { %5274 = vst [vmem:[#allocation49_spill] sm:$0xff] %v3873_v59  ;;  %v1454_v24 = vmul.f32 %v3794_v1, %v3814_v58  ;;  %v612_v38 = vadd.f32 %v3676_v3, %v591_v25  ;;  %v5285_v3 = vrot.slane %v3708_v39, 6 }
 0x1a2   : > { %5271 = vst [vmem:[#allocation46_spill] sm:$0xff] %v3850_v26 }
 0x1a3   : > { %v1461_v14 = vrot.slane %v1454_v24, 6  ;;  %v5293_v24 = vrot.slane %v3818_v30, 6 }
 0x1a4   : > { %1103 = vrot.lane.b32.xlu0 %v3660_v60, %s2921_s9  ;;  %1105 = vrot.lane.b32.xlu1 %v3663_v11, %s2921_s9  ;;  %v1393_v60 = vrot.slane %v1386_v61, 2  ;;  %v3897_v61 = vsel %vm417_vm5, %v5277_v28, %v1376_v29  ;;  %v3914_v29 = vmul.f32 %v3892_v13, %v3668_v52  ;;  %v2052_v28 = vrot.slane %v2045_v23, 1 }
 0x1a5   : > { %1084 = vrot.lane.b32.xlu2 %v3652_v19, %s2921_s9  ;;  %5278 = vst [vmem:[#allocation52_spill] sm:$0xff] %v3897_v61  ;;  %v5283_v19 = vrot.slane %v3712_v9, 1  ;;  %v1410_v61 = vrot.slane %v1403_v47, 3  ;;  %v5287_v47 = vrot.slane %v3753_v35, 3 }
 0x1a6   : > { %v3879_v11 = vpop.permute.xlu1 %685  ;;  %v3881_v20 = vpop.permute.xlu0 %683  ;;  %v3902_v43 = vsel %vm435_vm6, %v5279_v32, %v1393_v60  ;;  %5282 = vst [vmem:[#allocation55_spill] sm:$0xff] %v3914_v29  ;;  %v2010_v32 = vmul.f32 %v3693_v27, %v3814_v58  ;;  %v1437_v60 = vmul.f32 %v3774_v50, %v3814_v58  ;;  %v1427_v50 = vrot.slane %v1420_v10, 4 }
 0x1a7   : > { %v3888_v36 = vpop.permute.xlu2 %767  ;;  %5280 = vst [vmem:[#allocation53_spill] sm:$0xff] %v3902_v43  ;;  %v3930_v23 = vsel %vm417_vm5, %v5283_v19, %v2052_v28  ;;  %v2108_v43 = vmul.f32 %v3797_v8, %v3814_v58  ;;  %v2066_v28 = vmul.f32 %v3732_v44, %v3814_v58  ;;  %v5289_v10 = vrot.slane %v3781_v37, 4 }
 0x1a8   : > { %5275 = vst [vmem:[#allocation50_spill] sm:$0xff] %v3888_v36  ;;  %v3908_v36 = vmul.f32 %v3827_v16, %v3668_v52  ;;  %v2017_v62 = vrot.slane %v2010_v32, 6  ;;  %v1444_v1 = vrot.slane %v1437_v60, 5 }
 0x1a9   : > { %5284 = vst [vmem:[#allocation56_spill] sm:$0xff] %v3930_v23  ;;  %v2115_v19 = vrot.slane %v2108_v43, 4  ;;  %v5291_v43 = vrot.slane %v3785_v5, 5  ;;  %v2129_v23 = vmul.f32 %v3807_v42, %v3814_v58 }
 0x1aa   : > { %5281 = vst [vmem:[#allocation54_spill] sm:$0xff] %v3908_v36  ;;  %v3943_v25 = vsel %vm506_vm9, %v5285_v3, %v2017_v62  ;;  %v3961_v62 = vsel %vm211_vm0, %v5289_v10, %v1427_v50  ;;  %v3971_v3 = vsel %vm506_vm9, %v5293_v24, %v1461_v14  ;;  %v5295_v50 = vrot.slane %v3833_v17, 4 }
 0x1ab   : > { %5286 = vst [vmem:[#allocation57_spill] sm:$0xff] %v3943_v25  ;;  %v3966_v60 = vsel %vm488_vm8, %v5291_v43, %v1444_v1  ;;  %v613_v25 = vadd.f32 %v3538_v15, %v592_v0  ;;  %v2073_v1 = vrot.slane %v2066_v28, 2  ;;  %v2150_v14 = vmul.f32 %v3804_v63, %v3814_v58 }
 0x1ac   : > { %1126 = vrot.lane.b32.xlu0 %v3740_v48, %s2921_s9  ;;  %1145 = vrot.lane.b32.xlu1 %v3745_v56, %s2921_s9  ;;  %v2087_v48 = vmul.f32 %v3719_v49, %v3814_v58  ;;  %5290 = vst [vmem:[#allocation59_spill] sm:$0xff] %v3961_v62  ;;  %v3982_v10 = vsel %vm211_vm0, %v5295_v50, %v2115_v19  ;;  %v5297_v0 = vrot.slane %v3749_v4, 2  ;;  %v2136_v50 = vrot.slane %v2129_v23, 5  ;;  %v5318_v62 = vld [vmem:[#allocation23_spill] sm:$0xff] }
 0x1ad   : > { %1124 = vrot.lane.b32.xlu2 %v3672_v51, %s2921_s9  ;;  %v3956_v51 = vsel %vm453_vm7, %v5287_v47, %v1410_v61  ;;  %5292 = vst [vmem:[#allocation60_spill] sm:$0xff] %v3966_v60  ;;  %v633_v61 = vadd.f32 %v3678_v6, %v612_v38  ;;  %v2227_v15 = vmul.f32 %v3824_v18, %v3814_v58  ;;  %v5301_v23 = vrot.slane %v3846_v46, 5 }
 0x1ae   : > { %v3949_v56 = vpop.permute.xlu1 %725  ;;  %v3951_v32 = vpop.permute.xlu0 %706  ;;  %5288 = vst [vmem:[#allocation58_spill] sm:$0xff] %v3956_v51  ;;  %v2094_v43 = vrot.slane %v2087_v48, 3  ;;  %v634_v6 = vadd.f32 %v3787_v53, %v613_v25  ;;  %v3994_v38 = vsel %vm435_vm6, %v5297_v0, %v2073_v1  ;;  %v2185_v19 = vmul.f32 %v3821_v2, %v3814_v58 }
 0x1af   : > { %5294 = vst [vmem:[#allocation61_spill] sm:$0xff] %v3971_v3  ;;  %v3975_v47 = vpop.permute.xlu2 %790  ;;  %v2206_v28 = vmul.f32 %v3810_v41, %v3814_v58  ;;  %v5299_v48 = vrot.slane %v3729_v57, 3  ;;  %v2157_v53 = vrot.slane %v2150_v14, 6  ;;  %v2234_v25 = vrot.slane %v2227_v15, 3 }
 0x1b0   : > { %5296 = vst [vmem:[#allocation62_spill] sm:$0xff] %v3982_v10  ;;  %v2192_v10 = vrot.slane %v2185_v19, 1  ;;  %v2290_v1 = vmul.f32 %v3892_v13, %v3814_v58  ;;  %v2248_v0 = vmul.f32 %v3836_v21, %v3814_v58  ;;  %v4019_v14 = vsel %vm488_vm8, %v5301_v23, %v2136_v50 }
 0x1b1   : > { %5298 = vst [vmem:[#allocation63_spill] sm:$0xff] %v3994_v38  ;;  %v4005_v24 = vsel %vm453_vm7, %v5299_v48, %v2094_v43  ;;  %v2213_v3 = vrot.slane %v2206_v28, 2  ;;  %v5303_v15 = vrot.slane %v3842_v12, 6  ;;  %v5305_v28 = vrot.slane %v3869_v34, 3 }
 0x1b2   : > { %5300 = vst [vmem:[#allocation64_spill] sm:$0xff] %v4005_v24  ;;  %v5309_v50 = vrot.slane %v3850_v26, 2  ;;  %v5316_v24 = vld [vmem:[#allocation24_spill] sm:$0xff]  ;;  %v1203_v51 = vrot.slane %v5318_v62, 6 }
 0x1b3   : > { %5302 = vst [vmem:[#allocation65_spill] sm:$0xff] %v4019_v14  ;;  %v4024_v19 = vsel %vm506_vm9, %v5303_v15, %v2157_v53  ;;  %v2297_v53 = vrot.slane %v2290_v1, 6  ;;  %v2255_v15 = vrot.slane %v2248_v0, 4  ;;  %v5311_v0 = vrot.slane %v3914_v29, 6  ;;  %v5317_v1 = vld [vmem:[#allocation33_spill] sm:$0xff] }
 0x1b4   : > { %1166 = vrot.lane.b32.xlu0 %v3756_v33, %s2921_s9  ;;  %1168 = vrot.lane.b32.xlu1 %v3759_v55, %s2921_s9  ;;  %5304 = vst [vmem:[#allocation66_spill] sm:$0xff] %v4024_v19  ;;  %v4029_v33 = vsel %vm453_vm7, %v5305_v28, %v2234_v25  ;;  %v5307_v55 = vrot.slane %v3855_v45, 1  ;;  %v4041_v23 = vsel %vm435_vm6, %v5309_v50, %v2213_v3  ;;  %v4047_v25 = vld [vmem:[#allocation2] sm:$0xff]  ;;  %v5313_v50 = vrot.slane %v3873_v59, 4 }
 0x1b5   : > { %5306 = vst [vmem:[#allocation67_spill] sm:$0xff] %v4029_v33  ;;  %1147 = vrot.lane.b32.xlu2 %v3762_v54, %s2921_s9  ;;  %v1176_v54 = vmul.f32 %v4047_v25, %v3613_v22  ;;  %v5171_v19 = vrot.slane %v3908_v36, 5  ;;  %v654_v3 = vadd.f32 %v5316_v24, %v633_v61  ;;  %v655_v60 = vadd.f32 %v5317_v1, %v634_v6  ;;  %v4090_v24 = vld [vmem:[#allocation2 + $0x8] sm:$0xff] }
 0x1b6   : > { %v4036_v48 = vsel %vm417_vm5, %v5307_v55, %v2192_v10  ;;  %5310 = vst [vmem:[#allocation69_spill] sm:$0xff] %v4041_v23  ;;  %v4043_v43 = vpop.permute.xlu1 %748  ;;  %v4045_v14 = vpop.permute.xlu0 %746  ;;  %v2269_v10 = vmul.f32 %v3827_v16, %v3814_v58  ;;  %v4060_v55 = vsel %vm506_vm9, %v5311_v0, %v2297_v53  ;;  %v5315_v23 = vld [vmem:[#allocation25_spill] sm:$0xff]  ;;  %v5319_v53 = vstv %s3977_s6 }
 0x1b7   : > { %5308 = vst [vmem:[#allocation68_spill] sm:$0xff] %v4036_v48  ;;  %v4053_v28 = vpop.permute.xlu2 %823  ;;  %v4065_v48 = vsel %vm211_vm0, %v5313_v50, %v2255_v15  ;;  %v1218_v0 = vmul.f32 %v4047_v25, %v5319_v53  ;;  %v1182_v15 = vrot.slane %v1176_v54, 5  ;;  %v4080_v50 = vstv %s4000_s23  ;;  %v5324_v53 = vld [vmem:[#allocation20_spill] sm:$0xff]  ;;  %s2656_s23 = sld [smem:[#allocation9 + $0x41]] }
 0x1b8   : > { %5312 = vst [vmem:[#allocation70_spill] sm:$0xff] %v4060_v55  ;;  %v2276_v38 = vrot.slane %v2269_v10, 5  ;;  %v5321_v61 = vrot.slane %v3682_v31, 6  ;;  %v4094_v62 = vmul.f32 %v4090_v24, %v4080_v50  ;;  %v5322_v54 = vrot.slane %v5315_v23, 5  ;;  %v5323_v10 = vld [vmem:[#allocation21_spill] sm:$0xff] }
 0x1b9   : > { %5314 = vst [vmem:[#allocation71_spill] sm:$0xff] %v4065_v48  ;;  %v668_v1 = vadd.f32 %v5323_v10, %v654_v3  ;;  %v4249_v45 = vstv %s2653_s24  ;;  %s2662_s24 = sld [smem:[#allocation9 + $0x3b]] }
 0x1ba   : > { %v4085_v33 = vsel %vm488_vm8, %v5171_v19, %v2276_v38  ;;  %v1205_v6 = vsel %vm506_vm9, %v1203_v51, %v5321_v61  ;;  %v1184_v38 = vsel %vm488_vm8, %v1182_v15, %v5322_v54  ;;  %v669_v51 = vadd.f32 %v5324_v53, %v655_v60  ;;  %v5325_v61 = vld [vmem:[#allocation14_spill] sm:$0xff] }
 0x1bb   : > { %5320 = vst [vmem:[#allocation25_spill] sm:$0xff] %v4085_v33  ;;  %v1253_v19 = vmul.f32 %v4047_v25, %v5325_v61  ;;  %v5326_v33 = vld [vmem:[#allocation15_spill] sm:$0xff]  ;;  %v689_v3 = vadd.f32 %v3881_v20, %v668_v1  ;;  %v4117_v61 = vstv %s4068_s26  ;;  %v5327_v20 = vld [vmem:[#allocation26_spill] sm:$0xff]  ;;  %s2657_s26 = sld [smem:[#allocation9 + $0x48]] }
 0x1bc   : > { %1208 = vrot.lane.b32.xlu0 %v1205_v6, %s2921_s9  ;;  %1222 = vrot.lane.b32.xlu1 %v1218_v0, %s2922_s27  ;;  %v1274_v6 = vmul.f32 %v4047_v25, %v4080_v50  ;;  %v1232_v55 = vmul.f32 %v4047_v25, %v5326_v33  ;;  %v690_v15 = vadd.f32 %v3879_v11, %v669_v51  ;;  %v4124_v33 = vstv %s4074_s21  ;;  %v5328_v51 = vld [vmem:[#allocation16_spill] sm:$0xff]  ;;  %s2655_s21 = sld [smem:[#allocation9 + $0x3a]] }
 0x1bd   : > { %1187 = vrot.lane.b32.xlu2 %v1184_v38, %s2921_s9  ;;  %v1259_v10 = vrot.slane %v1253_v19, 2  ;;  %v4121_v13 = vmul.f32 %v4090_v24, %v4117_v61  ;;  %v4126_v11 = vstv %s2637_s18  ;;  %v710_v1 = vadd.f32 %v5327_v20, %v689_v3  ;;  %s2659_s18 = sld [smem:[#allocation9 + $0x56]] }
 0x1be   : > { %v789_v48 = vpop.permute.xlu1 %788  ;;  %v770_v0 = vpop.permute.xlu0 %769  ;;  %v711_v38 = vadd.f32 %v3951_v32, %v690_v15  ;;  %v1280_v53 = vrot.slane %v1274_v6, 3  ;;  %v1238_v29 = vrot.slane %v1232_v55, 1  ;;  %v5329_v60 = vrot.slane %v5328_v51, 2  ;;  %v5331_v15 = vld [vmem:[#allocation17_spill] sm:$0xff] }
 0x1bf   : > { %v4112_v54 = vpop.permute.xlu2 %846  ;;  %v5330_v19 = vrot.slane %v4094_v62, 3  ;;  %v4139_v6 = vmul.f32 %v4090_v24, %v4124_v33  ;;  %v5332_v59 = vrot.slane %v5331_v15, 1  ;;  %v4148_v20 = vmul.f32 %v4090_v24, %v4126_v11 }
 0x1c0   : > { %v1261_v32 = vsel %vm435_vm6, %v1259_v10, %v5329_v60  ;;  %v731_v60 = vadd.f32 %v3949_v56, %v710_v1  ;;  %v5333_v10 = vld [vmem:[#allocation35_spill] sm:$0xff]  ;;  %v1316_v51 = vmul.f32 %v4047_v25, %v4117_v61  ;;  %v4283_v41 = vstv %s2656_s23  ;;  %s2663_s23 = sld [smem:[#allocation9 + $0x42]] }
 0x1c1   : > { %v1282_v55 = vsel %vm453_vm7, %v1280_v53, %v5330_v19  ;;  %v1240_v3 = vsel %vm417_vm5, %v1238_v29, %v5332_v59  ;;  %v732_v53 = vadd.f32 %v5333_v10, %v711_v38  ;;  %v1295_v59 = vmul.f32 %v4047_v25, %v4126_v11  ;;  %5340 = vst [vmem:[#allocation33_spill] sm:$0xff] %v4283_v41 }
 0x1c2   : > { %v752_v56 = vadd.f32 %v4045_v14, %v731_v60  ;;  %v5177_v38 = vrot.slane %v4121_v13, 5  ;;  %v1322_v36 = vrot.slane %v1316_v51, 5  ;;  %v5334_v60 = vld [vmem:[#allocation50_spill] sm:$0xff]  ;;  %v4285_v46 = vstv %s2657_s26  ;;  %s5354_s26 = smov 125  }
 0x1c3   : > { %v753_v29 = vadd.f32 %v4043_v43, %v732_v53  ;;  %v4172_v43 = vld [vmem:[#allocation2 + $0x18] sm:$0xff]  ;;  %v1301_v14 = vrot.slane %v1295_v59, 4  ;;  %5341 = vst [vmem:[#allocation23_spill] sm:$0xff] %v4285_v46  ;;  %v4319_v63 = vstv %s2659_s18  ;;  %s2666_s18 = sld [smem:[#allocation9 + $0x57]] }
 0x1c4   : > { %1264 = vrot.lane.b32.xlu0 %v1261_v32, %s2922_s27  ;;  %1285 = vrot.lane.b32.xlu1 %v1282_v55, %s2922_s27  ;;  %v1337_v32 = vmul.f32 %v4047_v25, %v4124_v33  ;;  %v4175_v25 = vstv %s4128_s28  ;;  %v773_v53 = vadd.f32 %v5334_v60, %v752_v56  ;;  %v1324_v15 = vsel %vm488_vm8, %v1322_v36, %v5177_v38  ;;  %s2658_s28 = sld [smem:[#allocation9 + $0x4f]] }
 0x1c5   : > { %1243 = vrot.lane.b32.xlu2 %v1240_v3, %s2922_s27  ;;  %v774_v10 = vadd.f32 %v770_v0, %v753_v29  ;;  %v5335_v3 = vrot.slane %v4139_v6, 6  ;;  %v4186_v51 = vmul.f32 %v4175_v25, %v3668_v52  ;;  %v4193_v29 = vld [vmem:[#allocation2 + $0x10] sm:$0x3f]  ;;  %v5182_v38 = vstv %s4165_s5  ;;  %5344 = vst [vmem:[#allocation20_spill] sm:$0xff] %v4319_v63 }
 0x1c6   : > { %v805_v19 = vpop.permute.xlu1 %804  ;;  %v803_v55 = vpop.permute.xlu0 %802  ;;  %v1343_v21 = vrot.slane %v1337_v32, 6  ;;  %v5336_v32 = vrot.slane %v4148_v20, 4  ;;  %v1178_v36 = vmul.f32 %v4193_v29, %v3613_v22 }
 0x1c7   : > { %v4161_v1 = vpop.permute.xlu2 %886  ;;  %v795_v56 = vadd.f32 %v3975_v47, %v774_v10  ;;  %v5181_v16 = vrot.slane %v4186_v51, 1  ;;  %v4207_v47 = vstv %s4168_s7  ;;  %v4210_v10 = vstv %s4170_s19  ;;  %s5343_s7 = smov 126   ;;  %s2660_s19 = sld [smem:[#allocation9 + $0x5d]] }
 0x1c8   : > { %v1345_v0 = vsel %vm506_vm9, %v1343_v21, %v5335_v3  ;;  %v1303_v59 = vsel %vm211_vm0, %v1301_v14, %v5336_v32  ;;  %v794_v21 = vadd.f32 %v789_v48, %v773_v53  ;;  %v1185_v34 = vrot.slane %v1178_v36, 5 }
 0x1c9   : > { %v1469_v48 = vmul.f32 %v5182_v38, %v4172_v43  ;;  %v4212_v53 = vstv %s2649_s10  ;;  %v4224_v36 = vmul.f32 %v4210_v10, %v3668_v52  ;;  %s4350_s10 = sld [smem:[#allocation9 + $0x34]] }
 0x1ca   : > { %v808_v14 = vadd.f32 %v803_v55, %v794_v21  ;;  %v5338_v21 = vrot.slane %v5315_v23, 5 }
 0x1cc   : > { %1327 = vrot.lane.b32.xlu0 %v1324_v15, %s2922_s27  ;;  %1348 = vrot.lane.b32.xlu1 %v1345_v0, %s2922_s27  ;;  %v1483_v15 = vmul.f32 %v4175_v25, %v4172_v43  ;;  %v809_v0 = vadd.f32 %v805_v19, %v795_v56  ;;  %v829_v19 = vadd.f32 %v4053_v28, %v808_v14 }
 0x1cd   : > { %1306 = vrot.lane.b32.xlu2 %v1303_v59, %s2922_s27  ;;  %v4220_v59 = vmul.f32 %v4207_v47, %v3668_v52  ;;  %v1186_v28 = vsel %vm488_vm8, %v5338_v21, %v1185_v34  ;;  %v1504_v34 = vmul.f32 %v4212_v53, %v4172_v43 }
 0x1ce   : > { %v845_v3 = vpop.permute.xlu1 %844  ;;  %v826_v60 = vpop.permute.xlu0 %825  ;;  %v1489_v18 = vrot.slane %v1483_v15, 1 }
 0x1cf   : > { %v910_v32 = vpop.permute.xlu2 %909  ;;  %v830_v22 = vadd.f32 %v826_v60, %v809_v0  ;;  %v850_v56 = vadd.f32 %v845_v3, %v829_v19  ;;  %v1525_v60 = vmul.f32 %v4207_v47, %v4172_v43  ;;  %v1546_v0 = vmul.f32 %v4210_v10, %v4172_v43 }
 0x1d0   : > { %v1491_v55 = vsel %vm417_vm5, %v1489_v18, %v5181_v16  ;;  %v4233_v18 = vmul.f32 %v4212_v53, %v3668_v52  ;;  %v5185_v3 = vrot.slane %v4220_v59, 3  ;;  %v1510_v38 = vrot.slane %v1504_v34, 2 }
 0x1d1   : > { %v851_v15 = vadd.f32 %v4112_v54, %v830_v22  ;;  %v5184_v54 = vrot.slane %v4224_v36, 4  ;;  %v1552_v16 = vrot.slane %v1546_v0, 4  ;;  %v1588_v0 = vmul.f32 %v4249_v45, %v4172_v43 }
 0x1d2   : > { %v5186_v22 = vrot.slane %v4233_v18, 2 }
 0x1d3   : > { %v1594_v26 = vrot.slane %v1588_v0, 6  ;;  %v4298_v0 = vstv %s2655_s21  ;;  %s2667_s21 = sld [smem:[#allocation9 + $0x5e]] }
 0x1d4   : > { %1473 = vrot.lane.b32.xlu0 %v1469_v48, %s5337_s12  ;;  %1494 = vrot.lane.b32.xlu1 %v1491_v55, %s5337_s12 }
 0x1d5   : > { %1189 = vrot.lane.b32.xlu2 %v1186_v28, %s2921_s9  ;;  %v1531_v28 = vrot.slane %v1525_v60, 3  ;;  %v1512_v60 = vsel %vm435_vm6, %v1510_v38, %v5186_v22 }
 0x1d6   : > { %v868_v14 = vpop.permute.xlu1 %867  ;;  %v866_v48 = vpop.permute.xlu0 %865 }
 0x1d7   : > { %v872_v23 = vadd.f32 %v868_v14, %v851_v15  ;;  %v943_v55 = vpop.permute.xlu2 %942  ;;  %v871_v21 = vadd.f32 %v866_v48, %v850_v56  ;;  %v1533_v56 = vsel %vm453_vm7, %v1531_v28, %v5185_v3  ;;  %v1554_v15 = vsel %vm211_vm0, %v1552_v16, %v5184_v54 }
 0x1d8   : > { %v4259_v14 = vmul.f32 %v4249_v45, %v3668_v52  ;;  %v5191_v54 = vstv %s4245_s13 }
 0x1d9   : > { %v892_v19 = vadd.f32 %v4161_v1, %v871_v21  ;;  %v4261_v1 = vstv %s2652_s11  ;;  %s2664_s11 = sld [smem:[#allocation9 + $0x49]] }
 0x1da   : > { %5339 = vst [vmem:[#allocation24_spill] sm:$0xff] %v4259_v14  ;;  %v4270_v16 = vmul.f32 %v4261_v1, %v3668_v52  ;;  %v1567_v21 = vmul.f32 %v4261_v1, %v4172_v43  ;;  %v5192_v38 = vrot.slane %v4259_v14, 6 }
 0x1dc   : > { %1536 = vrot.lane.b32.xlu0 %v1533_v56, %s5337_s12  ;;  %1557 = vrot.lane.b32.xlu1 %v1554_v15, %s5337_s12  ;;  %v5193_v3 = vrot.slane %v4270_v16, 5  ;;  %v1573_v2 = vrot.slane %v1567_v21, 5  ;;  %v1665_v21 = vmul.f32 %v4285_v46, %v4172_v43 }
 0x1dd   : > { %1515 = vrot.lane.b32.xlu2 %v1512_v60, %s5337_s12  ;;  %v1609_v60 = vmul.f32 %v5191_v54, %v4172_v43 }
 0x1de   : > { %v908_v48 = vpop.permute.xlu1 %907  ;;  %v889_v34 = vpop.permute.xlu0 %888 }
 0x1df   : > { %v913_v28 = vadd.f32 %v908_v48, %v892_v19  ;;  %v966_v56 = vpop.permute.xlu2 %965  ;;  %v893_v15 = vadd.f32 %v889_v34, %v872_v23  ;;  %v1596_v23 = vsel %vm506_vm9, %v1594_v26, %v5192_v38  ;;  %v4292_v19 = vmul.f32 %v4283_v41, %v3668_v52 }
 0x1e0   : > { %v1575_v48 = vsel %vm488_vm8, %v1573_v2, %v5193_v3  ;;  %v4307_v26 = vmul.f32 %v4298_v0, %v3668_v52  ;;  %v1644_v34 = vmul.f32 %v4283_v41, %v4172_v43  ;;  %v1671_v41 = vrot.slane %v1665_v21, 3 }
 0x1e1   : > { %v914_v22 = vadd.f32 %v910_v32, %v893_v15  ;;  %v4296_v32 = vmul.f32 %v4285_v46, %v3668_v52  ;;  %v5202_v3 = vrot.slane %v4292_v19, 2  ;;  %v4321_v46 = vstv %s2658_s28  ;;  %s2669_s28 = sld [smem:[#allocation9 + $0x3c]] }
 0x1e2   : > { %v1650_v42 = vrot.slane %v1644_v34, 2  ;;  %v4342_v21 = vmul.f32 %v4321_v46, %v3668_v52 }
 0x1e3   : > { %5342 = vst [vmem:[#allocation21_spill] sm:$0xff] %v4296_v32  ;;  %v5201_v12 = vrot.slane %v4296_v32, 3 }
 0x1e4   : > { %1599 = vrot.lane.b32.xlu0 %v1596_v23, %s5337_s12  ;;  %1613 = vrot.lane.b32.xlu1 %v1609_v60, %s5343_s7  ;;  %v1623_v60 = vmul.f32 %v4298_v0, %v4172_v43  ;;  %5347 = vst [vmem:[#allocation15_spill] sm:$0xff] %v4342_v21 }
 0x1e5   : > { %1578 = vrot.lane.b32.xlu2 %v1575_v48, %s5337_s12  ;;  %v5203_v48 = vrot.slane %v4307_v26, 1 }
 0x1e6   : > { %v931_v15 = vpop.permute.xlu1 %930  ;;  %v929_v23 = vpop.permute.xlu0 %928  ;;  %v1629_v30 = vrot.slane %v1623_v60, 1 }
 0x1e7   : > { %v935_v54 = vadd.f32 %v931_v15, %v914_v22  ;;  %v1006_v38 = vpop.permute.xlu2 %1005  ;;  %v934_v2 = vadd.f32 %v929_v23, %v913_v28  ;;  %v1652_v22 = vsel %vm435_vm6, %v1650_v42, %v5202_v3  ;;  %v1673_v28 = vsel %vm453_vm7, %v1671_v41, %v5201_v12 }
 0x1e8   : > { %v4331_v15 = vmul.f32 %v4319_v63, %v3668_v52  ;;  %v1631_v42 = vsel %vm417_vm5, %v1629_v30, %v5203_v48  ;;  %v1707_v41 = vmul.f32 %v4319_v63, %v4172_v43  ;;  %v5207_v3 = vrot.slane %v4342_v21, 4 }
 0x1e9   : > { %v948_v14 = vadd.f32 %v943_v55, %v934_v2  ;;  %v5346_v55 = vld [vmem:[#allocation22_spill] sm:$0xff]  ;;  %v1686_v2 = vmul.f32 %v4321_v46, %v4172_v43 }
 0x1ea   : > { %5345 = vst [vmem:[#allocation14_spill] sm:$0xff] %v4331_v15  ;;  %v1199_v34 = vmul.f32 %v4193_v29, %v5346_v55  ;;  %v5206_v12 = vrot.slane %v4331_v15, 5 }
 0x1eb   : > { %v1692_v32 = vrot.slane %v1686_v2, 4 }
 0x1ec   : > { %1655 = vrot.lane.b32.xlu0 %v1652_v22, %s5343_s7  ;;  %1676 = vrot.lane.b32.xlu1 %v1673_v28, %s5343_s7  ;;  %v1206_v30 = vrot.slane %v1199_v34, 6 }
 0x1ed   : > { %1634 = vrot.lane.b32.xlu2 %v1631_v42, %s5343_s7  ;;  %v1713_v42 = vrot.slane %v1707_v41, 5 }
 0x1ee   : > { %v964_v23 = vpop.permute.xlu1 %963  ;;  %v945_v60 = vpop.permute.xlu0 %944 }
 0x1ef   : > { %v969_v22 = vadd.f32 %v964_v23, %v948_v14  ;;  %v1029_v28 = vpop.permute.xlu2 %1028  ;;  %v949_v55 = vadd.f32 %v945_v60, %v935_v54  ;;  %v1715_v63 = vsel %vm488_vm8, %v1713_v42, %v5206_v12  ;;  %v5348_v14 = vrot.slane %v3682_v31, 6 }
 0x1f0   : > { %v4359_v23 = vstv %s2660_s19  ;;  %s2670_s19 = sld [smem:[#allocation9 + $0x43]] }
 0x1f1   : > { %v970_v48 = vadd.f32 %v966_v56, %v949_v55  ;;  %v1207_v54 = vsel %vm506_vm9, %v5348_v14, %v1206_v30  ;;  %5349 = vst [vmem:[#allocation26_spill] sm:$0xff] %v4359_v23  ;;  %v1694_v56 = vsel %vm211_vm0, %v1692_v32, %v5207_v3  ;;  %v4368_v34 = vmul.f32 %v4359_v23, %v3668_v52 }
 0x1f2   : > { %v1728_v60 = vmul.f32 %v4359_v23, %v4172_v43  ;;  %v5209_v30 = vstv %s4350_s10 }
 0x1f3   : > { %5350 = vst [vmem:[#allocation16_spill] sm:$0xff] %v4368_v34  ;;  %v5211_v42 = vrot.slane %v4368_v34, 6  ;;  %v1749_v12 = vmul.f32 %v5209_v30, %v4172_v43  ;;  %v4396_v30 = vstv %s2664_s11  ;;  %s2672_s11 = sld [smem:[#allocation9 + $0x51]] }
 0x1f4   : > { %1718 = vrot.lane.b32.xlu0 %v1715_v63, %s5343_s7  ;;  %1210 = vrot.lane.b32.xlu1 %v1207_v54, %s2921_s9  ;;  %v5351_v54 = vstv %s3977_s6  ;;  %v1734_v3 = vrot.slane %v1728_v60, 6  ;;  %5355 = vst [vmem:[#allocation50_spill] sm:$0xff] %v4396_v30  ;;  %s2665_s6 = sld [smem:[#allocation9 + $0x50]] }
 0x1f5   : > { %1697 = vrot.lane.b32.xlu2 %v1694_v56, %s5343_s7  ;;  %v1219_v32 = vmul.f32 %v4090_v24, %v5351_v54  ;;  %v4381_v56 = vstv %s2662_s24  ;;  %s4479_s24 = sld [smem:[#allocation9 + $0x35]] }
 0x1f6   : > { %v987_v31 = vpop.permute.xlu1 %986  ;;  %v985_v41 = vpop.permute.xlu0 %984  ;;  %5352 = vst [vmem:[#allocation17_spill] sm:$0xff] %v4381_v56  ;;  %v4385_v23 = vmul.f32 %v4381_v56, %v3668_v52  ;;  %v1736_v24 = vsel %vm506_vm9, %v1734_v3, %v5211_v42  ;;  %v1276_v3 = vmul.f32 %v4193_v29, %v4080_v50  ;;  %v1805_v50 = vmul.f32 %v4396_v30, %v4172_v43 }
 0x1f7   : > { %v991_v2 = vadd.f32 %v987_v31, %v970_v48  ;;  %v1069_v55 = vpop.permute.xlu2 %1068  ;;  %v990_v63 = vadd.f32 %v985_v41, %v969_v22 }
 0x1f8   : > { %5353 = vst [vmem:[#allocation35_spill] sm:$0xff] %v4385_v23  ;;  %v1283_v42 = vrot.slane %v1276_v3, 3 }
 0x1f9   : > { %v1011_v14 = vadd.f32 %v1006_v38, %v990_v63  ;;  %v1763_v38 = vmul.f32 %v4381_v56, %v4172_v43  ;;  %v5210_v63 = vrot.slane %v4385_v23, 1  ;;  %v1811_v56 = vrot.slane %v1805_v50, 3 }
 0x1fa   : > { %v4424_v15 = vstv %s2665_s6  ;;  %s2671_s6 = sld [smem:[#allocation9 + $0x4a]] }
 0x1fc   : > { %1224 = vrot.lane.b32.xlu0 %v1219_v32, %s2922_s27  ;;  %1753 = vrot.lane.b32.xlu1 %v1749_v12, %s5354_s26  ;;  %v1769_v32 = vrot.slane %v1763_v38, 1  ;;  %v5357_v38 = vld [vmem:[#allocation19_spill] sm:$0xff] }
 0x1fd   : > { %1739 = vrot.lane.b32.xlu2 %v1736_v24, %s5343_s7  ;;  %v4405_v24 = vmul.f32 %v4396_v30, %v3668_v52  ;;  %v5358_v30 = vrot.slane %v4094_v62, 3 }
 0x1fe   : > { %v1027_v48 = vpop.permute.xlu1 %1026  ;;  %v1008_v22 = vpop.permute.xlu0 %1007  ;;  %v1771_v12 = vsel %vm417_vm5, %v1769_v32, %v5210_v63 }
 0x1ff   : > { %v1032_v31 = vadd.f32 %v1027_v48, %v1011_v14  ;;  %v1085_v41 = vpop.permute.xlu2 %1084  ;;  %v1012_v60 = vadd.f32 %v1008_v22, %v991_v2  ;;  %v4407_v14 = vstv %s2663_s23  ;;  %v1284_v21 = vsel %vm453_vm7, %v5358_v30, %v1283_v42  ;;  %s2673_s23 = sld [smem:[#allocation9 + $0x58]] }
 0x200   : > { %v4414_v2 = vmul.f32 %v4407_v14, %v3668_v52  ;;  %v1297_v30 = vmul.f32 %v4193_v29, %v4126_v11  ;;  %v1826_v42 = vmul.f32 %v4424_v15, %v4172_v43  ;;  %v4451_v11 = vstv %s2666_s18  ;;  %s4690_s18 = sld [smem:[#allocation9 + $0x37]] }
 0x201   : > { %v1033_v54 = vadd.f32 %v1029_v28, %v1012_v60  ;;  %v5356_v28 = vld [vmem:[#allocation18_spill] sm:$0xff]  ;;  %v1784_v60 = vmul.f32 %v4407_v14, %v4172_v43 }
 0x202   : > { %v5222_v23 = vrot.slane %v4414_v2, 2 }
 0x204   : > { %1774 = vrot.lane.b32.xlu0 %v1771_v12, %s5354_s26  ;;  %1266 = vrot.lane.b32.xlu1 %v5356_v28, %s2922_s27  ;;  %v5221_v28 = vrot.slane %v4405_v24, 3 }
 0x205   : > { %1245 = vrot.lane.b32.xlu2 %v5357_v38, %s2922_s27  ;;  %v1790_v38 = vrot.slane %v1784_v60, 2  ;;  %v1832_v60 = vrot.slane %v1826_v42, 4 }
 0x206   : > { %v1050_v48 = vpop.permute.xlu1 %1049  ;;  %v1048_v22 = vpop.permute.xlu0 %1047 }
 0x207   : > { %v1054_v32 = vadd.f32 %v1050_v48, %v1033_v54  ;;  %v1125_v12 = vpop.permute.xlu2 %1124  ;;  %v1053_v63 = vadd.f32 %v1048_v22, %v1032_v31  ;;  %v1813_v31 = vsel %vm453_vm7, %v1811_v56, %v5221_v28  ;;  %v4434_v54 = vmul.f32 %v4424_v15, %v3668_v52 }
 0x208   : > { %v1792_v62 = vsel %vm435_vm6, %v1790_v38, %v5222_v23  ;;  %v1304_v22 = vrot.slane %v1297_v30, 4  ;;  %v4449_v38 = vstv %s2667_s21  ;;  %v5361_v30 = vrot.slane %v4148_v20, 4  ;;  %s4554_s21 = sld [smem:[#allocation9 + $0x36]] }
 0x209   : > { %v1074_v34 = vadd.f32 %v1069_v55, %v1053_v63  ;;  %5359 = vst [vmem:[#allocation22_spill] sm:$0xff] %v4434_v54  ;;  %v1318_v55 = vmul.f32 %v4193_v29, %v4117_v61  ;;  %v4517_v28 = vstv %s2672_s11  ;;  %v4519_v23 = vstv %s2673_s23  ;;  %s5504_s11 = sshll.u32 %s3046_s4, 3 }
 0x20a   : > { %v1305_v42 = vsel %vm211_vm0, %v5361_v30, %v1304_v22  ;;  %5366 = vst [vmem:[#allocation73_spill] sm:$0xff] %v4517_v28  ;;  %s203_s23 = scalar_lea.vmem [#allocation10], %s5504_s11 }
 0x20b   : > { %v1325_v48 = vrot.slane %v1318_v55, 5  ;;  %v1339_v55 = vmul.f32 %v4193_v29, %v4124_v33  ;;  %v1868_v33 = vmul.f32 %v4449_v38, %v4172_v43  ;;  %5367 = vst [vmem:[#allocation74_spill] sm:$0xff] %v4519_v23 }
 0x20c   : > { %1287 = vrot.lane.b32.xlu0 %v1284_v21, %s2922_s27  ;;  %1816 = vrot.lane.b32.xlu1 %v1813_v31, %s5354_s26  ;;  %v5218_v21 = vrot.slane %v4434_v54, 4  ;;  %v4521_v54 = vstv %s2671_s6  ;;  %s2496_s6 = sshll.u32 %s203_s23, 4  ;;  %s2497_s6 = int_to_ptr.vmem [resolvable:$true] %s2496_s6 }
 0x20d   : > { %1795 = vrot.lane.b32.xlu2 %v1792_v62, %s5354_s26  ;;  %v1346_v22 = vrot.slane %v1339_v55, 6 }
 0x20e   : > { %v1083_v56 = vpop.permute.xlu1 %1082  ;;  %v1071_v63 = vpop.permute.xlu0 %1070  ;;  %v1834_v62 = vsel %vm211_vm0, %v1832_v60, %v5218_v21  ;;  %v4485_v21 = vstv %s2670_s19 }
 0x20f   : > { %v1088_v3 = vadd.f32 %v1083_v56, %v1074_v34  ;;  %v1148_v61 = vpop.permute.xlu2 %1147  ;;  %v1075_v50 = vadd.f32 %v1071_v63, %v1054_v32  ;;  %v5360_v34 = vrot.slane %v4121_v13, 5  ;;  %v4472_v13 = vmul.f32 %v4451_v11, %v3668_v52 }
 0x210   : > { %v1847_v63 = vmul.f32 %v4451_v11, %v4172_v43 }
 0x211   : > { %v1089_v31 = vadd.f32 %v1085_v41, %v1075_v50  ;;  %v1326_v32 = vsel %vm488_vm8, %v5360_v34, %v1325_v48  ;;  %v4463_v41 = vmul.f32 %v4449_v38, %v3668_v52  ;;  %v1874_v34 = vrot.slane %v1868_v33, 6 }
 0x212   : > { %v1853_v30 = vrot.slane %v1847_v63, 5 }
 0x213   : > { %v5219_v60 = vrot.slane %v4463_v41, 6 }
 0x214   : > { %1837 = vrot.lane.b32.xlu0 %v1834_v62, %s5354_s26  ;;  %1329 = vrot.lane.b32.xlu1 %v1326_v32, %s2922_s27  ;;  %v5220_v62 = vrot.slane %v4472_v13, 5 }
 0x215   : > { %1308 = vrot.lane.b32.xlu2 %v1305_v42, %s2922_s27  ;;  %v4483_v42 = vstv %s2669_s28  ;;  %v1876_v55 = vsel %vm506_vm9, %v1874_v34, %v5219_v60 }
 0x216   : > { %v1106_v29 = vpop.permute.xlu1 %1105  ;;  %v1104_v56 = vpop.permute.xlu0 %1103  ;;  %5362 = vst [vmem:[#allocation18_spill] sm:$0xff] %v4483_v42  ;;  %v4495_v33 = vmul.f32 %v4483_v42, %v3668_v52 }
 0x217   : > { %v1110_v50 = vadd.f32 %v1106_v29, %v1089_v31  ;;  %v1188_v20 = vpop.permute.xlu2 %1187  ;;  %v1109_v48 = vadd.f32 %v1104_v56, %v1088_v3  ;;  %v5363_v31 = vrot.slane %v4139_v6, 6  ;;  %v1855_v6 = vsel %vm488_vm8, %v1853_v30, %v5220_v62 }
 0x218   : > { %5364 = vst [vmem:[#allocation19_spill] sm:$0xff] %v4495_v33  ;;  %v1903_v29 = vmul.f32 %v4483_v42, %v4172_v43  ;;  %v1924_v56 = vmul.f32 %v4485_v21, %v4172_v43 }
 0x219   : > { %v1130_v32 = vadd.f32 %v1125_v12, %v1109_v48  ;;  %v1347_v3 = vsel %vm506_vm9, %v5363_v31, %v1346_v22  ;;  %v4499_v12 = vmul.f32 %v4485_v21, %v3668_v52  ;;  %v5226_v48 = vstv %s4479_s24 }
 0x21a   : > { %v1909_v60 = vrot.slane %v1903_v29, 1  ;;  %v1930_v30 = vrot.slane %v1924_v56, 2  ;;  %v4529_v29 = vld [vmem:[#allocation2 + $0x20] sm:$0xff] }
 0x21b   : > { %5365 = vst [vmem:[#allocation72_spill] sm:$0xff] %v4499_v12  ;;  %v4537_v56 = vmul.f32 %v4529_v29, %v4519_v23 }
 0x21c   : > { %1350 = vrot.lane.b32.xlu0 %v1347_v3, %s2922_s27  ;;  %1879 = vrot.lane.b32.xlu1 %v1876_v55, %s5354_s26  ;;  %v5224_v3 = vrot.slane %v4495_v33, 1  ;;  %v5225_v55 = vrot.slane %v4499_v12, 2 }
 0x21d   : > { %1858 = vrot.lane.b32.xlu2 %v1855_v6, %s5354_s26  ;;  %v1889_v6 = vmul.f32 %v5226_v48, %v4172_v43  ;;  %v1994_v33 = vrot.slane %v4537_v56, 5 }
 0x21e   : > { %v1146_v63 = vpop.permute.xlu1 %1145  ;;  %v1127_v52 = vpop.permute.xlu0 %1126 }
 0x21f   : > { %v1151_v22 = vadd.f32 %v1146_v63, %v1130_v32  ;;  %v1244_v34 = vpop.permute.xlu2 %1243  ;;  %v1131_v31 = vadd.f32 %v1127_v52, %v1110_v50  ;;  %v1911_v50 = vsel %vm417_vm5, %v1909_v60, %v5224_v3  ;;  %v1932_v32 = vsel %vm435_vm6, %v1930_v30, %v5225_v55 }
 0x220   : > { %v4543_v60 = vmul.f32 %v4529_v29, %v4521_v54  ;;  %v1966_v63 = vmul.f32 %v4517_v28, %v4172_v43  ;;  %v1987_v52 = vmul.f32 %v4519_v23, %v4172_v43  ;;  %v1945_v3 = vmul.f32 %v4521_v54, %v4172_v43 }
 0x221   : > { %v1152_v62 = vadd.f32 %v1148_v61, %v1131_v31  ;;  %v4533_v61 = vmul.f32 %v4529_v29, %v4517_v28 }
 0x222   : > { %v1972_v28 = vrot.slane %v1966_v63, 4  ;;  %v1993_v12 = vrot.slane %v1987_v52, 5  ;;  %v1951_v42 = vrot.slane %v1945_v3, 3  ;;  %v2008_v52 = vmul.f32 %v3693_v27, %v4172_v43 }
 0x223   : > { %v5232_v48 = vrot.slane %v4533_v61, 4  ;;  %v5369_v27 = vrot.slane %v3708_v39, 6 }
 0x224   : > { %1914 = vrot.lane.b32.xlu0 %v1911_v50, %s2920_s22  ;;  %1935 = vrot.lane.b32.xlu1 %v1932_v32, %s2920_s22 }
 0x225   : > { %1893 = vrot.lane.b32.xlu2 %v1889_v6, %s2920_s22  ;;  %v5233_v6 = vrot.slane %v4543_v60, 3 }
 0x226   : > { %v1169_v31 = vpop.permute.xlu1 %1168  ;;  %v1167_v30 = vpop.permute.xlu0 %1166 }
 0x227   : > { %v1173_v50 = vadd.f32 %v1169_v31, %v1152_v62  ;;  %v1307_v55 = vpop.permute.xlu2 %1306  ;;  %v1172_v32 = vadd.f32 %v1167_v30, %v1151_v22  ;;  %v1974_v62 = vsel %vm211_vm0, %v1972_v28, %v5232_v48  ;;  %v1995_v22 = vsel %vm488_vm8, %v1993_v12, %v1994_v33 }
 0x228   : > { %v1953_v63 = vsel %vm453_vm7, %v1951_v42, %v5233_v6  ;;  %v2028_v30 = vstv %s4554_s21  ;;  %v2014_v42 = vrot.slane %v2008_v52, 6 }
 0x229   : > { %v1193_v23 = vadd.f32 %v1188_v20, %v1172_v32  ;;  %v2029_v48 = vmul.f32 %v2028_v30, %v4172_v43 }
 0x22c   : > { %1977 = vrot.lane.b32.xlu0 %v1974_v62, %s2920_s22  ;;  %1998 = vrot.lane.b32.xlu1 %v1995_v22, %s2920_s22  ;;  %v5368_v62 = vstv %s4165_s5  ;;  %s4592_s5 = sld [smem:[#allocation9 + $0x31]] }
 0x22d   : > { %1956 = vrot.lane.b32.xlu2 %v1953_v63, %s2920_s22  ;;  %v1470_v22 = vmul.f32 %v4529_v29, %v5368_v62  ;;  %v1506_v63 = vmul.f32 %v4212_v53, %v3814_v58  ;;  %v5371_v62 = vrot.slane %v3712_v9, 1 }
 0x22e   : > { %v1223_v20 = vpop.permute.xlu1 %1222  ;;  %v1209_v3 = vpop.permute.xlu0 %1208 }
 0x22f   : > { %v1190_v28 = vpop.permute.xlu2 %1189  ;;  %v1214_v31 = vadd.f32 %v1209_v3, %v1193_v23  ;;  %v2016_v23 = vsel %vm506_vm9, %v2014_v42, %v5369_v27  ;;  %v4602_v27 = vld [vmem:[#allocation2 + $0x28] sm:$0x3f] }
 0x230   : > { %v4572_v32 = vadd.f32 %v1190_v28, %v1173_v50  ;;  %v1485_v50 = vmul.f32 %v4175_v25, %v3814_v58  ;;  %v5372_v25 = vrot.slane %v4233_v18, 2  ;;  %v2085_v18 = vmul.f32 %v3719_v49, %v4172_v43 }
 0x231   : > { %v1228_v12 = vadd.f32 %v1223_v20, %v1214_v31  ;;  %v5370_v20 = vld [vmem:[#allocation27_spill] sm:$0xff] }
 0x232   : > { %v2043_v3 = vmul.f32 %v5370_v20, %v4172_v43  ;;  %v1492_v39 = vrot.slane %v1485_v50, 1  ;;  %v5374_v50 = vld [vmem:[#allocation28_spill] sm:$0xff] }
 0x233   : > { %v1249_v6 = vadd.f32 %v1244_v34, %v1228_v12  ;;  %v1367_v20 = vmul.f32 %v5374_v50, %v4172_v43 }
 0x234   : > { %1475 = vrot.lane.b32.xlu0 %v1470_v22, %s5337_s12  ;;  %2033 = vrot.lane.b32.xlu1 %v2029_v48, %s2921_s9  ;;  %v1513_v48 = vrot.slane %v1506_v63, 2  ;;  %v2049_v12 = vrot.slane %v2043_v3, 1  ;;  %v5373_v63 = vrot.slane %v4186_v51, 1 }
 0x235   : > { %2019 = vrot.lane.b32.xlu2 %v2016_v23, %s2920_s22  ;;  %v1360_v23 = vstv %s4592_s5 }
 0x236   : > { %v1286_v34 = vpop.permute.xlu1 %1285  ;;  %v1265_v52 = vpop.permute.xlu0 %1264  ;;  %v2051_v58 = vsel %vm417_vm5, %v2049_v12, %v5371_v62  ;;  %v1514_v22 = vsel %vm435_vm6, %v5372_v25, %v1513_v48  ;;  %v1493_v9 = vsel %vm417_vm5, %v5373_v63, %v1492_v39  ;;  %v1361_v39 = vmul.f32 %v1360_v23, %v4172_v43 }
 0x237   : > { %v4594_v53 = vpop.permute.xlu2 %1515  ;;  %v1270_v28 = vadd.f32 %v1265_v52, %v1249_v6  ;;  %v1527_v6 = vmul.f32 %v4602_v27, %v4207_v47  ;;  %v2064_v47 = vmul.f32 %v3732_v44, %v4172_v43  ;;  %v1373_v12 = vrot.slane %v1367_v20, 1 }
 0x238   : > { %v1418_v44 = vmul.f32 %v3765_v40, %v4172_v43  ;;  %v5380_v40 = vrot.slane %v3749_v4, 2 }
 0x239   : > { %v1291_v31 = vadd.f32 %v1286_v34, %v1270_v28  ;;  %v1534_v51 = vrot.slane %v1527_v6, 3  ;;  %v5375_v28 = vld [vmem:[#allocation29_spill] sm:$0xff]  ;;  %v2070_v62 = vrot.slane %v2064_v47, 2  ;;  %v5377_v6 = vrot.slane %v3729_v57, 3 }
 0x23a   : > { %v1384_v48 = vmul.f32 %v5375_v28, %v4172_v43  ;;  %v1548_v57 = vmul.f32 %v4602_v27, %v4210_v10 }
 0x23b   : > { %v1312_v42 = vadd.f32 %v1307_v55, %v1291_v31  ;;  %v2091_v31 = vrot.slane %v2085_v18, 3  ;;  %v5378_v18 = vld [vmem:[#allocation30_spill] sm:$0xff] }
 0x23c   : > { %2054 = vrot.lane.b32.xlu0 %v2051_v58, %s2921_s9  ;;  %1517 = vrot.lane.b32.xlu1 %v1514_v22, %s5337_s12  ;;  %v1401_v58 = vmul.f32 %v3735_v7, %v4172_v43  ;;  %v5376_v22 = vrot.slane %v4220_v59, 3  ;;  %v1390_v7 = vrot.slane %v1384_v48, 2  ;;  %v2072_v59 = vsel %vm435_vm6, %v2070_v62, %v5380_v40  ;;  %v5383_v48 = vld [vmem:[#allocation32_spill] sm:$0xff] }
 0x23d   : > { %1496 = vrot.lane.b32.xlu2 %v1493_v9, %s5337_s12  ;;  %v2093_v63 = vsel %vm453_vm7, %v2091_v31, %v5377_v6  ;;  %v1569_v9 = vmul.f32 %v4602_v27, %v4261_v1  ;;  %v2106_v1 = vmul.f32 %v3797_v8, %v4172_v43  ;;  %v1435_v4 = vmul.f32 %v5383_v48, %v4172_v43  ;;  %v5385_v8 = vld [vmem:[#allocation34_spill] sm:$0xff]  ;;  %v5394_v48 = vld [vmem:[#allocation37_spill] sm:$0xff] }
 0x23e   : > { %v1349_v55 = vpop.permute.xlu1 %1348  ;;  %v1328_v3 = vpop.permute.xlu0 %1327  ;;  %v1407_v28 = vrot.slane %v1401_v58, 3  ;;  %v5386_v58 = vrot.slane %v3781_v37, 4  ;;  %v1590_v40 = vmul.f32 %v4602_v27, %v4249_v45  ;;  %v5392_v45 = vld [vmem:[#allocation39_spill] sm:$0xff] }
 0x23f   : > { %v4619_v34 = vpop.permute.xlu2 %1578  ;;  %v1333_v52 = vadd.f32 %v1328_v3, %v1312_v42  ;;  %v1535_v42 = vsel %vm453_vm7, %v5376_v22, %v1534_v51  ;;  %v5381_v3 = vld [vmem:[#allocation31_spill] sm:$0xff]  ;;  %v1576_v10 = vrot.slane %v1569_v9, 5  ;;  %v1452_v22 = vmul.f32 %v5385_v8, %v4172_v43 }
 0x240   : > { %v5382_v47 = vrot.slane %v5381_v3, 2 }
 0x241   : > { %v1354_v49 = vadd.f32 %v1349_v55, %v1333_v52  ;;  %v5379_v55 = vrot.slane %v5378_v18, 1  ;;  %v1458_v37 = vrot.slane %v1452_v22, 6  ;;  %v5395_v22 = vld [vmem:[#allocation24_spill] sm:$0xff] }
 0x242   : > { %v1392_v52 = vsel %vm435_vm6, %v1390_v7, %v5382_v47  ;;  %v5387_v7 = vrot.slane %v3833_v17, 4  ;;  %v5390_v17 = vrot.slane %v4224_v36, 4  ;;  %v5393_v47 = vrot.slane %v5392_v45, 6 }
 0x243   : > { %v1363_v25 = vadd.f32 %v1361_v39, %v1354_v49  ;;  %v1375_v50 = vsel %vm417_vm5, %v1373_v12, %v5379_v55  ;;  %v5384_v12 = vrot.slane %v3753_v35, 3  ;;  %v1441_v55 = vrot.slane %v1435_v4, 5 }
 0x244   : > { %1538 = vrot.lane.b32.xlu0 %v1535_v42, %s5337_s12  ;;  %2096 = vrot.lane.b32.xlu1 %v2093_v63, %s2921_s9  ;;  %v1555_v42 = vrot.slane %v1548_v57, 4  ;;  %v2112_v63 = vrot.slane %v2106_v1, 4  ;;  %v5388_v35 = vrot.slane %v4270_v16, 5  ;;  %v5391_v16 = vld [vmem:[#allocation36_spill] sm:$0xff]  ;;  %v2127_v4 = vmul.f32 %v5394_v48, %v4172_v43 }
 0x245   : > { %v1380_v20 = vadd.f32 %v1375_v50, %v1363_v25  ;;  %2075 = vrot.lane.b32.xlu2 %v2072_v59, %s2921_s9  ;;  %v1409_v62 = vsel %vm453_vm7, %v1407_v28, %v5384_v12  ;;  %v1424_v25 = vrot.slane %v1418_v44, 4  ;;  %v5389_v59 = vrot.slane %v3785_v5, 5 }
 0x246   : > { %v1495_v51 = vpop.permute.xlu1 %1494  ;;  %v1474_v39 = vpop.permute.xlu0 %1473  ;;  %v2114_v9 = vsel %vm211_vm0, %v2112_v63, %v5387_v7  ;;  %v1577_v44 = vsel %vm488_vm8, %v5388_v35, %v1576_v10  ;;  %v2148_v3 = vmul.f32 %v5391_v16, %v4172_v43  ;;  %v1460_v5 = vsel %vm506_vm9, %v1458_v37, %v5393_v47  ;;  %v5397_v63 = vld [vmem:[#allocation44_spill] sm:$0xff] }
 0x247   : > { %v1397_v49 = vadd.f32 %v1392_v52, %v1380_v20  ;;  %v4656_v31 = vpop.permute.xlu2 %1634  ;;  %v1426_v18 = vsel %vm211_vm0, %v1424_v25, %v5386_v58  ;;  %v1443_v57 = vsel %vm488_vm8, %v1441_v55, %v5389_v59  ;;  %v1556_v20 = vsel %vm211_vm0, %v5390_v17, %v1555_v42 }
 0x248   : > { %v1597_v36 = vrot.slane %v1590_v40, 6  ;;  %v2133_v25 = vrot.slane %v2127_v4, 5  ;;  %v5396_v42 = vrot.slane %v5395_v22, 6  ;;  %v5398_v58 = vrot.slane %v5397_v63, 6 }
 0x249   : > { %v1414_v6 = vadd.f32 %v1409_v62, %v1397_v49  ;;  %v2154_v62 = vrot.slane %v2148_v3, 6  ;;  %v1625_v55 = vmul.f32 %v4602_v27, %v4298_v0  ;;  %v2168_v59 = vstv %s4690_s18  ;;  %v5403_v3 = vld [vmem:[#allocation33_spill] sm:$0xff] }
 0x24a   : > { %v2169_v0 = vmul.f32 %v2168_v59, %v4172_v43  ;;  %v5401_v17 = vstv %s4245_s13  ;;  %v5402_v16 = vrot.slane %v4307_v26, 1  ;;  %v1646_v45 = vmul.f32 %v4602_v27, %v5403_v3  ;;  %s2927_s13 = smov 48  }
 0x24b   : > { %v1431_v50 = vadd.f32 %v1426_v18, %v1414_v6  ;;  %v1598_v6 = vsel %vm506_vm9, %v5396_v42, %v1597_v36  ;;  %v2156_v18 = vsel %vm506_vm9, %v2154_v62, %v5398_v58  ;;  %v5406_v22 = vrot.slane %v4292_v19, 2 }
 0x24c   : > { %2117 = vrot.lane.b32.xlu0 %v2114_v9, %s2921_s9  ;;  %1580 = vrot.lane.b32.xlu1 %v1577_v44, %s5337_s12  ;;  %v1653_v36 = vrot.slane %v1646_v45, 2  ;;  %v5415_v45 = vld [vmem:[#allocation15_spill] sm:$0xff] }
 0x24d   : > { %v1448_v1 = vadd.f32 %v1443_v57, %v1431_v50  ;;  %1559 = vrot.lane.b32.xlu2 %v1556_v20, %s5337_s12  ;;  %v1632_v57 = vrot.slane %v1625_v55, 1  ;;  %v1610_v20 = vmul.f32 %v4529_v29, %v5401_v17  ;;  %v5409_v55 = vld [vmem:[#allocation47_spill] sm:$0xff] }
 0x24e   : > { %v1558_v52 = vpop.permute.xlu1 %1557  ;;  %v1537_v28 = vpop.permute.xlu0 %1536  ;;  %v1654_v42 = vsel %vm435_vm6, %v5406_v22, %v1653_v36 }
 0x24f   : > { %v1465_v49 = vadd.f32 %v1460_v5, %v1448_v1  ;;  %v1698_v10 = vpop.permute.xlu2 %1697  ;;  %v5404_v5 = vld [vmem:[#allocation38_spill] sm:$0xff] }
 0x251   : > { %v1479_v12 = vadd.f32 %v1474_v39, %v1465_v49  ;;  %v5399_v39 = vld [vmem:[#allocation45_spill] sm:$0xff] }
 0x252   : > { %v5400_v50 = vrot.slane %v5399_v39, 5 }
 0x253   : > { %v1500_v8 = vadd.f32 %v1495_v51, %v1479_v12 }
 0x254   : > { %1601 = vrot.lane.b32.xlu0 %v1598_v6, %s5337_s12  ;;  %2159 = vrot.lane.b32.xlu1 %v2156_v18, %s2921_s9  ;;  %v2135_v51 = vsel %vm488_vm8, %v2133_v25, %v5400_v50  ;;  %v5407_v6 = vld [vmem:[#allocation46_spill] sm:$0xff]  ;;  %v1688_v18 = vmul.f32 %v4602_v27, %v4321_v46  ;;  %v5411_v50 = vld [vmem:[#allocation23_spill] sm:$0xff]  ;;  %s2926_s12 = smov 80  }
 0x255   : > { %v1521_v7 = vadd.f32 %v4594_v53, %v1500_v8  ;;  %2138 = vrot.lane.b32.xlu2 %v2135_v51, %s2921_s9  ;;  %v1633_v53 = vsel %vm417_vm5, %v5402_v16, %v1632_v57  ;;  %v5408_v63 = vrot.slane %v5407_v6, 2  ;;  %v1667_v19 = vmul.f32 %v4602_v27, %v5411_v50  ;;  %v5413_v16 = vld [vmem:[#allocation48_spill] sm:$0xff] }
 0x256   : > { %v1614_v9 = vpop.permute.xlu1 %1613  ;;  %v1600_v35 = vpop.permute.xlu0 %1599 }
 0x257   : > { %v1542_v44 = vadd.f32 %v1537_v28, %v1521_v7  ;;  %v1740_v40 = vpop.permute.xlu2 %1739  ;;  %v5412_v7 = vld [vmem:[#allocation41_spill] sm:$0xff]  ;;  %v1674_v17 = vrot.slane %v1667_v19, 3 }
 0x259   : > { %v1563_v37 = vadd.f32 %v1558_v52, %v1542_v44  ;;  %v2204_v52 = vmul.f32 %v5404_v5, %v4172_v43 }
 0x25b   : > { %v1584_v1 = vadd.f32 %v4619_v34, %v1563_v37  ;;  %v5405_v34 = vld [vmem:[#allocation40_spill] sm:$0xff]  ;;  %v2210_v62 = vrot.slane %v2204_v52, 2 }
 0x25c   : > { %2173 = vrot.lane.b32.xlu0 %v2169_v0, %s2922_s27  ;;  %1636 = vrot.lane.b32.xlu1 %v1633_v53, %s5343_s7  ;;  %v2183_v26 = vmul.f32 %v5405_v34, %v4172_v43  ;;  %v1695_v0 = vrot.slane %v1688_v18, 4  ;;  %v5414_v53 = vrot.slane %v5413_v16, 3  ;;  %v5422_v18 = vld [vmem:[#allocation14_spill] sm:$0xff] }
 0x25d   : > { %v1605_v47 = vadd.f32 %v1600_v35, %v1584_v1  ;;  %1615 = vrot.lane.b32.xlu2 %v1610_v20, %s5343_s7  ;;  %v2212_v58 = vsel %vm435_vm6, %v2210_v62, %v5408_v63 }
 0x25e   : > { %v1677_v28 = vpop.permute.xlu1 %1676  ;;  %v1656_v48 = vpop.permute.xlu0 %1655  ;;  %v2189_v25 = vrot.slane %v2183_v26, 1  ;;  %v5420_v26 = vld [vmem:[#allocation42_spill] sm:$0xff] }
 0x25f   : > { %v1619_v4 = vadd.f32 %v1614_v9, %v1605_v47  ;;  %v1246_v49 = vpop.permute.xlu2 %1245  ;;  %v2225_v9 = vmul.f32 %v5412_v7, %v4172_v43  ;;  %v5416_v47 = vrot.slane %v5415_v45, 4 }
 0x261   : > { %v1640_v12 = vadd.f32 %v4656_v31, %v1619_v4  ;;  %v5410_v31 = vrot.slane %v5409_v55, 1  ;;  %v2231_v1 = vrot.slane %v2225_v9, 3  ;;  %v1696_v5 = vsel %vm211_vm0, %v5416_v47, %v1695_v0  ;;  %v5431_v47 = vld [vmem:[#allocation55_spill] sm:$0xff] }
 0x262   : > { %v2267_v4 = vmul.f32 %v5420_v26, %v4172_v43  ;;  %v5423_v55 = vrot.slane %v5422_v18, 5  ;;  %v5436_v26 = vld [vmem:[#allocation17_spill] sm:$0xff] }
 0x263   : > { %v1661_v8 = vadd.f32 %v1656_v48, %v1640_v12  ;;  %v2191_v39 = vsel %vm417_vm5, %v2189_v25, %v5410_v31  ;;  %v2233_v3 = vsel %vm453_vm7, %v2231_v1, %v5414_v53 }
 0x264   : > { %1657 = vrot.lane.b32.xlu0 %v1654_v42, %s5343_s7  ;;  %2215 = vrot.lane.b32.xlu1 %v2212_v58, %s2922_s27  ;;  %v2273_v6 = vrot.slane %v2267_v4, 5  ;;  %v1765_v4 = vmul.f32 %v4602_v27, %v5436_v26  ;;  %v5449_v26 = vld [vmem:[#allocation72_spill] sm:$0xff] }
 0x265   : > { %v1682_v51 = vadd.f32 %v1677_v28, %v1661_v8  ;;  %2194 = vrot.lane.b32.xlu2 %v2191_v39, %s2922_s27  ;;  %v5417_v28 = vld [vmem:[#allocation20_spill] sm:$0xff]  ;;  %v5424_v39 = vld [vmem:[#allocation54_spill] sm:$0xff] }
 0x266   : > { %v1211_v35 = vpop.permute.xlu1 %1210  ;;  %v1719_v44 = vpop.permute.xlu0 %1718  ;;  %v1709_v48 = vmul.f32 %v4602_v27, %v5417_v28  ;;  %v5425_v50 = vrot.slane %v5424_v39, 5  ;;  %v1786_v28 = vmul.f32 %v4602_v27, %v4407_v14  ;;  %v5439_v39 = vld [vmem:[#allocation35_spill] sm:$0xff] }
 0x267   : > { %v1215_v46 = vadd.f32 %v1211_v35, %v4572_v32  ;;  %v4747_v57 = vpop.permute.xlu2 %1795  ;;  %v1703_v37 = vadd.f32 %v1698_v10, %v1682_v51  ;;  %v5418_v32 = vld [vmem:[#allocation21_spill] sm:$0xff]  ;;  %v5428_v35 = vld [vmem:[#allocation26_spill] sm:$0xff] }
 0x268   : > { %v5419_v10 = vrot.slane %v5418_v32, 3  ;;  %v1716_v42 = vrot.slane %v1709_v48, 5  ;;  %v2275_v19 = vsel %vm488_vm8, %v2273_v6, %v5425_v50  ;;  %v5426_v51 = vld [vmem:[#allocation49_spill] sm:$0xff]  ;;  %v5434_v32 = vld [vmem:[#allocation16_spill] sm:$0xff]  ;;  %v5437_v6 = vrot.slane %v4414_v2, 2 }
 0x269   : > { %v1724_v20 = vadd.f32 %v1719_v44, %v1703_v37  ;;  %v5427_v7 = vrot.slane %v5426_v51, 4  ;;  %v5429_v44 = vld [vmem:[#allocation51_spill] sm:$0xff]  ;;  %v1828_v50 = vmul.f32 %v4602_v27, %v4424_v15 }
 0x26a   : > { %v1675_v34 = vsel %vm453_vm7, %v5419_v10, %v1674_v17  ;;  %v1717_v31 = vsel %vm488_vm8, %v5423_v55, %v1716_v42  ;;  %v5435_v10 = vrot.slane %v5434_v32, 6  ;;  %v1849_v55 = vmul.f32 %v4602_v27, %v4451_v11 }
 0x26b   : > { %v1745_v52 = vadd.f32 %v1740_v40, %v1724_v20  ;;  %v5421_v40 = vld [vmem:[#allocation43_spill] sm:$0xff] }
 0x26c   : > { %2236 = vrot.lane.b32.xlu0 %v2233_v3, %s2922_s27  ;;  %1699 = vrot.lane.b32.xlu1 %v1696_v5, %s5343_s7  ;;  %v2246_v62 = vmul.f32 %v5421_v40, %v4172_v43  ;;  %v5430_v3 = vstv %s4350_s10  ;;  %v5432_v5 = vrot.slane %v5431_v47, 6  ;;  %s2929_s10 = smov 112  }
 0x26d   : > { %1678 = vrot.lane.b32.xlu2 %v1675_v34, %s5343_s7  ;;  %v1750_v45 = vmul.f32 %v4529_v29, %v5430_v3 }
 0x26e   : > { %v1754_v36 = vpop.permute.xlu1 %1753  ;;  %v1225_v12 = vpop.permute.xlu0 %1224  ;;  %v2252_v58 = vrot.slane %v2246_v62, 4  ;;  %v1793_v62 = vrot.slane %v1786_v28, 2  ;;  %v5446_v28 = vstv %s4479_s24 }
 0x26f   : > { %v1759_v25 = vadd.f32 %v1754_v36, %v1745_v52  ;;  %v1309_v8 = vpop.permute.xlu2 %1308  ;;  %v1229_v22 = vadd.f32 %v1225_v12, %v1215_v46  ;;  %v2288_v46 = vmul.f32 %v5429_v44, %v4172_v43  ;;  %v5433_v43 = vld [vmem:[#allocation50_spill] sm:$0xff]  ;;  %v5442_v44 = vrot.slane %v4463_v41, 6 }
 0x270   : > { %v2254_v9 = vsel %vm211_vm0, %v2252_v58, %v5427_v7  ;;  %v1807_v48 = vmul.f32 %v4602_v27, %v5433_v43  ;;  %v5438_v58 = vrot.slane %v4405_v24, 3  ;;  %v1890_v43 = vmul.f32 %v4529_v29, %v5446_v28 }
 0x271   : > { %v1250_v63 = vadd.f32 %v1246_v49, %v1229_v22  ;;  %v1730_v49 = vmul.f32 %v4602_v27, %v5428_v35  ;;  %v2294_v53 = vrot.slane %v2288_v46, 6  ;;  %v1772_v22 = vrot.slane %v1765_v4, 1 }
 0x272   : > { %v5441_v35 = vrot.slane %v4472_v13, 5  ;;  %v1926_v46 = vmul.f32 %v4602_v27, %v4485_v21  ;;  %v1362_v21 = vmul.f32 %v4529_v29, %v1360_v23  ;;  %v5450_v4 = vrot.slane %v5449_v26, 2 }
 0x273   : > { %v1737_v16 = vrot.slane %v1730_v49, 6  ;;  %v2296_v52 = vsel %vm506_vm9, %v2294_v53, %v5432_v5 }
 0x274   : > { %1720 = vrot.lane.b32.xlu0 %v1717_v31, %s5343_s7  ;;  %2278 = vrot.lane.b32.xlu1 %v2275_v19, %s2922_s27  ;;  %v1870_v31 = vmul.f32 %v4602_v27, %v4449_v38  ;;  %v1856_v38 = vrot.slane %v1849_v55, 5  ;;  %v1933_v47 = vrot.slane %v1926_v46, 2 }
 0x275   : > { %2257 = vrot.lane.b32.xlu2 %v2254_v9, %s2922_s27  ;;  %v1738_v34 = vsel %vm506_vm9, %v5435_v10, %v1737_v16  ;;  %v1835_v9 = vrot.slane %v1828_v50, 4  ;;  %v5448_v10 = vld [vmem:[#allocation52_spill] sm:$0xff] }
 0x276   : > { %v1267_v37 = vpop.permute.xlu1 %1266  ;;  %v1775_v0 = vpop.permute.xlu0 %1774  ;;  %v1877_v7 = vrot.slane %v1870_v31, 6  ;;  %v1857_v49 = vsel %vm488_vm8, %v5441_v35, %v1856_v38  ;;  %v5459_v35 = vrot.slane %v4543_v60, 3  ;;  %v5462_v60 = vld [vmem:[#allocation57_spill] sm:$0xff] }
 0x277   : > { %v1271_v17 = vadd.f32 %v1267_v37, %v1250_v63  ;;  %v4783_v20 = vpop.permute.xlu2 %1858  ;;  %v4785_v1 = vadd.f32 %v1775_v0, %v1759_v25  ;;  %v1814_v25 = vrot.slane %v1807_v48, 3  ;;  %v1794_v63 = vsel %vm435_vm6, %v5437_v6, %v1793_v62  ;;  %v5443_v37 = vld [vmem:[#allocation18_spill] sm:$0xff]  ;;  %v5454_v6 = vld [vmem:[#allocation53_spill] sm:$0xff] }
 0x278   : > { %v1878_v15 = vsel %vm506_vm9, %v5442_v44, %v1877_v7  ;;  %v1905_v0 = vmul.f32 %v4602_v27, %v5443_v37  ;;  %v5447_v48 = vld [vmem:[#allocation74_spill] sm:$0xff]  ;;  %v5458_v7 = vld [vmem:[#allocation60_spill] sm:$0xff]  ;;  %v5460_v44 = vld [vmem:[#allocation61_spill] sm:$0xff] }
 0x279   : > { %v1815_v18 = vsel %vm453_vm7, %v5438_v58, %v1814_v25  ;;  %v1989_v32 = vmul.f32 %v4602_v27, %v5447_v48  ;;  %v5453_v25 = vld [vmem:[#allocation73_spill] sm:$0xff]  ;;  %v5461_v37 = vld [vmem:[#allocation56_spill] sm:$0xff] }
 0x27a   : > { %v1912_v5 = vrot.slane %v1905_v0, 1 }
 0x27b   : > { %v1996_v55 = vrot.slane %v1989_v32, 5  ;;  %v5466_v32 = vld [vmem:[#allocation66_spill] sm:$0xff] }
 0x27c   : > { %2299 = vrot.lane.b32.xlu0 %v2296_v52, %s2922_s27  ;;  %1755 = vrot.lane.b32.xlu1 %v1750_v45, %s5354_s26 }
 0x27d   : > { %1741 = vrot.lane.b32.xlu2 %v1738_v34, %s5343_s7  ;;  %v1997_v38 = vsel %vm488_vm8, %v1994_v33, %v1996_v55  ;;  %s2928_s7 = smov 96  }
 0x27e   : > { %v4805_v36 = vpop.permute.xlu1 %1816  ;;  %v1288_v12 = vpop.permute.xlu0 %1287 }
 0x27f   : > { %v4807_v14 = vpop.permute.xlu2 %1893  ;;  %v1292_v40 = vadd.f32 %v1288_v12, %v1271_v17  ;;  %v5444_v17 = vld [vmem:[#allocation22_spill] sm:$0xff]  ;;  %v1934_v12 = vsel %vm435_vm6, %v5450_v4, %v1933_v47 }
 0x280   : > { %v5445_v16 = vrot.slane %v5444_v17, 4 }
 0x281   : > { %v1313_v42 = vadd.f32 %v1309_v8, %v1292_v40  ;;  %v5440_v8 = vrot.slane %v5439_v39, 1  ;;  %v5451_v40 = vld [vmem:[#allocation19_spill] sm:$0xff]  ;;  %v5455_v39 = vld [vmem:[#allocation58_spill] sm:$0xff] }
 0x282   : > { %v1836_v13 = vsel %vm211_vm0, %v5445_v16, %v1835_v9  ;;  %v5452_v62 = vrot.slane %v5451_v40, 1 }
 0x283   : > { %v1773_v2 = vsel %vm417_vm5, %v5440_v8, %v1772_v22  ;;  %v1968_v22 = vmul.f32 %v4602_v27, %v5453_v25 }
 0x284   : > { %1797 = vrot.lane.b32.xlu0 %v1794_v63, %s5354_s26  ;;  %1818 = vrot.lane.b32.xlu1 %v1815_v18, %s5354_s26  ;;  %v1913_v23 = vsel %vm417_vm5, %v5452_v62, %v1912_v5 }
 0x285   : > { %1776 = vrot.lane.b32.xlu2 %v1773_v2, %s5354_s26  ;;  %v1975_v31 = vrot.slane %v1968_v22, 4 }
 0x286   : > { %v1330_v24 = vpop.permute.xlu1 %1329  ;;  %v4827_v19 = vpop.permute.xlu0 %1837 }
 0x287   : > { %v1334_v11 = vadd.f32 %v1330_v24, %v1313_v42  ;;  %v4829_v51 = vpop.permute.xlu2 %1956  ;;  %v1947_v42 = vmul.f32 %v4602_v27, %v4521_v54  ;;  %v5456_v24 = vld [vmem:[#allocation59_spill] sm:$0xff]  ;;  %v5457_v54 = vrot.slane %v4533_v61, 4  ;;  %v2030_v61 = vmul.f32 %v4529_v29, %v2028_v30  ;;  %v5463_v30 = vld [vmem:[#allocation62_spill] sm:$0xff] }
 0x289   : > { %v1954_v2 = vrot.slane %v1947_v42, 3  ;;  %v1976_v27 = vsel %vm211_vm0, %v5457_v54, %v1975_v31 }
 0x28c   : > { %1860 = vrot.lane.b32.xlu0 %v1857_v49, %s5354_s26  ;;  %1881 = vrot.lane.b32.xlu1 %v1878_v15, %s5354_s26  ;;  %v1955_v49 = vsel %vm453_vm7, %v5459_v35, %v1954_v2 }
 0x28d   : > { %1839 = vrot.lane.b32.xlu2 %v1836_v13, %s5354_s26  ;;  %v1801_v13 = vadd.f32 %v4747_v57, %v4785_v1  ;;  %v2170_v1 = vmul.f32 %v4529_v29, %v2168_v59  ;;  %v5469_v29 = vld [vmem:[#allocation69_spill] sm:$0xff]  ;;  %s2697_s26 = sshll.u32 %s2974_s2, 3  ;;  %s2483_s2 = scalar_lea.sflag [#allocation7], %s3046_s4 }
 0x28e   : > { %v1880_v41 = vpop.permute.xlu1 %1879  ;;  %v1351_v53 = vpop.permute.xlu0 %1350  ;;  %s2494_s24 = scalar_lea.hbm %s5148_s3, %s2697_s26 }
 0x28f   : > { %v4847_v3 = vpop.permute.xlu2 %2019  ;;  %v1355_v45 = vadd.f32 %v1351_v53, %v1334_v11  ;;  %s2498_s21 = sshll.u32 %s2494_s24, 4  ;;  %s2499_s21 = int_to_ptr.hbm [resolvable:$true] %s2498_s21 }
 0x290   : > { %s2849_s5 = sshra.s32 %s2499_s21, 4  ;;  %s2850_s5 = int_to_ptr.hbm [resolvable:$true] %s2849_s5 }
 0x291   : > { %v1364_v52 = vadd.f32 %v1362_v21, %v1355_v45  ;;  %v1822_v21 = vadd.f32 %v4805_v36, %v1801_v13  ;;  %v5464_v45 = vld [vmem:[#allocation64_spill] sm:$0xff]  ;;  %s2851_s18 = scalar_lea.hbm %s2850_s5, 8  ;;  %p2856_p9 = scmp.lt.s32.totalorder %s2850_s5, %s5148_s3 }
 0x292   : > { %p2852_p1 = scmp.ne.s32.totalorder %s2850_s5, %s2851_s18 }
 0x293   : > { %v1381_v34 = vadd.f32 %v5448_v10, %v1364_v52  ;;  %v1843_v47 = vadd.f32 %v4827_v19, %v1822_v21  ;;  %v5465_v52 = vld [vmem:[#allocation63_spill] sm:$0xff]  ;;  %v5467_v19 = vld [vmem:[#allocation65_spill] sm:$0xff] }
 0x294   : > { %1937 = vrot.lane.b32.xlu1 %v1934_v12, %s2920_s22  ;;  %1916 = vrot.lane.b32.xlu0 %v1913_v23, %s2920_s22  ;;  %p2853_p4 = pnand %p2852_p1, %p3019_p3 }
 0x295   : > { %v1398_v63 = vadd.f32 %v5454_v6, %v1381_v34  ;;  %1895 = vrot.lane.b32.xlu2 %v1890_v43, %s2920_s22  ;;  %v1864_v57 = vadd.f32 %v4783_v20, %v1843_v47  ;;  %v5468_v20 = vld [vmem:[#allocation67_spill] sm:$0xff]  ;;  %v5472_v6 = vld [vmem:[#allocation25_spill] sm:$0xff] }
 0x296   : > { %v1936_v58 = vpop.permute.xlu1 %1935  ;;  %v1915_v18 = vpop.permute.xlu0 %1914  ;;  %p2854_p8 = pneg %p2853_p4 }
 0x297   : > { %v1415_v8 = vadd.f32 %v5455_v39, %v1398_v63  ;;  %v1497_v50 = vpop.permute.xlu2 %1496  ;;  %v1885_v36 = vadd.f32 %v1880_v41, %v1864_v57  ;;  %v5470_v41 = vld [vmem:[#allocation68_spill] sm:$0xff]  ;;  %v5473_v63 = vld [vmem:[#allocation71_spill] sm:$0xff] }
 0x299   : > { %v1432_v11 = vadd.f32 %v5456_v24, %v1415_v8  ;;  %v1899_v26 = vadd.f32 %v4807_v14, %v1885_v36  ;;  %v5471_v14 = vld [vmem:[#allocation70_spill] sm:$0xff] }
 0x29b   : > { %v1449_v9 = vadd.f32 %v5458_v7, %v1432_v11  ;;  %v1920_v40 = vadd.f32 %v1915_v18, %v1899_v26 }
 0x29c   : > { %2000 = vrot.lane.b32.xlu1 %v1997_v38, %s2920_s22  ;;  %1979 = vrot.lane.b32.xlu0 %v1976_v27, %s2920_s22 }
 0x29d   : > { %1958 = vrot.lane.b32.xlu2 %v1955_v49, %s2920_s22  ;;  %v1466_v56 = vadd.f32 %v5460_v44, %v1449_v9  ;;  %v1941_v59 = vadd.f32 %v1936_v58, %v1920_v40 }
 0x29e   : > { %v1999_v15 = vpop.permute.xlu1 %1998  ;;  %v1978_v33 = vpop.permute.xlu0 %1977 }
 0x29f   : > { %v2076_v46 = vpop.permute.xlu2 %2075  ;;  %v1962_v25 = vadd.f32 %v4829_v51, %v1941_v59 }
 0x2a1   : > { %v1983_v42 = vadd.f32 %v1978_v33, %v1962_v25 }
 0x2a3   : > { %v2004_v55 = vadd.f32 %v1999_v15, %v1983_v42 }
 0x2a4   : > { %2056 = vrot.lane.b32.xlu1 %v5461_v37, %s2921_s9  ;;  %2035 = vrot.lane.b32.xlu0 %v2030_v61, %s2921_s9 }
 0x2a5   : > { %2021 = vrot.lane.b32.xlu2 %v5462_v60, %s2920_s22  ;;  %v2025_v31 = vadd.f32 %v4847_v3, %v2004_v55  ;;  %s2923_s22 = smov 16  }
 0x2a6   : > { %v2034_v0 = vpop.permute.xlu1 %2033  ;;  %v1476_v17 = vpop.permute.xlu0 %1475 }
 0x2a7   : > { %v1480_v16 = vadd.f32 %v1476_v17, %v1466_v56  ;;  %v1560_v5 = vpop.permute.xlu2 %1559  ;;  %v2039_v8 = vadd.f32 %v2034_v0, %v2025_v31 }
 0x2a9   : > { %v1501_v53 = vadd.f32 %v1497_v50, %v1480_v16 }
 0x2ac   : > { %2119 = vrot.lane.b32.xlu1 %v5463_v30, %s2921_s9  ;;  %2098 = vrot.lane.b32.xlu0 %v5464_v45, %s2921_s9 }
 0x2ad   : > { %2077 = vrot.lane.b32.xlu2 %v5465_v52, %s2921_s9 }
 0x2ae   : > { %v1518_v28 = vpop.permute.xlu1 %1517  ;;  %v2055_v43 = vpop.permute.xlu0 %2054 }
 0x2af   : > { %v1522_v48 = vadd.f32 %v1518_v28, %v1501_v53  ;;  %v2139_v4 = vpop.permute.xlu2 %2138  ;;  %v2060_v50 = vadd.f32 %v2055_v43, %v2039_v8 }
 0x2b1   : > { %v2081_v24 = vadd.f32 %v2076_v46, %v2060_v50 }
 0x2b4   : > { %2175 = vrot.lane.b32.xlu1 %v2170_v1, %s2922_s27  ;;  %2161 = vrot.lane.b32.xlu0 %v5466_v32, %s2921_s9 }
 0x2b5   : > { %2140 = vrot.lane.b32.xlu2 %v5467_v19, %s2921_s9  ;;  %s2924_s9 = smov 32  }
 0x2b6   : > { %v2097_v10 = vpop.permute.xlu1 %2096  ;;  %v1539_v34 = vpop.permute.xlu0 %1538 }
 0x2b7   : > { %v1543_v12 = vadd.f32 %v1539_v34, %v1522_v48  ;;  %v1616_v22 = vpop.permute.xlu2 %1615  ;;  %v2102_v11 = vadd.f32 %v2097_v10, %v2081_v24 }
 0x2b9   : > { %v1564_v37 = vadd.f32 %v1560_v5, %v1543_v12 }
 0x2bc   : > { %2238 = vrot.lane.b32.xlu1 %v5468_v20, %s2922_s27  ;;  %2217 = vrot.lane.b32.xlu0 %v5469_v29, %s2922_s27 }
 0x2bd   : > { %2196 = vrot.lane.b32.xlu2 %v5470_v41, %s2922_s27 }
 0x2be   : > { %v1581_v62 = vpop.permute.xlu1 %1580  ;;  %v2118_v23 = vpop.permute.xlu0 %2117 }
 0x2bf   : > { %v2195_v39 = vpop.permute.xlu2 %2194  ;;  %v2123_v7 = vadd.f32 %v2118_v23, %v2102_v11  ;;  %v1585_v0 = vadd.f32 %v1581_v62, %v1564_v37 }
 0x2c1   : > { %v2144_v9 = vadd.f32 %v2139_v4, %v2123_v7 }
 0x2c4   : > { %2301 = vrot.lane.b32.xlu1 %v5471_v14, %s2922_s27  ;;  %2280 = vrot.lane.b32.xlu0 %v5472_v6, %s2922_s27 }
 0x2c5   : > { %2259 = vrot.lane.b32.xlu2 %v5473_v63, %s2922_s27  ;;  %s2925_s27 = smov 64  }
 0x2c6   : > { %v2160_v18 = vpop.permute.xlu1 %2159  ;;  %v1602_v58 = vpop.permute.xlu0 %1601 }
 0x2c7   : > { %v1679_v38 = vpop.permute.xlu2 %1678  ;;  %v2165_v35 = vadd.f32 %v2160_v18, %v2144_v9  ;;  %v1606_v46 = vadd.f32 %v1602_v58, %v1585_v0 }
 0x2c9   : > { %v1620_v30 = vadd.f32 %v1616_v22, %v1606_v46 }
 0x2ce   : > { %v1637_v2 = vpop.permute.xlu1 %1636  ;;  %v2174_v51 = vpop.permute.xlu0 %2173 }
 0x2cf   : > { %v2179_v44 = vadd.f32 %v2174_v51, %v2165_v35  ;;  %v2258_v56 = vpop.permute.xlu2 %2257  ;;  %v1641_v47 = vadd.f32 %v1637_v2, %v1620_v30 }
 0x2d1   : > { %v2200_v15 = vadd.f32 %v2195_v39, %v2179_v44 }
 0x2d6   : > { %v2216_v54 = vpop.permute.xlu1 %2215  ;;  %v1658_v27 = vpop.permute.xlu0 %1657 }
 0x2d7   : > { %v2221_v61 = vadd.f32 %v2216_v54, %v2200_v15  ;;  %v1742_v17 = vpop.permute.xlu2 %1741  ;;  %v1662_v28 = vadd.f32 %v1658_v27, %v1641_v47 }
 0x2d9   : > { %v1683_v48 = vadd.f32 %v1679_v38, %v1662_v28 }
 0x2de   : > { %v2237_v49 = vpop.permute.xlu0 %2236  ;;  %v1700_v33 = vpop.permute.xlu1 %1699 }
 0x2df   : > { %v2242_v60 = vadd.f32 %v2237_v49, %v2221_v61  ;;  %v1777_v43 = vpop.permute.xlu2 %1776  ;;  %v1704_v1 = vadd.f32 %v1700_v33, %v1683_v48 }
 0x2e1   : > { %v2263_v13 = vadd.f32 %v2258_v56, %v2242_v60 }
 0x2e6   : > { %v1721_v3 = vpop.permute.xlu0 %1720  ;;  %v2279_v16 = vpop.permute.xlu1 %2278 }
 0x2e7   : > { %v2284_v53 = vadd.f32 %v2279_v16, %v2263_v13  ;;  %v1725_v5 = vadd.f32 %v1721_v3, %v1704_v1  ;;  %v1840_v19 = vpop.permute.xlu2 %1839 }
 0x2e9   : > { %v1746_v10 = vadd.f32 %v1742_v17, %v1725_v5 }
 0x2ee   : > { %v2300_v21 = vpop.permute.xlu0 %2299  ;;  %v1756_v32 = vpop.permute.xlu1 %1755 }
 0x2ef   : > { %v2305_v45 = vadd.f32 %v2300_v21, %v2284_v53  ;;  %v1760_v34 = vadd.f32 %v1756_v32, %v1746_v10  ;;  %v1896_v25 = vpop.permute.xlu2 %1895 }
 0x2f1   : > { %v2689_v52 = vmul.f32 -1.442695, %v2305_v45  ;;  %v1781_v20 = vadd.f32 %v1777_v43, %v1760_v34 }
 0x2f3   : > { %2777 = vpow2.f32 %v2689_v52 }
 0x2f6   : > { %v1819_v40 = vpop.permute.xlu1 %1818  ;;  %v1798_v59 = vpop.permute.xlu0 %1797 }
 0x2f7   : > { %v1802_v23 = vadd.f32 %v1798_v59, %v1781_v20  ;;  %v1959_v8 = vpop.permute.xlu2 %1958 }
 0x2f9   : > { %v2778_v57 = vpop.eup %2777  ;;  %v1823_v42 = vadd.f32 %v1819_v40, %v1802_v23 }
 0x2fa   : > { %v2313_v36 = vadd.f32 1.0, %v2778_v57 }
 0x2fb   : > { %v1844_v58 = vadd.f32 %v1840_v19, %v1823_v42 }
 0x2fc   : > { %2779 = vrcp.f32 %v2313_v36  ;;  %v2326_v29 = vand.u32 2147483648, %v2313_v36  ;;  %v2324_v62 = vand.u32 2147483647, %v2313_v36  ;;  %vm2320_vm11 = vweird.f32 %v2313_v36 }
 0x2fe   : > { %v2327_v14 = vor.u32 1.1754944e-38, %v2326_v29  ;;  %vm2325_vm13 = vcmp.eq.f32.partialorder %v2324_v62, 8.507059e+37  ;;  %v1882_v18 = vpop.permute.xlu1 %1881  ;;  %v1861_v55 = vpop.permute.xlu0 %1860 }
 0x2ff   : > { %v1865_v31 = vadd.f32 %v1861_v55, %v1844_v58  ;;  %v2022_v27 = vpop.permute.xlu2 %2021 }
 0x301   : > { %v1886_v39 = vadd.f32 %v1882_v18, %v1865_v31 }
 0x302   : > { %v2780_v26 = vpop.eup %2779 }
 0x303   : > { %v2316_v4 = vmul.f32 %v2780_v26, %v2313_v36  ;;  %vm2321_vm10 = vweird.f32 %v2780_v26  ;;  %v1900_v50 = vadd.f32 %v1896_v25, %v1886_v39 }
 0x304   : > { %vm2322_vm12 = vmor %vm2320_vm11, %vm2321_vm10 }
 0x305   : > { %v2317_v12 = vsub.f32 1.0, %v2316_v4 }
 0x306   : > { %v1938_v51 = vpop.permute.xlu1 %1937  ;;  %v1917_v24 = vpop.permute.xlu0 %1916 }
 0x307   : > { %v2318_v41 = vmul.f32 %v2780_v26, %v2317_v12  ;;  %v1921_v11 = vadd.f32 %v1917_v24, %v1900_v50  ;;  %v2078_v61 = vpop.permute.xlu2 %2077 }
 0x309   : > { %v2319_v22 = vadd.f32 %v2780_v26, %v2318_v41  ;;  %v1942_v38 = vadd.f32 %v1938_v51, %v1921_v11  ;;  %v2345_v41 = vlaneseq }
 0x30b   : > { %v2323_v6 = vsel %vm2322_vm12, %v2780_v26, %v2319_v22  ;;  %v1963_v9 = vadd.f32 %v1959_v8, %v1942_v38  ;;  %vm4946_vm14 = vcmp.lt.s32.totalorder %v2345_v41, 16  ;;  %vm4956_vm4 = vcmp.ge.s32.totalorder %v2345_v41, 16 }
 0x30c   : > { %v4930_v63 = vsel %vm2325_vm13, %v2327_v14, %v2323_v6  ;;  %vm4961_vm5 = vcmp.lt.s32.totalorder %v2345_v41, 32  ;;  %vm4979_vm7 = vcmp.ge.s32.totalorder %v2345_v41, 32  ;;  %vm4984_vm8 = vcmp.lt.s32.totalorder %v2345_v41, 48 }
 0x30d   : > { %2351 = vst [vmem:[#allocation1] sm:$0xff] %v4930_v63  ;;  %vm2359_vm6 = vmand %vm4956_vm4, %vm4961_vm5  ;;  %vm5009_vm10 = vcmp.ge.s32.totalorder %v2345_v41, 48  ;;  %vm5014_vm11 = vcmp.lt.s32.totalorder %v2345_v41, 64  ;;  %vm5019_vm12 = vcmp.ge.s32.totalorder %v2345_v41, 64  ;;  %vm5024_vm13 = vcmp.lt.s32.totalorder %v2345_v41, 80 }
 0x30e   : > { %v2001_v7 = vpop.permute.xlu1 %2000  ;;  %v1980_v35 = vpop.permute.xlu0 %1979  ;;  %2349 = vst.msk [vmem:[#allocation3] sm:$0x1] %vm4946_vm14, %v4930_v63  ;;  %vm2369_vm9 = vmand %vm4979_vm7, %vm4984_vm8  ;;  %vm5066_vm4 = vcmp.ge.s32.totalorder %v2345_v41, 96  ;;  %vm5071_vm5 = vcmp.lt.s32.totalorder %v2345_v41, 112  ;;  %vm5081_vm7 = vcmp.lt.s32.totalorder %v2345_v41, 128 }
 0x30f   : > { %v1984_v49 = vadd.f32 %v1980_v35, %v1963_v9  ;;  %v2141_v53 = vpop.permute.xlu2 %2140  ;;  %vm2409_vm8 = vmand %vm5066_vm4, %vm5071_vm5 }
 0x311   : > { %v2005_v44 = vadd.f32 %v2001_v7, %v1984_v49 }
 0x313   : > { %v2026_v15 = vadd.f32 %v2022_v27, %v2005_v44 }
 0x314   : > { %v2353_v2 = vld [vmem:[#allocation1 + $0x1] ss:$9 sm:$0xff] }
 0x315   : > { %2361 = vst [vmem:[#allocation1] sm:$0xff] %v4930_v63  ;;  %2354 = vrot.lane.b32.xlu2 %v2353_v2, %s2923_s22 }
 0x316   : > { %v2057_v33 = vpop.permute.xlu1 %2056  ;;  %v2036_v3 = vpop.permute.xlu0 %2035 }
 0x317   : > { %v2040_v37 = vadd.f32 %v2036_v3, %v2026_v15  ;;  %v2197_v48 = vpop.permute.xlu2 %2196 }
 0x319   : > { %v2061_v60 = vadd.f32 %v2057_v33, %v2040_v37 }
 0x31b   : > { %v2082_v16 = vadd.f32 %v2078_v61, %v2061_v60 }
 0x31c   : > { %v2363_v54 = vld [vmem:[#allocation1 + $0x2] ss:$9 sm:$0xff] }
 0x31d   : > { %2371 = vst [vmem:[#allocation1] sm:$0xff] %v4930_v63  ;;  %2364 = vrot.lane.b32.xlu1 %v2363_v54, %s2924_s9 }
 0x31e   : > { %v2120_v17 = vpop.permute.xlu1 %2119  ;;  %v2099_v46 = vpop.permute.xlu0 %2098 }
 0x31f   : > { %v2103_v13 = vadd.f32 %v2099_v46, %v2082_v16  ;;  %v2260_v10 = vpop.permute.xlu2 %2259 }
 0x321   : > { %v2124_v21 = vadd.f32 %v2120_v17, %v2103_v13 }
 0x323   : > { %v2145_v47 = vadd.f32 %v2141_v53, %v2124_v21 }
 0x324   : > { %v4937_v56 = vld [vmem:[#allocation1 + $0x3] ss:$9 sm:$0xff] }
 0x325   : > { %2381 = vst [vmem:[#allocation1] sm:$0xff] %v4930_v63 }
 0x326   : > { %v2176_v45 = vpop.permute.xlu1 %2175  ;;  %v2162_v52 = vpop.permute.xlu0 %2161 }
 0x327   : > { %v2166_v28 = vadd.f32 %v2162_v52, %v2145_v47 }
 0x329   : > { %v2180_v43 = vadd.f32 %v2176_v45, %v2166_v28 }
 0x32b   : > { %v2201_v1 = vadd.f32 %v2197_v48, %v2180_v43 }
 0x32c   : > { %v2383_v0 = vld [vmem:[#allocation1 + $0x4] ss:$9 sm:$0xff] }
 0x32d   : > { %2384 = vrot.lane.b32.xlu2 %v2383_v0, %s2925_s27  ;;  %2391 = vst [vmem:[#allocation1] sm:$0xff] %v4930_v63 }
 0x32e   : > { %v2239_v36 = vpop.permute.xlu1 %2238  ;;  %v2218_v5 = vpop.permute.xlu0 %2217 }
 0x32f   : > { %v2222_v32 = vadd.f32 %v2218_v5, %v2201_v1  ;;  %v2473_v1 = vld [vmem:[%s3052_s8] sm:$0xff] }
 0x331   : > { %v2243_v19 = vadd.f32 %v2239_v36, %v2222_v32 }
 0x333   : > { %v2264_v34 = vadd.f32 %v2260_v10, %v2243_v19 }
 0x334   : > { %v2393_v30 = vld [vmem:[#allocation1 + $0x5] ss:$9 sm:$0xff] }
 0x335   : > { %2394 = vrot.lane.b32.xlu1 %v2393_v30, %s2926_s12  ;;  %2401 = vst [vmem:[#allocation1] sm:$0xff] %v4930_v63 }
 0x336   : > { %v2281_v26 = vpop.permute.xlu0 %2280  ;;  %v2302_v12 = vpop.permute.xlu1 %2301 }
 0x337   : > { %v2285_v4 = vadd.f32 %v2281_v26, %v2264_v34 }
 0x339   : > { %v2306_v40 = vadd.f32 %v2302_v12, %v2285_v4 }
 0x33b   : > { %v2690_v20 = vmul.f32 -1.442695, %v2306_v40 }
 0x33c   : > { %v2403_v57 = vld [vmem:[#allocation1 + $0x6] ss:$9 sm:$0xff] }
 0x33d   : > { %2411 = vst [vmem:[#allocation1] sm:$0xff] %v4930_v63  ;;  %2781 = vpow2.f32 %v2690_v20 }
 0x343   : > { %v2782_v29 = vpop.eup %2781 }
 0x344   : > { %v2314_v59 = vadd.f32 1.0, %v2782_v29  ;;  %v2413_v31 = vld [vmem:[#allocation1 + $0x7] ss:$9 sm:$0xff] }
 0x346   : > { %2783 = vrcp.f32 %v2314_v59  ;;  %v2341_v42 = vand.u32 2147483648, %v2314_v59  ;;  %v2339_v6 = vand.u32 2147483647, %v2314_v59  ;;  %vm2335_vm1 = vweird.f32 %v2314_v59 }
 0x348   : > { %v2342_v58 = vor.u32 1.1754944e-38, %v2341_v42  ;;  %vm2340_vm3 = vcmp.eq.f32.partialorder %v2339_v6, 8.507059e+37 }
 0x34c   : > { %v2784_v23 = vpop.eup %2783 }
 0x34d   : > { %v2331_v25 = vmul.f32 %v2784_v23, %v2314_v59  ;;  %vm2336_vm15 = vweird.f32 %v2784_v23 }
 0x34e   : > { %vm2337_vm2 = vmor %vm2335_vm1, %vm2336_vm15  ;;  %vm5034_vm15 = vcmp.lt.s32.totalorder %v2345_v41, 96 }
 0x34f   : > { %v2332_v22 = vsub.f32 1.0, %v2331_v25  ;;  %vm2379_vm1 = vmand %vm5009_vm10, %vm5014_vm11 }
 0x351   : > { %v2333_v14 = vmul.f32 %v2784_v23, %v2332_v22 }
 0x353   : > { %v2334_v18 = vadd.f32 %v2784_v23, %v2333_v14 }
 0x355   : > { %v2338_v55 = vsel %vm2337_vm2, %v2784_v23, %v2334_v18  ;;  %vm2389_vm2 = vmand %vm5019_vm12, %vm5024_vm13 }
 0x356   : > { %v2343_v39 = vsel %vm2340_vm3, %v2342_v58, %v2338_v55 }
 0x357   : > { %2423 = vst [vmem:[#allocation1] sm:$0xff] %v2343_v39 }
 0x358   : > { %2421 = vst.msk [vmem:[#allocation3 + $0x1] sm:$0x1] %vm4946_vm14, %v2343_v39  ;;  %vm5029_vm14 = vcmp.ge.s32.totalorder %v2345_v41, 80 }
 0x359   : > { %vm2399_vm3 = vmand %vm5029_vm14, %vm5034_vm15 }
 0x35e   : > { %v2425_v2 = vld [vmem:[#allocation1 + $0x1] ss:$9 sm:$0xff] }
 0x35f   : > { %2426 = vrot.lane.b32.xlu0 %v2425_v2, %s2923_s22  ;;  %2430 = vst [vmem:[#allocation1] sm:$0xff] %v2343_v39 }
 0x366   : > { %v2432_v50 = vld [vmem:[#allocation1 + $0x2] ss:$9 sm:$0xff] }
 0x367   : > { %2374 = vrot.lane.b32.xlu0 %v4937_v56, %s2927_s13  ;;  %2433 = vrot.lane.b32.xlu2 %v2432_v50, %s2924_s9  ;;  %2437 = vst [vmem:[#allocation1] sm:$0xff] %v2343_v39  ;;  %s2855_s9 = scalar_lea.hbm %s5148_s3, 16 }
 0x368   : > { %p2857_p10 = scmp.lt.s32.totalorder %s2855_s9, %s2851_s18 }
 0x36a   : > { %p2858_p2 = por %p2857_p10, %p2856_p9 }
 0x36c   : > { %p2859_p11 = pnand %p2858_p2, %p2854_p8 }
 0x36e   : > { %v2439_v24 = vld [vmem:[#allocation1 + $0x3] ss:$9 sm:$0xff] }
 0x36f   : > { %v2355_v51 = vpop.permute.xlu2 %2354  ;;  %2404 = vrot.lane.b32.xlu0 %v2403_v57, %s2928_s7  ;;  %2440 = vrot.lane.b32.xlu1 %v2439_v24, %s2927_s13  ;;  %2444 = vst [vmem:[#allocation1] sm:$0xff] %v2343_v39 }
 0x370   : > { %2360 = vst.msk [vmem:[#allocation3] sm:$0x1] %vm2359_vm6, %v2355_v51 }
 0x376   : > { %v2446_v11 = vld [vmem:[#allocation1 + $0x4] ss:$9 sm:$0xff] }
 0x377   : > { %2447 = vrot.lane.b32.xlu0 %v2446_v11, %s2925_s27  ;;  %2451 = vst [vmem:[#allocation1] sm:$0xff] %v2343_v39 }
 0x37e   : > { %v2453_v27 = vld [vmem:[#allocation1 + $0x5] ss:$9 sm:$0xff] }
 0x37f   : > { %2454 = vrot.lane.b32.xlu2 %v2453_v27, %s2926_s12  ;;  %2458 = vst [vmem:[#allocation1] sm:$0xff] %v2343_v39 }
 0x386   : > { %v2460_v9 = vld [vmem:[#allocation1 + $0x6] ss:$9 sm:$0xff] }
 0x387   : > { %2414 = vrot.lane.b32.xlu2 %v2413_v31, %s2929_s10  ;;  %2461 = vrot.lane.b32.xlu1 %v2460_v9, %s2928_s7  ;;  %2465 = vst [vmem:[#allocation1] sm:$0xff] %v2343_v39  ;;  %v2385_v49 = vpop.permute.xlu2 %2384 }
 0x38e   : > { %v2467_v35 = vld [vmem:[#allocation1 + $0x7] ss:$9 sm:$0xff] }
 0x38f   : > { %v2365_v7 = vpop.permute.xlu1 %2364  ;;  %2468 = vrot.lane.b32.xlu0 %v2467_v35, %s2929_s10 }
 0x390   : > { %2370 = vst.msk [vmem:[#allocation3] sm:$0x1] %vm2369_vm9, %v2365_v7 }
 0x3a7   : > { %v2395_v0 = vpop.permute.xlu1 %2394 }
 0x3c1   : > { %v2434_v44 = vpop.permute.xlu2 %2433 }
 0x3d1   : > { %v2427_v56 = vpop.permute.xlu0 %2426 }
 0x3d2   : > { %2429 = vst.msk [vmem:[#allocation3 + $0x1] sm:$0x1] %vm2359_vm6, %v2427_v56  ;;  %vm5076_vm6 = vcmp.ge.s32.totalorder %v2345_v41, 112 }
 0x3d3   : > { %2436 = vst.msk [vmem:[#allocation3 + $0x1] sm:$0x1] %vm2369_vm9, %v2434_v44  ;;  %vm2419_vm9 = vmand %vm5076_vm6, %vm5081_vm7 }
 0x3d9   : > { %v2375_v17 = vpop.permute.xlu0 %2374  ;;  %v2455_v16 = vpop.permute.xlu2 %2454 }
 0x3da   : > { %2380 = vst.msk [vmem:[#allocation3] sm:$0x1] %vm2379_vm1, %v2375_v17 }
 0x3db   : > { %2390 = vst.msk [vmem:[#allocation3] sm:$0x1] %vm2389_vm2, %v2385_v49 }
 0x3dc   : > { %2400 = vst.msk [vmem:[#allocation3] sm:$0x1] %vm2399_vm3, %v2395_v0 }
 0x3e1   : > { %v2405_v30 = vpop.permute.xlu0 %2404  ;;  %v2441_v45 = vpop.permute.xlu1 %2440 }
 0x3e2   : > { %2410 = vst.msk [vmem:[#allocation3] sm:$0x1] %vm2409_vm8, %v2405_v30  ;;  %v2415_v47 = vpop.permute.xlu2 %2414 }
 0x3e3   : > { %2443 = vst.msk [vmem:[#allocation3 + $0x1] sm:$0x1] %vm2379_vm1, %v2441_v45 }
 0x3e4   : > { %2420 = vst.msk [vmem:[#allocation3] sm:$0x1] %vm2419_vm9, %v2415_v47 }
 0x3e9   : > { %v2448_v52 = vpop.permute.xlu0 %2447 }
 0x3ea   : > { %2450 = vst.msk [vmem:[#allocation3 + $0x1] sm:$0x1] %vm2389_vm2, %v2448_v52 }
 0x3eb   : > { %2457 = vst.msk [vmem:[#allocation3 + $0x1] sm:$0x1] %vm2399_vm3, %v2455_v16 }
 0x3f9   : > { %v2462_v28 = vpop.permute.xlu1 %2461 }
 0x3fa   : > { %2464 = vst.msk [vmem:[#allocation3 + $0x1] sm:$0x1] %vm2409_vm8, %v2462_v28 }
 0x401   : > { %v2469_v43 = vpop.permute.xlu0 %2468 }
 0x402   : > { %2471 = vst.msk [vmem:[#allocation3 + $0x1] sm:$0x1] %vm2419_vm9, %v2469_v43 }
 0x409   : > { %v2472_v48 = vld [vmem:[#allocation3] sm:$0x3] }
 0x40a   : > { %v2476_v57 = vperm.slane %v2472_v48, 1  ;;  %v2475_v36 = vperm.slane %v2472_v48, 0 }
 0x40c   : > { %v2477_v5 = vrot.slane %v2476_v57, 4 }
 0x40e   : > { %v2478_v32 = vsel %vm211_vm0, %v2475_v36, %v2477_v5 }
 0x40f   : > { %v2480_v19 = vmul.f32 %v2478_v32, %v2473_v1 }
 0x411   : > { %2481 = vst [vmem:[%s203_s23] sm:$0xff] %v2480_v19 }
 0x412   : > { %2862 = shalt.err (!%p2859_p11)
}
 0x413   : > { %2704 = dma.vmem_to_hbm [thread:$0]  (%p3019_p3), %s2497_s6, 128, %s2499_s21, %s2483_s2  }
 0x414 PF: > { %s2510_s4 = sand.u32 1, %s2893_s14   ;;  %p5505_p12 = scmp.ge.s32.totalorder %s2905_s17, 2 }
 0x415   : > { %s2511_s13 = scalar_lea.sflag [#allocation7], %s2510_s4 }
 0x416   : > { %p2715_p13 = pnand %p5505_p12, %p2988_p6 }
 0x418   : > { %p2716_p0 = pneg %p2715_p13 }
 0x41a   : > { %2888 = dma.done.wait (%p2716_p0), %s2511_s13, 128  }
 0x41b   : > { %2890 = vsyncadd (%p2716_p0), %s2511_s13, 4294967168  ;;  %p18_p5 = scmp.ge.s32.totalorder %s3004_s25, 4   ;;  %s5506_s14 = smov %s2897_s15 }
 0x41c   : > { %s5507_s15 = smov %s2901_s16  ;;  %s5508_s16 = smov %s3014_s29 }
 0x41d   : > { %s5509_s17 = smov %s3004_s25  ;;  %20 = sbr.rel (!%p18_p5) target bundleno = 8 (0x8), region = 97 }
 0x422   :  { %2517 = vsyncpa [#allocation6], 1 }
 0x423   :  { %2519 = vsyncpa [#allocation6 + $0x1], 1 }
 0x424   :  { %2520 = vsyncpa [#allocation7], 1 }
 0x425   :  { %2522 = vsyncpa [#allocation7 + $0x1], 1 }
 0x426   :  { %2523 = vsyncpa [#allocation8], 1 }
 0x427   :  { %2525 = vsyncpa [#allocation8 + $0x1], 1 }

</bundles_post_ra>
